<compile_context>
chip_gen: v7x
topology: tpu7x:2x2x1
jax: 0.10.0
libtpu: 0.0.40
codegen_flags: <defaults>
</compile_context>

<pallas_src>
import functools
import math

import jax
import jax.numpy as jnp
from jax.experimental import pallas as pl
from jax.experimental.pallas import tpu as pltpu

SELU_ALPHA = 1.6732632423543772
SELU_SCALE = 1.0507009873554805
LN_EPS = 1e-5                    # PyTorch nn.LayerNorm / EncoderLayer default
NEG_INF = -1e30
COMPUTE_DTYPE = jnp.bfloat16     # matmul-input dtype; accumulation is float32


# ------------------------------ in-kernel math ------------------------------ #

def _selu(x):
    return SELU_SCALE * jnp.where(
        x > 0, x, SELU_ALPHA * (jnp.exp(jnp.minimum(x, 0.0)) - 1.0))


def _layer_norm(x, g, b):
    mu = jnp.mean(x, axis=-1, keepdims=True)
    var = jnp.mean((x - mu) ** 2, axis=-1, keepdims=True)
    return (x - mu) * jax.lax.rsqrt(var + LN_EPS) * g + b


def _erf(x):
    # Abramowitz & Stegun 7.1.26 polynomial, max abs error ~1.5e-7.
    a1, a2, a3, a4, a5 = (0.254829592, -0.284496736, 1.421413741,
                          -1.453152027, 1.061405429)
    p = 0.3275911
    sgn = jnp.where(x >= 0, 1.0, -1.0)
    ax = jnp.abs(x)
    t = 1.0 / (1.0 + p * ax)
    poly = ((((a5 * t + a4) * t + a3) * t + a2) * t + a1) * t
    return sgn * (1.0 - poly * jnp.exp(-ax * ax))


def _gelu_exact(x):
    # matches torch F.gelu(approximate='none') up to the erf polynomial error
    return 0.5 * x * (1.0 + _erf(x * (1.0 / math.sqrt(2.0))))


def _mm(a, w, b=None):
    """bf16 matmul with f32 accumulation (+ optional f32 bias)."""
    y = jnp.dot(a.astype(COMPUTE_DTYPE), w.astype(COMPUTE_DTYPE),
                preferred_element_type=jnp.float32)
    return y if b is None else y + b


# ------------------------------ fused kernel -------------------------------- #

def _fused_model_kernel(src_ref, mask_ref, *refs,
                        n_heads, n_layers, n_blocks, bt, seq, scale,
                        has_lin_in):
    """linear_in + n_layers post-LN encoder layers + final LN + output_net
    for one batch tile of `bt` sequences, entirely in VMEM."""
    i = 0
    if has_lin_in:
        liw_ref, lib_ref = refs[i], refs[i + 1]
        i += 2
    (wqkv_ref, bqkv_ref, wo_ref, bo_ref, g1_ref, be1_ref,
     w1_ref, bf1_ref, w2_ref, bf2_ref, g2_ref, be2_ref) = refs[i:i + 12]
    i += 12
    eg_ref, eb_ref = refs[i:i + 2]
    i += 2
    (onw_ref, onb_ref, bw_ref, bb_ref, bg_ref, bbt_ref,
     fw_ref, fb_ref, fg_ref, fbt_ref) = refs[i:i + 10]
    i += 10
    out_ref = refs[i]
    attn_buf = refs[i + 1]                       # VMEM scratch (bt*seq, dm)

    # ---- input block: (bt, seq, d_in) -> (bt*seq, d_in), optional linear_in
    x = src_ref[...].reshape(bt * seq, -1).astype(jnp.float32)
    if has_lin_in:
        x = _mm(x, liw_ref[...], lib_ref[...])   # (bt*seq, dm)
    dm = x.shape[-1]
    dh = dm // n_heads

    # ---- key-padding bias, built once per tile, reused by every layer
    mask = mask_ref[0]                           # (bt, seq) int32, 1 = pad
    biases = [
        jnp.where(mask[b:b + 1, :] != 0,
                  jnp.float32(NEG_INF), jnp.float32(0.0))
        for b in range(bt)
    ]

    # ---- transformer encoder layers (post-LN, GELU FFN)
    for l in range(n_layers):
        qkv = _mm(x, wqkv_ref[l], bqkv_ref[l])   # (bt*seq, 3*dm), full-M matmul
        wo = wo_ref[l].astype(COMPUTE_DTYPE)     # (dm, dm)
        for b in range(bt):                      # attention per sequence
            r0 = b * seq
            q = qkv[r0:r0 + seq, 0 * dm:1 * dm]
            k = qkv[r0:r0 + seq, 1 * dm:2 * dm]
            v = qkv[r0:r0 + seq, 2 * dm:3 * dm]
            acc = jnp.zeros((seq, dm), jnp.float32)
            for h in range(n_heads):             # accumulate out-proj, no concat
                c0 = h * dh
                qh = q[:, c0:c0 + dh].astype(COMPUTE_DTYPE)
                kh = k[:, c0:c0 + dh].astype(COMPUTE_DTYPE)
                vh = v[:, c0:c0 + dh].astype(COMPUTE_DTYPE)
                s = jax.lax.dot_general(qh, kh, (((1,), (1,)), ((), ())),
                                        preferred_element_type=jnp.float32)
                s = s * scale + biases[b]
                m = jnp.max(s, axis=-1, keepdims=True)
                p = jnp.exp(s - m)
                # NOTE: a fully key-masked row attends uniformly to padding
                # (same garbage as torch); callers keep >=1 valid key per row.
                p = p * pl.reciprocal(jnp.sum(p, axis=-1, keepdims=True),
                                      approx=True)
                head = jnp.dot(p.astype(COMPUTE_DTYPE), vh,
                               preferred_element_type=jnp.float32)
                acc = acc + jnp.dot(head.astype(COMPUTE_DTYPE),
                                    wo[c0:c0 + dh, :],
                                    preferred_element_type=jnp.float32)
            attn_buf[r0:r0 + seq, :] = acc
        attn = attn_buf[...] + bo_ref[l]

        h1 = _layer_norm(x + attn, g1_ref[l], be1_ref[l])
        ff = _gelu_exact(_mm(h1, w1_ref[l], bf1_ref[l]))
        ff = _mm(ff, w2_ref[l], bf2_ref[l])
        x = _layer_norm(h1 + ff, g2_ref[l], be2_ref[l])

    # ---- final encoder LayerNorm + output_net (all skip blocks unrolled)
    x = _layer_norm(x, eg_ref[...], eb_ref[...])
    hdn = _selu(_mm(x, onw_ref[...], onb_ref[...]))
    for j in range(n_blocks):
        t = _layer_norm(_mm(hdn, bw_ref[j], bb_ref[j]), bg_ref[j], bbt_ref[j])
        hdn = _selu(t) + hdn                     # SkipConnection
    y = _mm(hdn, fw_ref[...], fb_ref[...])
    y = _layer_norm(y, fg_ref[...], fbt_ref[...])
    out_ref[...] = y.reshape(bt, seq, -1)


# ------------------------------ pallas wrapper ------------------------------ #

def _const_index_map(ndim):
    return lambda i: (0,) * ndim


def _pick_batch_tile(n, seq, target_rows=256):
    """Sequences per grid step: aim for >=target_rows rows per step, but keep
    >=2 grid tiles when the batch allows it (v7x has 2 TensorCores)."""
    bt = max(1, min(n, target_rows // max(seq, 1)))
    if n >= 2 and (n + bt - 1) // bt < 2:
        bt = (n + 1) // 2
    return bt


def transformer_enc_only_forward(params, src, src_key_padding_mask=None, *,
                                 n_heads):
    """Eval-mode forward of TransformerEncOnlyModel. src: (N, S, d_in) f32.
    src_key_padding_mask: optional (N, S) bool, True = padded key."""
    N, S, d_in = src.shape
    lp = params["layers"]
    n_layers, d_model = lp["wqkv"].shape[0], lp["wqkv"].shape[1]
    on = params["output_net"]
    n_blocks = on["block_w"].shape[0]
    n_out = on["final_w"].shape[1]
    has_lin_in = params["linear_in_w"] is not None
    scale = 1.0 / math.sqrt(d_model // n_heads)

    bt = _pick_batch_tile(N, S)
    num_tiles = -(-N // bt)
    n_pad = num_tiles * bt

    srcp = src.astype(jnp.float32)
    if n_pad != N:
        srcp = jnp.pad(srcp, ((0, n_pad - N), (0, 0), (0, 0)))

    if src_key_padding_mask is None:
        mask_i32 = jnp.zeros((n_pad, S), jnp.int32)
    else:
        mask_i32 = src_key_padding_mask.astype(jnp.int32)
        if n_pad != N:
            mask_i32 = jnp.pad(mask_i32, ((0, n_pad - N), (0, 0)))
    mask3d = mask_i32.reshape(num_tiles, bt, S)

    # Flat, fixed-order weight list (per-layer weights are pre-stacked (L,...)).
    weights = []
    if has_lin_in:
        weights += [params["linear_in_w"], params["linear_in_b"]]
    weights += [lp["wqkv"], lp["bqkv"], lp["wo"], lp["bo"], lp["g1"], lp["b1"],
                lp["w1"], lp["bf1"], lp["w2"], lp["bf2"], lp["g2"], lp["b2"]]
    weights += [params["final_norm_g"], params["final_norm_b"]]
    weights += [on["in_w"], on["in_b"], on["block_w"], on["block_b"],
                on["block_g"], on["block_beta"],
                on["final_w"], on["final_b"], on["final_g"], on["final_beta"]]

    in_specs = [
        pl.BlockSpec((bt, S, d_in), lambda i: (i, 0, 0)),
        pl.BlockSpec((1, bt, S), lambda i: (i, 0, 0)),
    ]
    for w in weights:
        in_specs.append(pl.BlockSpec(w.shape, _const_index_map(w.ndim)))

    kernel = functools.partial(
        _fused_model_kernel, n_heads=n_heads, n_layers=n_layers,
        n_blocks=n_blocks, bt=bt, seq=S, scale=scale, has_lin_in=has_lin_in)

    out = pl.pallas_call(
        kernel,
        out_shape=jax.ShapeDtypeStruct((n_pad, S, n_out), jnp.float32),
        grid=(num_tiles,),
        in_specs=in_specs,
        out_specs=pl.BlockSpec((bt, S, n_out), lambda i: (i, 0, 0)),
        scratch_shapes=[pltpu.VMEM((bt * S, d_model), jnp.float32)],
        compiler_params=pltpu.CompilerParams(
            dimension_semantics=("parallel",)),
    )(srcp, mask3d, *weights)

    return out[:N] if n_pad != N else out


# ------------------------------ parameter init ------------------------------ #

def _init_linear(key, d_in, d_out):
    k1, k2 = jax.random.split(key)
    s = 1.0 / math.sqrt(d_in)
    w = jax.random.uniform(k1, (d_in, d_out), jnp.float32, -s, s)
    b = jax.random.uniform(k2, (1, d_out), jnp.float32, -s, s)
    return w, b


def init_model(key, d_in, d_model, n_heads, d_hid, n_layers, n_outputs,
               n_layers_output=4):
    assert d_model >= d_in and d_model % n_heads == 0
    keys = jax.random.split(key, n_layers + 2)

    if d_model > d_in:
        lin_w, lin_b = _init_linear(keys[0], d_in, d_model)
    else:
        lin_w, lin_b = None, None

    per = []
    for i in range(n_layers):
        k = jax.random.split(keys[1 + i], 4)
        wqkv, bqkv = _init_linear(k[0], d_model, 3 * d_model)
        wo, bo = _init_linear(k[1], d_model, d_model)
        w1, bf1 = _init_linear(k[2], d_model, d_hid)
        w2, bf2 = _init_linear(k[3], d_hid, d_model)
        per.append((wqkv, bqkv, wo, bo, w1, bf1, w2, bf2))

    def stack(idx):
        return jnp.stack([p[idx] for p in per])

    ones_dm = jnp.ones((n_layers, 1, d_model), jnp.float32)
    zeros_dm = jnp.zeros((n_layers, 1, d_model), jnp.float32)
    layers = dict(
        wqkv=stack(0), bqkv=stack(1), wo=stack(2), bo=stack(3),
        g1=ones_dm, b1=zeros_dm,
        w1=stack(4), bf1=stack(5), w2=stack(6), bf2=stack(7),
        g2=ones_dm, b2=zeros_dm)

    kout = jax.random.split(keys[-1], n_layers_output + 2)
    in_w, in_b = _init_linear(kout[0], d_model, d_hid)
    blk = [_init_linear(kout[1 + i], d_hid, d_hid) for i in range(n_layers_output)]
    fw, fb = _init_linear(kout[-1], d_hid, n_outputs)
    output_net = dict(
        in_w=in_w, in_b=in_b,
        block_w=jnp.stack([w for w, _ in blk]),
        block_b=jnp.stack([b for _, b in blk]),
        block_g=jnp.ones((n_layers_output, 1, d_hid), jnp.float32),
        block_beta=jnp.zeros((n_layers_output, 1, d_hid), jnp.float32),
        final_w=fw, final_b=fb,
        final_g=jnp.ones((1, n_outputs), jnp.float32),
        final_beta=jnp.zeros((1, n_outputs), jnp.float32))

    return dict(
        linear_in_w=lin_w, linear_in_b=lin_b,
        layers=layers,
        final_norm_g=jnp.ones((1, d_model), jnp.float32),
        final_norm_b=jnp.zeros((1, d_model), jnp.float32),
        output_net=output_net)


# ---------------------------------- main ------------------------------------ #

if __name__ == "__main__":
    d_in, d_model, n_heads, d_hid = 32, 64, 4, 32
    n_layers, n_outputs, n_layers_output = 2, 8, 4
    N, S = 2, 8

    key = jax.random.PRNGKey(0)
    kp, kx = jax.random.split(key)
    params = init_model(kp, d_in, d_model, n_heads, d_hid, n_layers,
                        n_outputs, n_layers_output)

    src = jax.random.normal(kx, (N, S, d_in), jnp.float32)
    lengths = jnp.array([S, S - 3])                                  # batch 1: 3 padded keys
    src_key_padding_mask = jnp.arange(S)[None, :] >= lengths[:, None]  # True = pad

    fwd = jax.jit(functools.partial(transformer_enc_only_forward,
                                    n_heads=n_heads))
    out = fwd(params, src, src_key_padding_mask)
    jax.block_until_ready(out)

    assert out.shape == (N, S, n_outputs)
    assert not bool(jnp.isnan(out).any())
    print("KERNEL_OK")
</pallas_src>

<mosaic_0001>
module attributes {stable_mosaic.version = 11 : i64} {
  func.func @_fused_model_kernel(%arg0: i32, %arg1: memref<1x8x32xf32, #tpu.memory_space<vmem>>, %arg2: memref<1x1x8xi32, #tpu.memory_space<vmem>>, %arg3: memref<32x64xf32, #tpu.memory_space<vmem>>, %arg4: memref<1x64xf32, #tpu.memory_space<vmem>>, %arg5: memref<2x64x192xf32, #tpu.memory_space<vmem>>, %arg6: memref<2x1x192xf32, #tpu.memory_space<vmem>>, %arg7: memref<2x64x64xf32, #tpu.memory_space<vmem>>, %arg8: memref<2x1x64xf32, #tpu.memory_space<vmem>>, %arg9: memref<2x1x64xf32, #tpu.memory_space<vmem>>, %arg10: memref<2x1x64xf32, #tpu.memory_space<vmem>>, %arg11: memref<2x64x32xf32, #tpu.memory_space<vmem>>, %arg12: memref<2x1x32xf32, #tpu.memory_space<vmem>>, %arg13: memref<2x32x64xf32, #tpu.memory_space<vmem>>, %arg14: memref<2x1x64xf32, #tpu.memory_space<vmem>>, %arg15: memref<2x1x64xf32, #tpu.memory_space<vmem>>, %arg16: memref<2x1x64xf32, #tpu.memory_space<vmem>>, %arg17: memref<1x64xf32, #tpu.memory_space<vmem>>, %arg18: memref<1x64xf32, #tpu.memory_space<vmem>>, %arg19: memref<64x32xf32, #tpu.memory_space<vmem>>, %arg20: memref<1x32xf32, #tpu.memory_space<vmem>>, %arg21: memref<4x32x32xf32, #tpu.memory_space<vmem>>, %arg22: memref<4x1x32xf32, #tpu.memory_space<vmem>>, %arg23: memref<4x1x32xf32, #tpu.memory_space<vmem>>, %arg24: memref<4x1x32xf32, #tpu.memory_space<vmem>>, %arg25: memref<32x8xf32, #tpu.memory_space<vmem>>, %arg26: memref<1x8xf32, #tpu.memory_space<vmem>>, %arg27: memref<1x8xf32, #tpu.memory_space<vmem>>, %arg28: memref<1x8xf32, #tpu.memory_space<vmem>>, %arg29: memref<1x8x8xf32, #tpu.memory_space<vmem>>, %arg30: memref<8x64xf32, #tpu.memory_space<vmem>>) attributes {dimension_semantics = [#tpu.dimension_semantics<parallel>], iteration_bounds = array<i64: 2>, scalar_prefetch = 0 : i64, scratch_operands = 1 : i64, tpu.core_type = #tpu.core_type<tc>, window_params = [{transform_indices = @transform_0, window_bounds = array<i64: 1, 8, 32>}, {transform_indices = @transform_1, window_bounds = array<i64: 1, 1, 8>}, {pipeline_mode = #tpu.pipeline_mode<synchronous>, transform_indices = @transform_2, window_bounds = array<i64: 32, 64>}, {pipeline_mode = #tpu.pipeline_mode<synchronous>, transform_indices = @transform_3, window_bounds = array<i64: 1, 64>}, {pipeline_mode = #tpu.pipeline_mode<synchronous>, transform_indices = @transform_4, window_bounds = array<i64: 2, 64, 192>}, {pipeline_mode = #tpu.pipeline_mode<synchronous>, transform_indices = @transform_5, window_bounds = array<i64: 2, 1, 192>}, {pipeline_mode = #tpu.pipeline_mode<synchronous>, transform_indices = @transform_6, window_bounds = array<i64: 2, 64, 64>}, {pipeline_mode = #tpu.pipeline_mode<synchronous>, transform_indices = @transform_7, window_bounds = array<i64: 2, 1, 64>}, {pipeline_mode = #tpu.pipeline_mode<synchronous>, transform_indices = @transform_8, window_bounds = array<i64: 2, 1, 64>}, {pipeline_mode = #tpu.pipeline_mode<synchronous>, transform_indices = @transform_9, window_bounds = array<i64: 2, 1, 64>}, {pipeline_mode = #tpu.pipeline_mode<synchronous>, transform_indices = @transform_10, window_bounds = array<i64: 2, 64, 32>}, {pipeline_mode = #tpu.pipeline_mode<synchronous>, transform_indices = @transform_11, window_bounds = array<i64: 2, 1, 32>}, {pipeline_mode = #tpu.pipeline_mode<synchronous>, transform_indices = @transform_12, window_bounds = array<i64: 2, 32, 64>}, {pipeline_mode = #tpu.pipeline_mode<synchronous>, transform_indices = @transform_13, window_bounds = array<i64: 2, 1, 64>}, {pipeline_mode = #tpu.pipeline_mode<synchronous>, transform_indices = @transform_14, window_bounds = array<i64: 2, 1, 64>}, {pipeline_mode = #tpu.pipeline_mode<synchronous>, transform_indices = @transform_15, window_bounds = array<i64: 2, 1, 64>}, {pipeline_mode = #tpu.pipeline_mode<synchronous>, transform_indices = @transform_16, window_bounds = array<i64: 1, 64>}, {pipeline_mode = #tpu.pipeline_mode<synchronous>, transform_indices = @transform_17, window_bounds = array<i64: 1, 64>}, {pipeline_mode = #tpu.pipeline_mode<synchronous>, transform_indices = @transform_18, window_bounds = array<i64: 64, 32>}, {pipeline_mode = #tpu.pipeline_mode<synchronous>, transform_indices = @transform_19, window_bounds = array<i64: 1, 32>}, {pipeline_mode = #tpu.pipeline_mode<synchronous>, transform_indices = @transform_20, window_bounds = array<i64: 4, 32, 32>}, {pipeline_mode = #tpu.pipeline_mode<synchronous>, transform_indices = @transform_21, window_bounds = array<i64: 4, 1, 32>}, {pipeline_mode = #tpu.pipeline_mode<synchronous>, transform_indices = @transform_22, window_bounds = array<i64: 4, 1, 32>}, {pipeline_mode = #tpu.pipeline_mode<synchronous>, transform_indices = @transform_23, window_bounds = array<i64: 4, 1, 32>}, {pipeline_mode = #tpu.pipeline_mode<synchronous>, transform_indices = @transform_24, window_bounds = array<i64: 32, 8>}, {pipeline_mode = #tpu.pipeline_mode<synchronous>, transform_indices = @transform_25, window_bounds = array<i64: 1, 8>}, {pipeline_mode = #tpu.pipeline_mode<synchronous>, transform_indices = @transform_26, window_bounds = array<i64: 1, 8>}, {pipeline_mode = #tpu.pipeline_mode<synchronous>, transform_indices = @transform_27, window_bounds = array<i64: 1, 8>}, {transform_indices = @transform_28, window_bounds = array<i64: 1, 8, 8>}]} {
    %c0 = arith.constant 0 : index
    %c0_0 = arith.constant 0 : index
    %c0_1 = arith.constant 0 : index
    %0 = vector.load %arg1[%c0, %c0_0, %c0_1] : memref<1x8x32xf32, #tpu.memory_space<vmem>>, vector<1x8x32xf32>
    %1 = vector.shape_cast %0 : vector<1x8x32xf32> to vector<8x32xf32>
    %c0_2 = arith.constant 0 : index
    %c0_3 = arith.constant 0 : index
    %2 = vector.load %arg3[%c0_2, %c0_3] : memref<32x64xf32, #tpu.memory_space<vmem>>, vector<32x64xf32>
    %c0_4 = arith.constant 0 : index
    %c0_5 = arith.constant 0 : index
    %3 = vector.load %arg4[%c0_4, %c0_5] : memref<1x64xf32, #tpu.memory_space<vmem>>, vector<1x64xf32>
    %4 = arith.truncf %1 : vector<8x32xf32> to vector<8x32xbf16>
    %5 = arith.truncf %2 : vector<32x64xf32> to vector<32x64xbf16>
    %cst = arith.constant dense<0.000000e+00> : vector<8x64xf32>
    %6 = tpu.matmul %4, %5, %cst {dimension_numbers = #tpu.dot_dimension_numbers<[1], [0], [0], [1], [0, 0, 1, 1], [], []>} : vector<8x32xbf16>, vector<32x64xbf16>, vector<8x64xf32> -> vector<8x64xf32>
    %7 = vector.broadcast %3 : vector<1x64xf32> to vector<8x64xf32>
    %8 = arith.addf %6, %7 : vector<8x64xf32>
    %c0_6 = arith.constant 0 : index
    %c0_7 = arith.constant 0 : index
    %c0_8 = arith.constant 0 : index
    %9 = vector.load %arg2[%c0_6, %c0_7, %c0_8] : memref<1x1x8xi32, #tpu.memory_space<vmem>>, vector<1x1x8xi32>
    %10 = vector.shape_cast %9 : vector<1x1x8xi32> to vector<1x8xi32>
    %c0_i32 = arith.constant 0 : i32
    %11 = vector.broadcast %c0_i32 : i32 to vector<1x8xi32>
    %12 = arith.cmpi ne, %10, %11 : vector<1x8xi32>
    %cst_9 = arith.constant -1.000000e+30 : f32
    %cst_10 = arith.constant 0.000000e+00 : f32
    %13 = vector.broadcast %cst_9 : f32 to vector<1x8xf32>
    %14 = vector.broadcast %cst_10 : f32 to vector<1x8xf32>
    %15 = arith.select %12, %13, %14 : vector<1x8xi1>, vector<1x8xf32>
    %c0_11 = arith.constant 0 : index
    %c0_12 = arith.constant 0 : index
    %c0_13 = arith.constant 0 : index
    %16 = vector.load %arg5[%c0_11, %c0_12, %c0_13] : memref<2x64x192xf32, #tpu.memory_space<vmem>>, vector<1x64x192xf32>
    %17 = vector.shape_cast %16 : vector<1x64x192xf32> to vector<64x192xf32>
    %c0_14 = arith.constant 0 : index
    %c0_15 = arith.constant 0 : index
    %c0_16 = arith.constant 0 : index
    %18 = vector.load %arg6[%c0_14, %c0_15, %c0_16] : memref<2x1x192xf32, #tpu.memory_space<vmem>>, vector<1x1x192xf32>
    %19 = vector.shape_cast %18 : vector<1x1x192xf32> to vector<1x192xf32>
    %20 = arith.truncf %8 : vector<8x64xf32> to vector<8x64xbf16>
    %21 = arith.truncf %17 : vector<64x192xf32> to vector<64x192xbf16>
    %cst_17 = arith.constant dense<0.000000e+00> : vector<8x192xf32>
    %22 = tpu.matmul %20, %21, %cst_17 {dimension_numbers = #tpu.dot_dimension_numbers<[1], [0], [0], [1], [0, 0, 1, 1], [], []>} : vector<8x64xbf16>, vector<64x192xbf16>, vector<8x192xf32> -> vector<8x192xf32>
    %23 = vector.broadcast %19 : vector<1x192xf32> to vector<8x192xf32>
    %24 = arith.addf %22, %23 : vector<8x192xf32>
    %c0_18 = arith.constant 0 : index
    %c0_19 = arith.constant 0 : index
    %c0_20 = arith.constant 0 : index
    %25 = vector.load %arg7[%c0_18, %c0_19, %c0_20] : memref<2x64x64xf32, #tpu.memory_space<vmem>>, vector<1x64x64xf32>
    %26 = vector.shape_cast %25 : vector<1x64x64xf32> to vector<64x64xf32>
    %27 = arith.truncf %26 : vector<64x64xf32> to vector<64x64xbf16>
    %28 = vector.extract_strided_slice %24 {offsets = [0, 0], sizes = [8, 64], strides = [1, 1]} : vector<8x192xf32> to vector<8x64xf32>
    %29 = vector.extract_strided_slice %24 {offsets = [0, 64], sizes = [8, 64], strides = [1, 1]} : vector<8x192xf32> to vector<8x64xf32>
    %30 = vector.extract_strided_slice %24 {offsets = [0, 128], sizes = [8, 64], strides = [1, 1]} : vector<8x192xf32> to vector<8x64xf32>
    %cst_21 = arith.constant 0.000000e+00 : f32
    %31 = vector.broadcast %cst_21 : f32 to vector<8x64xf32>
    %32 = vector.extract_strided_slice %28 {offsets = [0, 0], sizes = [8, 16], strides = [1, 1]} : vector<8x64xf32> to vector<8x16xf32>
    %33 = arith.truncf %32 : vector<8x16xf32> to vector<8x16xbf16>
    %34 = vector.extract_strided_slice %29 {offsets = [0, 0], sizes = [8, 16], strides = [1, 1]} : vector<8x64xf32> to vector<8x16xf32>
    %35 = arith.truncf %34 : vector<8x16xf32> to vector<8x16xbf16>
    %36 = vector.extract_strided_slice %30 {offsets = [0, 0], sizes = [8, 16], strides = [1, 1]} : vector<8x64xf32> to vector<8x16xf32>
    %37 = arith.truncf %36 : vector<8x16xf32> to vector<8x16xbf16>
    %cst_22 = arith.constant dense<0.000000e+00> : vector<8x8xf32>
    %38 = tpu.matmul %33, %35, %cst_22 {dimension_numbers = #tpu.dot_dimension_numbers<[1], [1], [0], [0], [0, 0, 1, 0], [], []>} : vector<8x16xbf16>, vector<8x16xbf16>, vector<8x8xf32> -> vector<8x8xf32>
    %cst_23 = arith.constant 2.500000e-01 : f32
    %39 = vector.broadcast %cst_23 : f32 to vector<8x8xf32>
    %40 = arith.mulf %38, %39 : vector<8x8xf32>
    %41 = vector.broadcast %15 : vector<1x8xf32> to vector<8x8xf32>
    %42 = arith.addf %40, %41 : vector<8x8xf32>
    %cst_24 = arith.constant dense<0xFF800000> : vector<8xf32>
    %43 = vector.multi_reduction <maximumf>, %42, %cst_24 [1] : vector<8x8xf32> to vector<8xf32>
    %44 = vector.shape_cast %43 : vector<8xf32> to vector<8x1xf32>
    %45 = vector.broadcast %44 : vector<8x1xf32> to vector<8x8xf32>
    %46 = arith.subf %42, %45 : vector<8x8xf32>
    %47 = math.exp %46 : vector<8x8xf32>
    %cst_25 = arith.constant dense<0.000000e+00> : vector<8xf32>
    %48 = vector.multi_reduction <add>, %47, %cst_25 [1] : vector<8x8xf32> to vector<8xf32>
    %49 = vector.shape_cast %48 : vector<8xf32> to vector<8x1xf32>
    %50 = tpu.reciprocal %49 {approx = true} : vector<8x1xf32> -> vector<8x1xf32>
    %51 = vector.broadcast %50 : vector<8x1xf32> to vector<8x8xf32>
    %52 = arith.mulf %47, %51 : vector<8x8xf32>
    %53 = arith.truncf %52 : vector<8x8xf32> to vector<8x8xbf16>
    %cst_26 = arith.constant dense<0.000000e+00> : vector<8x16xf32>
    %54 = tpu.matmul %53, %37, %cst_26 {dimension_numbers = #tpu.dot_dimension_numbers<[1], [0], [0], [1], [0, 0, 1, 1], [], []>} : vector<8x8xbf16>, vector<8x16xbf16>, vector<8x16xf32> -> vector<8x16xf32>
    %55 = arith.truncf %54 : vector<8x16xf32> to vector<8x16xbf16>
    %56 = vector.extract_strided_slice %27 {offsets = [0, 0], sizes = [16, 64], strides = [1, 1]} : vector<64x64xbf16> to vector<16x64xbf16>
    %cst_27 = arith.constant dense<0.000000e+00> : vector<8x64xf32>
    %57 = tpu.matmul %55, %56, %cst_27 {dimension_numbers = #tpu.dot_dimension_numbers<[1], [0], [0], [1], [0, 0, 1, 1], [], []>} : vector<8x16xbf16>, vector<16x64xbf16>, vector<8x64xf32> -> vector<8x64xf32>
    %58 = arith.addf %31, %57 : vector<8x64xf32>
    %59 = vector.extract_strided_slice %28 {offsets = [0, 16], sizes = [8, 16], strides = [1, 1]} : vector<8x64xf32> to vector<8x16xf32>
    %60 = arith.truncf %59 : vector<8x16xf32> to vector<8x16xbf16>
    %61 = vector.extract_strided_slice %29 {offsets = [0, 16], sizes = [8, 16], strides = [1, 1]} : vector<8x64xf32> to vector<8x16xf32>
    %62 = arith.truncf %61 : vector<8x16xf32> to vector<8x16xbf16>
    %63 = vector.extract_strided_slice %30 {offsets = [0, 16], sizes = [8, 16], strides = [1, 1]} : vector<8x64xf32> to vector<8x16xf32>
    %64 = arith.truncf %63 : vector<8x16xf32> to vector<8x16xbf16>
    %cst_28 = arith.constant dense<0.000000e+00> : vector<8x8xf32>
    %65 = tpu.matmul %60, %62, %cst_28 {dimension_numbers = #tpu.dot_dimension_numbers<[1], [1], [0], [0], [0, 0, 1, 0], [], []>} : vector<8x16xbf16>, vector<8x16xbf16>, vector<8x8xf32> -> vector<8x8xf32>
    %cst_29 = arith.constant 2.500000e-01 : f32
    %66 = vector.broadcast %cst_29 : f32 to vector<8x8xf32>
    %67 = arith.mulf %65, %66 : vector<8x8xf32>
    %68 = vector.broadcast %15 : vector<1x8xf32> to vector<8x8xf32>
    %69 = arith.addf %67, %68 : vector<8x8xf32>
    %cst_30 = arith.constant dense<0xFF800000> : vector<8xf32>
    %70 = vector.multi_reduction <maximumf>, %69, %cst_30 [1] : vector<8x8xf32> to vector<8xf32>
    %71 = vector.shape_cast %70 : vector<8xf32> to vector<8x1xf32>
    %72 = vector.broadcast %71 : vector<8x1xf32> to vector<8x8xf32>
    %73 = arith.subf %69, %72 : vector<8x8xf32>
    %74 = math.exp %73 : vector<8x8xf32>
    %cst_31 = arith.constant dense<0.000000e+00> : vector<8xf32>
    %75 = vector.multi_reduction <add>, %74, %cst_31 [1] : vector<8x8xf32> to vector<8xf32>
    %76 = vector.shape_cast %75 : vector<8xf32> to vector<8x1xf32>
    %77 = tpu.reciprocal %76 {approx = true} : vector<8x1xf32> -> vector<8x1xf32>
    %78 = vector.broadcast %77 : vector<8x1xf32> to vector<8x8xf32>
    %79 = arith.mulf %74, %78 : vector<8x8xf32>
    %80 = arith.truncf %79 : vector<8x8xf32> to vector<8x8xbf16>
    %cst_32 = arith.constant dense<0.000000e+00> : vector<8x16xf32>
    %81 = tpu.matmul %80, %64, %cst_32 {dimension_numbers = #tpu.dot_dimension_numbers<[1], [0], [0], [1], [0, 0, 1, 1], [], []>} : vector<8x8xbf16>, vector<8x16xbf16>, vector<8x16xf32> -> vector<8x16xf32>
    %82 = arith.truncf %81 : vector<8x16xf32> to vector<8x16xbf16>
    %83 = vector.extract_strided_slice %27 {offsets = [16, 0], sizes = [16, 64], strides = [1, 1]} : vector<64x64xbf16> to vector<16x64xbf16>
    %cst_33 = arith.constant dense<0.000000e+00> : vector<8x64xf32>
    %84 = tpu.matmul %82, %83, %cst_33 {dimension_numbers = #tpu.dot_dimension_numbers<[1], [0], [0], [1], [0, 0, 1, 1], [], []>} : vector<8x16xbf16>, vector<16x64xbf16>, vector<8x64xf32> -> vector<8x64xf32>
    %85 = arith.addf %58, %84 : vector<8x64xf32>
    %86 = vector.extract_strided_slice %28 {offsets = [0, 32], sizes = [8, 16], strides = [1, 1]} : vector<8x64xf32> to vector<8x16xf32>
    %87 = arith.truncf %86 : vector<8x16xf32> to vector<8x16xbf16>
    %88 = vector.extract_strided_slice %29 {offsets = [0, 32], sizes = [8, 16], strides = [1, 1]} : vector<8x64xf32> to vector<8x16xf32>
    %89 = arith.truncf %88 : vector<8x16xf32> to vector<8x16xbf16>
    %90 = vector.extract_strided_slice %30 {offsets = [0, 32], sizes = [8, 16], strides = [1, 1]} : vector<8x64xf32> to vector<8x16xf32>
    %91 = arith.truncf %90 : vector<8x16xf32> to vector<8x16xbf16>
    %cst_34 = arith.constant dense<0.000000e+00> : vector<8x8xf32>
    %92 = tpu.matmul %87, %89, %cst_34 {dimension_numbers = #tpu.dot_dimension_numbers<[1], [1], [0], [0], [0, 0, 1, 0], [], []>} : vector<8x16xbf16>, vector<8x16xbf16>, vector<8x8xf32> -> vector<8x8xf32>
    %cst_35 = arith.constant 2.500000e-01 : f32
    %93 = vector.broadcast %cst_35 : f32 to vector<8x8xf32>
    %94 = arith.mulf %92, %93 : vector<8x8xf32>
    %95 = vector.broadcast %15 : vector<1x8xf32> to vector<8x8xf32>
    %96 = arith.addf %94, %95 : vector<8x8xf32>
    %cst_36 = arith.constant dense<0xFF800000> : vector<8xf32>
    %97 = vector.multi_reduction <maximumf>, %96, %cst_36 [1] : vector<8x8xf32> to vector<8xf32>
    %98 = vector.shape_cast %97 : vector<8xf32> to vector<8x1xf32>
    %99 = vector.broadcast %98 : vector<8x1xf32> to vector<8x8xf32>
    %100 = arith.subf %96, %99 : vector<8x8xf32>
    %101 = math.exp %100 : vector<8x8xf32>
    %cst_37 = arith.constant dense<0.000000e+00> : vector<8xf32>
    %102 = vector.multi_reduction <add>, %101, %cst_37 [1] : vector<8x8xf32> to vector<8xf32>
    %103 = vector.shape_cast %102 : vector<8xf32> to vector<8x1xf32>
    %104 = tpu.reciprocal %103 {approx = true} : vector<8x1xf32> -> vector<8x1xf32>
    %105 = vector.broadcast %104 : vector<8x1xf32> to vector<8x8xf32>
    %106 = arith.mulf %101, %105 : vector<8x8xf32>
    %107 = arith.truncf %106 : vector<8x8xf32> to vector<8x8xbf16>
    %cst_38 = arith.constant dense<0.000000e+00> : vector<8x16xf32>
    %108 = tpu.matmul %107, %91, %cst_38 {dimension_numbers = #tpu.dot_dimension_numbers<[1], [0], [0], [1], [0, 0, 1, 1], [], []>} : vector<8x8xbf16>, vector<8x16xbf16>, vector<8x16xf32> -> vector<8x16xf32>
    %109 = arith.truncf %108 : vector<8x16xf32> to vector<8x16xbf16>
    %110 = vector.extract_strided_slice %27 {offsets = [32, 0], sizes = [16, 64], strides = [1, 1]} : vector<64x64xbf16> to vector<16x64xbf16>
    %cst_39 = arith.constant dense<0.000000e+00> : vector<8x64xf32>
    %111 = tpu.matmul %109, %110, %cst_39 {dimension_numbers = #tpu.dot_dimension_numbers<[1], [0], [0], [1], [0, 0, 1, 1], [], []>} : vector<8x16xbf16>, vector<16x64xbf16>, vector<8x64xf32> -> vector<8x64xf32>
    %112 = arith.addf %85, %111 : vector<8x64xf32>
    %113 = vector.extract_strided_slice %28 {offsets = [0, 48], sizes = [8, 16], strides = [1, 1]} : vector<8x64xf32> to vector<8x16xf32>
    %114 = arith.truncf %113 : vector<8x16xf32> to vector<8x16xbf16>
    %115 = vector.extract_strided_slice %29 {offsets = [0, 48], sizes = [8, 16], strides = [1, 1]} : vector<8x64xf32> to vector<8x16xf32>
    %116 = arith.truncf %115 : vector<8x16xf32> to vector<8x16xbf16>
    %117 = vector.extract_strided_slice %30 {offsets = [0, 48], sizes = [8, 16], strides = [1, 1]} : vector<8x64xf32> to vector<8x16xf32>
    %118 = arith.truncf %117 : vector<8x16xf32> to vector<8x16xbf16>
    %cst_40 = arith.constant dense<0.000000e+00> : vector<8x8xf32>
    %119 = tpu.matmul %114, %116, %cst_40 {dimension_numbers = #tpu.dot_dimension_numbers<[1], [1], [0], [0], [0, 0, 1, 0], [], []>} : vector<8x16xbf16>, vector<8x16xbf16>, vector<8x8xf32> -> vector<8x8xf32>
    %cst_41 = arith.constant 2.500000e-01 : f32
    %120 = vector.broadcast %cst_41 : f32 to vector<8x8xf32>
    %121 = arith.mulf %119, %120 : vector<8x8xf32>
    %122 = vector.broadcast %15 : vector<1x8xf32> to vector<8x8xf32>
    %123 = arith.addf %121, %122 : vector<8x8xf32>
    %cst_42 = arith.constant dense<0xFF800000> : vector<8xf32>
    %124 = vector.multi_reduction <maximumf>, %123, %cst_42 [1] : vector<8x8xf32> to vector<8xf32>
    %125 = vector.shape_cast %124 : vector<8xf32> to vector<8x1xf32>
    %126 = vector.broadcast %125 : vector<8x1xf32> to vector<8x8xf32>
    %127 = arith.subf %123, %126 : vector<8x8xf32>
    %128 = math.exp %127 : vector<8x8xf32>
    %cst_43 = arith.constant dense<0.000000e+00> : vector<8xf32>
    %129 = vector.multi_reduction <add>, %128, %cst_43 [1] : vector<8x8xf32> to vector<8xf32>
    %130 = vector.shape_cast %129 : vector<8xf32> to vector<8x1xf32>
    %131 = tpu.reciprocal %130 {approx = true} : vector<8x1xf32> -> vector<8x1xf32>
    %132 = vector.broadcast %131 : vector<8x1xf32> to vector<8x8xf32>
    %133 = arith.mulf %128, %132 : vector<8x8xf32>
    %134 = arith.truncf %133 : vector<8x8xf32> to vector<8x8xbf16>
    %cst_44 = arith.constant dense<0.000000e+00> : vector<8x16xf32>
    %135 = tpu.matmul %134, %118, %cst_44 {dimension_numbers = #tpu.dot_dimension_numbers<[1], [0], [0], [1], [0, 0, 1, 1], [], []>} : vector<8x8xbf16>, vector<8x16xbf16>, vector<8x16xf32> -> vector<8x16xf32>
    %136 = arith.truncf %135 : vector<8x16xf32> to vector<8x16xbf16>
    %137 = vector.extract_strided_slice %27 {offsets = [48, 0], sizes = [16, 64], strides = [1, 1]} : vector<64x64xbf16> to vector<16x64xbf16>
    %cst_45 = arith.constant dense<0.000000e+00> : vector<8x64xf32>
    %138 = tpu.matmul %136, %137, %cst_45 {dimension_numbers = #tpu.dot_dimension_numbers<[1], [0], [0], [1], [0, 0, 1, 1], [], []>} : vector<8x16xbf16>, vector<16x64xbf16>, vector<8x64xf32> -> vector<8x64xf32>
    %139 = arith.addf %112, %138 : vector<8x64xf32>
    %c0_46 = arith.constant 0 : index
    %c0_47 = arith.constant 0 : index
    %140 = vector.load %arg30[%c0_46, %c0_47] : memref<8x64xf32, #tpu.memory_space<vmem>>, vector<8x64xf32>
    tpu.vector_store %arg30[%c0_46, %c0_47], %139 {strides = array<i32>} : memref<8x64xf32, #tpu.memory_space<vmem>>, vector<8x64xf32>,
    %c0_48 = arith.constant 0 : index
    %c0_49 = arith.constant 0 : index
    %141 = vector.load %arg30[%c0_48, %c0_49] : memref<8x64xf32, #tpu.memory_space<vmem>>, vector<8x64xf32>
    %c0_50 = arith.constant 0 : index
    %c0_51 = arith.constant 0 : index
    %c0_52 = arith.constant 0 : index
    %142 = vector.load %arg8[%c0_50, %c0_51, %c0_52] : memref<2x1x64xf32, #tpu.memory_space<vmem>>, vector<1x1x64xf32>
    %143 = vector.shape_cast %142 : vector<1x1x64xf32> to vector<1x64xf32>
    %144 = vector.broadcast %143 : vector<1x64xf32> to vector<8x64xf32>
    %145 = arith.addf %141, %144 : vector<8x64xf32>
    %146 = arith.addf %8, %145 : vector<8x64xf32>
    %c0_53 = arith.constant 0 : index
    %c0_54 = arith.constant 0 : index
    %c0_55 = arith.constant 0 : index
    %147 = vector.load %arg9[%c0_53, %c0_54, %c0_55] : memref<2x1x64xf32, #tpu.memory_space<vmem>>, vector<1x1x64xf32>
    %148 = vector.shape_cast %147 : vector<1x1x64xf32> to vector<1x64xf32>
    %c0_56 = arith.constant 0 : index
    %c0_57 = arith.constant 0 : index
    %c0_58 = arith.constant 0 : index
    %149 = vector.load %arg10[%c0_56, %c0_57, %c0_58] : memref<2x1x64xf32, #tpu.memory_space<vmem>>, vector<1x1x64xf32>
    %150 = vector.shape_cast %149 : vector<1x1x64xf32> to vector<1x64xf32>
    %cst_59 = arith.constant dense<0.000000e+00> : vector<8xf32>
    %151 = vector.multi_reduction <add>, %146, %cst_59 [1] : vector<8x64xf32> to vector<8xf32>
    %152 = vector.shape_cast %151 : vector<8xf32> to vector<8x1xf32>
    %cst_60 = arith.constant 6.400000e+01 : f32
    %153 = vector.broadcast %cst_60 : f32 to vector<8x1xf32>
    %154 = arith.divf %152, %153 : vector<8x1xf32>
    %155 = vector.broadcast %154 : vector<8x1xf32> to vector<8x64xf32>
    %156 = arith.subf %146, %155 : vector<8x64xf32>
    %157 = arith.mulf %156, %156 : vector<8x64xf32>
    %cst_61 = arith.constant dense<0.000000e+00> : vector<8xf32>
    %158 = vector.multi_reduction <add>, %157, %cst_61 [1] : vector<8x64xf32> to vector<8xf32>
    %159 = vector.shape_cast %158 : vector<8xf32> to vector<8x1xf32>
    %cst_62 = arith.constant 6.400000e+01 : f32
    %160 = vector.broadcast %cst_62 : f32 to vector<8x1xf32>
    %161 = arith.divf %159, %160 : vector<8x1xf32>
    %162 = vector.broadcast %154 : vector<8x1xf32> to vector<8x64xf32>
    %163 = arith.subf %146, %162 : vector<8x64xf32>
    %cst_63 = arith.constant 9.99999974E-6 : f32
    %164 = vector.broadcast %cst_63 : f32 to vector<8x1xf32>
    %165 = arith.addf %161, %164 : vector<8x1xf32>
    %166 = math.rsqrt %165 : vector<8x1xf32>
    %167 = vector.broadcast %166 : vector<8x1xf32> to vector<8x64xf32>
    %168 = arith.mulf %163, %167 : vector<8x64xf32>
    %169 = vector.broadcast %148 : vector<1x64xf32> to vector<8x64xf32>
    %170 = arith.mulf %168, %169 : vector<8x64xf32>
    %171 = vector.broadcast %150 : vector<1x64xf32> to vector<8x64xf32>
    %172 = arith.addf %170, %171 : vector<8x64xf32>
    %c0_64 = arith.constant 0 : index
    %c0_65 = arith.constant 0 : index
    %c0_66 = arith.constant 0 : index
    %173 = vector.load %arg11[%c0_64, %c0_65, %c0_66] : memref<2x64x32xf32, #tpu.memory_space<vmem>>, vector<1x64x32xf32>
    %174 = vector.shape_cast %173 : vector<1x64x32xf32> to vector<64x32xf32>
    %c0_67 = arith.constant 0 : index
    %c0_68 = arith.constant 0 : index
    %c0_69 = arith.constant 0 : index
    %175 = vector.load %arg12[%c0_67, %c0_68, %c0_69] : memref<2x1x32xf32, #tpu.memory_space<vmem>>, vector<1x1x32xf32>
    %176 = vector.shape_cast %175 : vector<1x1x32xf32> to vector<1x32xf32>
    %177 = arith.truncf %172 : vector<8x64xf32> to vector<8x64xbf16>
    %178 = arith.truncf %174 : vector<64x32xf32> to vector<64x32xbf16>
    %cst_70 = arith.constant dense<0.000000e+00> : vector<8x32xf32>
    %179 = tpu.matmul %177, %178, %cst_70 {dimension_numbers = #tpu.dot_dimension_numbers<[1], [0], [0], [1], [0, 0, 1, 1], [], []>} : vector<8x64xbf16>, vector<64x32xbf16>, vector<8x32xf32> -> vector<8x32xf32>
    %180 = vector.broadcast %176 : vector<1x32xf32> to vector<8x32xf32>
    %181 = arith.addf %179, %180 : vector<8x32xf32>
    %cst_71 = arith.constant 5.000000e-01 : f32
    %182 = vector.broadcast %cst_71 : f32 to vector<8x32xf32>
    %183 = arith.mulf %182, %181 : vector<8x32xf32>
    %cst_72 = arith.constant 0.707106769 : f32
    %184 = vector.broadcast %cst_72 : f32 to vector<8x32xf32>
    %185 = arith.mulf %181, %184 : vector<8x32xf32>
    %cst_73 = arith.constant 0.000000e+00 : f32
    %186 = vector.broadcast %cst_73 : f32 to vector<8x32xf32>
    %187 = arith.cmpf oge, %185, %186 : vector<8x32xf32>
    %cst_74 = arith.constant 1.000000e+00 : f32
    %cst_75 = arith.constant -1.000000e+00 : f32
    %188 = vector.broadcast %cst_74 : f32 to vector<8x32xf32>
    %189 = vector.broadcast %cst_75 : f32 to vector<8x32xf32>
    %190 = arith.select %187, %188, %189 : vector<8x32xi1>, vector<8x32xf32>
    %191 = math.absf %185 : vector<8x32xf32>
    %cst_76 = arith.constant 0.327591091 : f32
    %192 = vector.broadcast %cst_76 : f32 to vector<8x32xf32>
    %193 = arith.mulf %192, %191 : vector<8x32xf32>
    %cst_77 = arith.constant 1.000000e+00 : f32
    %194 = vector.broadcast %cst_77 : f32 to vector<8x32xf32>
    %195 = arith.addf %194, %193 : vector<8x32xf32>
    %cst_78 = arith.constant 1.000000e+00 : f32
    %196 = vector.broadcast %cst_78 : f32 to vector<8x32xf32>
    %197 = arith.divf %196, %195 : vector<8x32xf32>
    %cst_79 = arith.constant 1.06140542 : f32
    %198 = vector.broadcast %cst_79 : f32 to vector<8x32xf32>
    %199 = arith.mulf %198, %197 : vector<8x32xf32>
    %cst_80 = arith.constant -1.45315206 : f32
    %200 = vector.broadcast %cst_80 : f32 to vector<8x32xf32>
    %201 = arith.addf %199, %200 : vector<8x32xf32>
    %202 = arith.mulf %201, %197 : vector<8x32xf32>
    %cst_81 = arith.constant 1.42141378 : f32
    %203 = vector.broadcast %cst_81 : f32 to vector<8x32xf32>
    %204 = arith.addf %202, %203 : vector<8x32xf32>
    %205 = arith.mulf %204, %197 : vector<8x32xf32>
    %cst_82 = arith.constant -0.284496725 : f32
    %206 = vector.broadcast %cst_82 : f32 to vector<8x32xf32>
    %207 = arith.addf %205, %206 : vector<8x32xf32>
    %208 = arith.mulf %207, %197 : vector<8x32xf32>
    %cst_83 = arith.constant 0.254829586 : f32
    %209 = vector.broadcast %cst_83 : f32 to vector<8x32xf32>
    %210 = arith.addf %208, %209 : vector<8x32xf32>
    %211 = arith.mulf %210, %197 : vector<8x32xf32>
    %cst_84 = arith.constant 0.000000e+00 : f32
    %212 = vector.broadcast %cst_84 : f32 to vector<8x32xf32>
    %213 = arith.subf %212, %191 : vector<8x32xf32>
    %214 = arith.mulf %213, %191 : vector<8x32xf32>
    %215 = math.exp %214 : vector<8x32xf32>
    %216 = arith.mulf %211, %215 : vector<8x32xf32>
    %cst_85 = arith.constant 1.000000e+00 : f32
    %217 = vector.broadcast %cst_85 : f32 to vector<8x32xf32>
    %218 = arith.subf %217, %216 : vector<8x32xf32>
    %219 = arith.mulf %190, %218 : vector<8x32xf32>
    %cst_86 = arith.constant 1.000000e+00 : f32
    %220 = vector.broadcast %cst_86 : f32 to vector<8x32xf32>
    %221 = arith.addf %220, %219 : vector<8x32xf32>
    %222 = arith.mulf %183, %221 : vector<8x32xf32>
    %c0_87 = arith.constant 0 : index
    %c0_88 = arith.constant 0 : index
    %c0_89 = arith.constant 0 : index
    %223 = vector.load %arg13[%c0_87, %c0_88, %c0_89] : memref<2x32x64xf32, #tpu.memory_space<vmem>>, vector<1x32x64xf32>
    %224 = vector.shape_cast %223 : vector<1x32x64xf32> to vector<32x64xf32>
    %c0_90 = arith.constant 0 : index
    %c0_91 = arith.constant 0 : index
    %c0_92 = arith.constant 0 : index
    %225 = vector.load %arg14[%c0_90, %c0_91, %c0_92] : memref<2x1x64xf32, #tpu.memory_space<vmem>>, vector<1x1x64xf32>
    %226 = vector.shape_cast %225 : vector<1x1x64xf32> to vector<1x64xf32>
    %227 = arith.truncf %222 : vector<8x32xf32> to vector<8x32xbf16>
    %228 = arith.truncf %224 : vector<32x64xf32> to vector<32x64xbf16>
    %cst_93 = arith.constant dense<0.000000e+00> : vector<8x64xf32>
    %229 = tpu.matmul %227, %228, %cst_93 {dimension_numbers = #tpu.dot_dimension_numbers<[1], [0], [0], [1], [0, 0, 1, 1], [], []>} : vector<8x32xbf16>, vector<32x64xbf16>, vector<8x64xf32> -> vector<8x64xf32>
    %230 = vector.broadcast %226 : vector<1x64xf32> to vector<8x64xf32>
    %231 = arith.addf %229, %230 : vector<8x64xf32>
    %232 = arith.addf %172, %231 : vector<8x64xf32>
    %c0_94 = arith.constant 0 : index
    %c0_95 = arith.constant 0 : index
    %c0_96 = arith.constant 0 : index
    %233 = vector.load %arg15[%c0_94, %c0_95, %c0_96] : memref<2x1x64xf32, #tpu.memory_space<vmem>>, vector<1x1x64xf32>
    %234 = vector.shape_cast %233 : vector<1x1x64xf32> to vector<1x64xf32>
    %c0_97 = arith.constant 0 : index
    %c0_98 = arith.constant 0 : index
    %c0_99 = arith.constant 0 : index
    %235 = vector.load %arg16[%c0_97, %c0_98, %c0_99] : memref<2x1x64xf32, #tpu.memory_space<vmem>>, vector<1x1x64xf32>
    %236 = vector.shape_cast %235 : vector<1x1x64xf32> to vector<1x64xf32>
    %cst_100 = arith.constant dense<0.000000e+00> : vector<8xf32>
    %237 = vector.multi_reduction <add>, %232, %cst_100 [1] : vector<8x64xf32> to vector<8xf32>
    %238 = vector.shape_cast %237 : vector<8xf32> to vector<8x1xf32>
    %cst_101 = arith.constant 6.400000e+01 : f32
    %239 = vector.broadcast %cst_101 : f32 to vector<8x1xf32>
    %240 = arith.divf %238, %239 : vector<8x1xf32>
    %241 = vector.broadcast %240 : vector<8x1xf32> to vector<8x64xf32>
    %242 = arith.subf %232, %241 : vector<8x64xf32>
    %243 = arith.mulf %242, %242 : vector<8x64xf32>
    %cst_102 = arith.constant dense<0.000000e+00> : vector<8xf32>
    %244 = vector.multi_reduction <add>, %243, %cst_102 [1] : vector<8x64xf32> to vector<8xf32>
    %245 = vector.shape_cast %244 : vector<8xf32> to vector<8x1xf32>
    %cst_103 = arith.constant 6.400000e+01 : f32
    %246 = vector.broadcast %cst_103 : f32 to vector<8x1xf32>
    %247 = arith.divf %245, %246 : vector<8x1xf32>
    %248 = vector.broadcast %240 : vector<8x1xf32> to vector<8x64xf32>
    %249 = arith.subf %232, %248 : vector<8x64xf32>
    %cst_104 = arith.constant 9.99999974E-6 : f32
    %250 = vector.broadcast %cst_104 : f32 to vector<8x1xf32>
    %251 = arith.addf %247, %250 : vector<8x1xf32>
    %252 = math.rsqrt %251 : vector<8x1xf32>
    %253 = vector.broadcast %252 : vector<8x1xf32> to vector<8x64xf32>
    %254 = arith.mulf %249, %253 : vector<8x64xf32>
    %255 = vector.broadcast %234 : vector<1x64xf32> to vector<8x64xf32>
    %256 = arith.mulf %254, %255 : vector<8x64xf32>
    %257 = vector.broadcast %236 : vector<1x64xf32> to vector<8x64xf32>
    %258 = arith.addf %256, %257 : vector<8x64xf32>
    %c1 = arith.constant 1 : index
    %c0_105 = arith.constant 0 : index
    %c0_106 = arith.constant 0 : index
    %259 = vector.load %arg5[%c1, %c0_105, %c0_106] : memref<2x64x192xf32, #tpu.memory_space<vmem>>, vector<1x64x192xf32>
    %260 = vector.shape_cast %259 : vector<1x64x192xf32> to vector<64x192xf32>
    %c1_107 = arith.constant 1 : index
    %c0_108 = arith.constant 0 : index
    %c0_109 = arith.constant 0 : index
    %261 = vector.load %arg6[%c1_107, %c0_108, %c0_109] : memref<2x1x192xf32, #tpu.memory_space<vmem>>, vector<1x1x192xf32>
    %262 = vector.shape_cast %261 : vector<1x1x192xf32> to vector<1x192xf32>
    %263 = arith.truncf %258 : vector<8x64xf32> to vector<8x64xbf16>
    %264 = arith.truncf %260 : vector<64x192xf32> to vector<64x192xbf16>
    %cst_110 = arith.constant dense<0.000000e+00> : vector<8x192xf32>
    %265 = tpu.matmul %263, %264, %cst_110 {dimension_numbers = #tpu.dot_dimension_numbers<[1], [0], [0], [1], [0, 0, 1, 1], [], []>} : vector<8x64xbf16>, vector<64x192xbf16>, vector<8x192xf32> -> vector<8x192xf32>
    %266 = vector.broadcast %262 : vector<1x192xf32> to vector<8x192xf32>
    %267 = arith.addf %265, %266 : vector<8x192xf32>
    %c1_111 = arith.constant 1 : index
    %c0_112 = arith.constant 0 : index
    %c0_113 = arith.constant 0 : index
    %268 = vector.load %arg7[%c1_111, %c0_112, %c0_113] : memref<2x64x64xf32, #tpu.memory_space<vmem>>, vector<1x64x64xf32>
    %269 = vector.shape_cast %268 : vector<1x64x64xf32> to vector<64x64xf32>
    %270 = arith.truncf %269 : vector<64x64xf32> to vector<64x64xbf16>
    %271 = vector.extract_strided_slice %267 {offsets = [0, 0], sizes = [8, 64], strides = [1, 1]} : vector<8x192xf32> to vector<8x64xf32>
    %272 = vector.extract_strided_slice %267 {offsets = [0, 64], sizes = [8, 64], strides = [1, 1]} : vector<8x192xf32> to vector<8x64xf32>
    %273 = vector.extract_strided_slice %267 {offsets = [0, 128], sizes = [8, 64], strides = [1, 1]} : vector<8x192xf32> to vector<8x64xf32>
    %cst_114 = arith.constant 0.000000e+00 : f32
    %274 = vector.broadcast %cst_114 : f32 to vector<8x64xf32>
    %275 = vector.extract_strided_slice %271 {offsets = [0, 0], sizes = [8, 16], strides = [1, 1]} : vector<8x64xf32> to vector<8x16xf32>
    %276 = arith.truncf %275 : vector<8x16xf32> to vector<8x16xbf16>
    %277 = vector.extract_strided_slice %272 {offsets = [0, 0], sizes = [8, 16], strides = [1, 1]} : vector<8x64xf32> to vector<8x16xf32>
    %278 = arith.truncf %277 : vector<8x16xf32> to vector<8x16xbf16>
    %279 = vector.extract_strided_slice %273 {offsets = [0, 0], sizes = [8, 16], strides = [1, 1]} : vector<8x64xf32> to vector<8x16xf32>
    %280 = arith.truncf %279 : vector<8x16xf32> to vector<8x16xbf16>
    %cst_115 = arith.constant dense<0.000000e+00> : vector<8x8xf32>
    %281 = tpu.matmul %276, %278, %cst_115 {dimension_numbers = #tpu.dot_dimension_numbers<[1], [1], [0], [0], [0, 0, 1, 0], [], []>} : vector<8x16xbf16>, vector<8x16xbf16>, vector<8x8xf32> -> vector<8x8xf32>
    %cst_116 = arith.constant 2.500000e-01 : f32
    %282 = vector.broadcast %cst_116 : f32 to vector<8x8xf32>
    %283 = arith.mulf %281, %282 : vector<8x8xf32>
    %284 = vector.broadcast %15 : vector<1x8xf32> to vector<8x8xf32>
    %285 = arith.addf %283, %284 : vector<8x8xf32>
    %cst_117 = arith.constant dense<0xFF800000> : vector<8xf32>
    %286 = vector.multi_reduction <maximumf>, %285, %cst_117 [1] : vector<8x8xf32> to vector<8xf32>
    %287 = vector.shape_cast %286 : vector<8xf32> to vector<8x1xf32>
    %288 = vector.broadcast %287 : vector<8x1xf32> to vector<8x8xf32>
    %289 = arith.subf %285, %288 : vector<8x8xf32>
    %290 = math.exp %289 : vector<8x8xf32>
    %cst_118 = arith.constant dense<0.000000e+00> : vector<8xf32>
    %291 = vector.multi_reduction <add>, %290, %cst_118 [1] : vector<8x8xf32> to vector<8xf32>
    %292 = vector.shape_cast %291 : vector<8xf32> to vector<8x1xf32>
    %293 = tpu.reciprocal %292 {approx = true} : vector<8x1xf32> -> vector<8x1xf32>
    %294 = vector.broadcast %293 : vector<8x1xf32> to vector<8x8xf32>
    %295 = arith.mulf %290, %294 : vector<8x8xf32>
    %296 = arith.truncf %295 : vector<8x8xf32> to vector<8x8xbf16>
    %cst_119 = arith.constant dense<0.000000e+00> : vector<8x16xf32>
    %297 = tpu.matmul %296, %280, %cst_119 {dimension_numbers = #tpu.dot_dimension_numbers<[1], [0], [0], [1], [0, 0, 1, 1], [], []>} : vector<8x8xbf16>, vector<8x16xbf16>, vector<8x16xf32> -> vector<8x16xf32>
    %298 = arith.truncf %297 : vector<8x16xf32> to vector<8x16xbf16>
    %299 = vector.extract_strided_slice %270 {offsets = [0, 0], sizes = [16, 64], strides = [1, 1]} : vector<64x64xbf16> to vector<16x64xbf16>
    %cst_120 = arith.constant dense<0.000000e+00> : vector<8x64xf32>
    %300 = tpu.matmul %298, %299, %cst_120 {dimension_numbers = #tpu.dot_dimension_numbers<[1], [0], [0], [1], [0, 0, 1, 1], [], []>} : vector<8x16xbf16>, vector<16x64xbf16>, vector<8x64xf32> -> vector<8x64xf32>
    %301 = arith.addf %274, %300 : vector<8x64xf32>
    %302 = vector.extract_strided_slice %271 {offsets = [0, 16], sizes = [8, 16], strides = [1, 1]} : vector<8x64xf32> to vector<8x16xf32>
    %303 = arith.truncf %302 : vector<8x16xf32> to vector<8x16xbf16>
    %304 = vector.extract_strided_slice %272 {offsets = [0, 16], sizes = [8, 16], strides = [1, 1]} : vector<8x64xf32> to vector<8x16xf32>
    %305 = arith.truncf %304 : vector<8x16xf32> to vector<8x16xbf16>
    %306 = vector.extract_strided_slice %273 {offsets = [0, 16], sizes = [8, 16], strides = [1, 1]} : vector<8x64xf32> to vector<8x16xf32>
    %307 = arith.truncf %306 : vector<8x16xf32> to vector<8x16xbf16>
    %cst_121 = arith.constant dense<0.000000e+00> : vector<8x8xf32>
    %308 = tpu.matmul %303, %305, %cst_121 {dimension_numbers = #tpu.dot_dimension_numbers<[1], [1], [0], [0], [0, 0, 1, 0], [], []>} : vector<8x16xbf16>, vector<8x16xbf16>, vector<8x8xf32> -> vector<8x8xf32>
    %cst_122 = arith.constant 2.500000e-01 : f32
    %309 = vector.broadcast %cst_122 : f32 to vector<8x8xf32>
    %310 = arith.mulf %308, %309 : vector<8x8xf32>
    %311 = vector.broadcast %15 : vector<1x8xf32> to vector<8x8xf32>
    %312 = arith.addf %310, %311 : vector<8x8xf32>
    %cst_123 = arith.constant dense<0xFF800000> : vector<8xf32>
    %313 = vector.multi_reduction <maximumf>, %312, %cst_123 [1] : vector<8x8xf32> to vector<8xf32>
    %314 = vector.shape_cast %313 : vector<8xf32> to vector<8x1xf32>
    %315 = vector.broadcast %314 : vector<8x1xf32> to vector<8x8xf32>
    %316 = arith.subf %312, %315 : vector<8x8xf32>
    %317 = math.exp %316 : vector<8x8xf32>
    %cst_124 = arith.constant dense<0.000000e+00> : vector<8xf32>
    %318 = vector.multi_reduction <add>, %317, %cst_124 [1] : vector<8x8xf32> to vector<8xf32>
    %319 = vector.shape_cast %318 : vector<8xf32> to vector<8x1xf32>
    %320 = tpu.reciprocal %319 {approx = true} : vector<8x1xf32> -> vector<8x1xf32>
    %321 = vector.broadcast %320 : vector<8x1xf32> to vector<8x8xf32>
    %322 = arith.mulf %317, %321 : vector<8x8xf32>
    %323 = arith.truncf %322 : vector<8x8xf32> to vector<8x8xbf16>
    %cst_125 = arith.constant dense<0.000000e+00> : vector<8x16xf32>
    %324 = tpu.matmul %323, %307, %cst_125 {dimension_numbers = #tpu.dot_dimension_numbers<[1], [0], [0], [1], [0, 0, 1, 1], [], []>} : vector<8x8xbf16>, vector<8x16xbf16>, vector<8x16xf32> -> vector<8x16xf32>
    %325 = arith.truncf %324 : vector<8x16xf32> to vector<8x16xbf16>
    %326 = vector.extract_strided_slice %270 {offsets = [16, 0], sizes = [16, 64], strides = [1, 1]} : vector<64x64xbf16> to vector<16x64xbf16>
    %cst_126 = arith.constant dense<0.000000e+00> : vector<8x64xf32>
    %327 = tpu.matmul %325, %326, %cst_126 {dimension_numbers = #tpu.dot_dimension_numbers<[1], [0], [0], [1], [0, 0, 1, 1], [], []>} : vector<8x16xbf16>, vector<16x64xbf16>, vector<8x64xf32> -> vector<8x64xf32>
    %328 = arith.addf %301, %327 : vector<8x64xf32>
    %329 = vector.extract_strided_slice %271 {offsets = [0, 32], sizes = [8, 16], strides = [1, 1]} : vector<8x64xf32> to vector<8x16xf32>
    %330 = arith.truncf %329 : vector<8x16xf32> to vector<8x16xbf16>
    %331 = vector.extract_strided_slice %272 {offsets = [0, 32], sizes = [8, 16], strides = [1, 1]} : vector<8x64xf32> to vector<8x16xf32>
    %332 = arith.truncf %331 : vector<8x16xf32> to vector<8x16xbf16>
    %333 = vector.extract_strided_slice %273 {offsets = [0, 32], sizes = [8, 16], strides = [1, 1]} : vector<8x64xf32> to vector<8x16xf32>
    %334 = arith.truncf %333 : vector<8x16xf32> to vector<8x16xbf16>
    %cst_127 = arith.constant dense<0.000000e+00> : vector<8x8xf32>
    %335 = tpu.matmul %330, %332, %cst_127 {dimension_numbers = #tpu.dot_dimension_numbers<[1], [1], [0], [0], [0, 0, 1, 0], [], []>} : vector<8x16xbf16>, vector<8x16xbf16>, vector<8x8xf32> -> vector<8x8xf32>
    %cst_128 = arith.constant 2.500000e-01 : f32
    %336 = vector.broadcast %cst_128 : f32 to vector<8x8xf32>
    %337 = arith.mulf %335, %336 : vector<8x8xf32>
    %338 = vector.broadcast %15 : vector<1x8xf32> to vector<8x8xf32>
    %339 = arith.addf %337, %338 : vector<8x8xf32>
    %cst_129 = arith.constant dense<0xFF800000> : vector<8xf32>
    %340 = vector.multi_reduction <maximumf>, %339, %cst_129 [1] : vector<8x8xf32> to vector<8xf32>
    %341 = vector.shape_cast %340 : vector<8xf32> to vector<8x1xf32>
    %342 = vector.broadcast %341 : vector<8x1xf32> to vector<8x8xf32>
    %343 = arith.subf %339, %342 : vector<8x8xf32>
    %344 = math.exp %343 : vector<8x8xf32>
    %cst_130 = arith.constant dense<0.000000e+00> : vector<8xf32>
    %345 = vector.multi_reduction <add>, %344, %cst_130 [1] : vector<8x8xf32> to vector<8xf32>
    %346 = vector.shape_cast %345 : vector<8xf32> to vector<8x1xf32>
    %347 = tpu.reciprocal %346 {approx = true} : vector<8x1xf32> -> vector<8x1xf32>
    %348 = vector.broadcast %347 : vector<8x1xf32> to vector<8x8xf32>
    %349 = arith.mulf %344, %348 : vector<8x8xf32>
    %350 = arith.truncf %349 : vector<8x8xf32> to vector<8x8xbf16>
    %cst_131 = arith.constant dense<0.000000e+00> : vector<8x16xf32>
    %351 = tpu.matmul %350, %334, %cst_131 {dimension_numbers = #tpu.dot_dimension_numbers<[1], [0], [0], [1], [0, 0, 1, 1], [], []>} : vector<8x8xbf16>, vector<8x16xbf16>, vector<8x16xf32> -> vector<8x16xf32>
    %352 = arith.truncf %351 : vector<8x16xf32> to vector<8x16xbf16>
    %353 = vector.extract_strided_slice %270 {offsets = [32, 0], sizes = [16, 64], strides = [1, 1]} : vector<64x64xbf16> to vector<16x64xbf16>
    %cst_132 = arith.constant dense<0.000000e+00> : vector<8x64xf32>
    %354 = tpu.matmul %352, %353, %cst_132 {dimension_numbers = #tpu.dot_dimension_numbers<[1], [0], [0], [1], [0, 0, 1, 1], [], []>} : vector<8x16xbf16>, vector<16x64xbf16>, vector<8x64xf32> -> vector<8x64xf32>
    %355 = arith.addf %328, %354 : vector<8x64xf32>
    %356 = vector.extract_strided_slice %271 {offsets = [0, 48], sizes = [8, 16], strides = [1, 1]} : vector<8x64xf32> to vector<8x16xf32>
    %357 = arith.truncf %356 : vector<8x16xf32> to vector<8x16xbf16>
    %358 = vector.extract_strided_slice %272 {offsets = [0, 48], sizes = [8, 16], strides = [1, 1]} : vector<8x64xf32> to vector<8x16xf32>
    %359 = arith.truncf %358 : vector<8x16xf32> to vector<8x16xbf16>
    %360 = vector.extract_strided_slice %273 {offsets = [0, 48], sizes = [8, 16], strides = [1, 1]} : vector<8x64xf32> to vector<8x16xf32>
    %361 = arith.truncf %360 : vector<8x16xf32> to vector<8x16xbf16>
    %cst_133 = arith.constant dense<0.000000e+00> : vector<8x8xf32>
    %362 = tpu.matmul %357, %359, %cst_133 {dimension_numbers = #tpu.dot_dimension_numbers<[1], [1], [0], [0], [0, 0, 1, 0], [], []>} : vector<8x16xbf16>, vector<8x16xbf16>, vector<8x8xf32> -> vector<8x8xf32>
    %cst_134 = arith.constant 2.500000e-01 : f32
    %363 = vector.broadcast %cst_134 : f32 to vector<8x8xf32>
    %364 = arith.mulf %362, %363 : vector<8x8xf32>
    %365 = vector.broadcast %15 : vector<1x8xf32> to vector<8x8xf32>
    %366 = arith.addf %364, %365 : vector<8x8xf32>
    %cst_135 = arith.constant dense<0xFF800000> : vector<8xf32>
    %367 = vector.multi_reduction <maximumf>, %366, %cst_135 [1] : vector<8x8xf32> to vector<8xf32>
    %368 = vector.shape_cast %367 : vector<8xf32> to vector<8x1xf32>
    %369 = vector.broadcast %368 : vector<8x1xf32> to vector<8x8xf32>
    %370 = arith.subf %366, %369 : vector<8x8xf32>
    %371 = math.exp %370 : vector<8x8xf32>
    %cst_136 = arith.constant dense<0.000000e+00> : vector<8xf32>
    %372 = vector.multi_reduction <add>, %371, %cst_136 [1] : vector<8x8xf32> to vector<8xf32>
    %373 = vector.shape_cast %372 : vector<8xf32> to vector<8x1xf32>
    %374 = tpu.reciprocal %373 {approx = true} : vector<8x1xf32> -> vector<8x1xf32>
    %375 = vector.broadcast %374 : vector<8x1xf32> to vector<8x8xf32>
    %376 = arith.mulf %371, %375 : vector<8x8xf32>
    %377 = arith.truncf %376 : vector<8x8xf32> to vector<8x8xbf16>
    %cst_137 = arith.constant dense<0.000000e+00> : vector<8x16xf32>
    %378 = tpu.matmul %377, %361, %cst_137 {dimension_numbers = #tpu.dot_dimension_numbers<[1], [0], [0], [1], [0, 0, 1, 1], [], []>} : vector<8x8xbf16>, vector<8x16xbf16>, vector<8x16xf32> -> vector<8x16xf32>
    %379 = arith.truncf %378 : vector<8x16xf32> to vector<8x16xbf16>
    %380 = vector.extract_strided_slice %270 {offsets = [48, 0], sizes = [16, 64], strides = [1, 1]} : vector<64x64xbf16> to vector<16x64xbf16>
    %cst_138 = arith.constant dense<0.000000e+00> : vector<8x64xf32>
    %381 = tpu.matmul %379, %380, %cst_138 {dimension_numbers = #tpu.dot_dimension_numbers<[1], [0], [0], [1], [0, 0, 1, 1], [], []>} : vector<8x16xbf16>, vector<16x64xbf16>, vector<8x64xf32> -> vector<8x64xf32>
    %382 = arith.addf %355, %381 : vector<8x64xf32>
    %c0_139 = arith.constant 0 : index
    %c0_140 = arith.constant 0 : index
    %383 = vector.load %arg30[%c0_139, %c0_140] : memref<8x64xf32, #tpu.memory_space<vmem>>, vector<8x64xf32>
    tpu.vector_store %arg30[%c0_139, %c0_140], %382 {strides = array<i32>} : memref<8x64xf32, #tpu.memory_space<vmem>>, vector<8x64xf32>,
    %c0_141 = arith.constant 0 : index
    %c0_142 = arith.constant 0 : index
    %384 = vector.load %arg30[%c0_141, %c0_142] : memref<8x64xf32, #tpu.memory_space<vmem>>, vector<8x64xf32>
    %c1_143 = arith.constant 1 : index
    %c0_144 = arith.constant 0 : index
    %c0_145 = arith.constant 0 : index
    %385 = vector.load %arg8[%c1_143, %c0_144, %c0_145] : memref<2x1x64xf32, #tpu.memory_space<vmem>>, vector<1x1x64xf32>
    %386 = vector.shape_cast %385 : vector<1x1x64xf32> to vector<1x64xf32>
    %387 = vector.broadcast %386 : vector<1x64xf32> to vector<8x64xf32>
    %388 = arith.addf %384, %387 : vector<8x64xf32>
    %389 = arith.addf %258, %388 : vector<8x64xf32>
    %c1_146 = arith.constant 1 : index
    %c0_147 = arith.constant 0 : index
    %c0_148 = arith.constant 0 : index
    %390 = vector.load %arg9[%c1_146, %c0_147, %c0_148] : memref<2x1x64xf32, #tpu.memory_space<vmem>>, vector<1x1x64xf32>
    %391 = vector.shape_cast %390 : vector<1x1x64xf32> to vector<1x64xf32>
    %c1_149 = arith.constant 1 : index
    %c0_150 = arith.constant 0 : index
    %c0_151 = arith.constant 0 : index
    %392 = vector.load %arg10[%c1_149, %c0_150, %c0_151] : memref<2x1x64xf32, #tpu.memory_space<vmem>>, vector<1x1x64xf32>
    %393 = vector.shape_cast %392 : vector<1x1x64xf32> to vector<1x64xf32>
    %cst_152 = arith.constant dense<0.000000e+00> : vector<8xf32>
    %394 = vector.multi_reduction <add>, %389, %cst_152 [1] : vector<8x64xf32> to vector<8xf32>
    %395 = vector.shape_cast %394 : vector<8xf32> to vector<8x1xf32>
    %cst_153 = arith.constant 6.400000e+01 : f32
    %396 = vector.broadcast %cst_153 : f32 to vector<8x1xf32>
    %397 = arith.divf %395, %396 : vector<8x1xf32>
    %398 = vector.broadcast %397 : vector<8x1xf32> to vector<8x64xf32>
    %399 = arith.subf %389, %398 : vector<8x64xf32>
    %400 = arith.mulf %399, %399 : vector<8x64xf32>
    %cst_154 = arith.constant dense<0.000000e+00> : vector<8xf32>
    %401 = vector.multi_reduction <add>, %400, %cst_154 [1] : vector<8x64xf32> to vector<8xf32>
    %402 = vector.shape_cast %401 : vector<8xf32> to vector<8x1xf32>
    %cst_155 = arith.constant 6.400000e+01 : f32
    %403 = vector.broadcast %cst_155 : f32 to vector<8x1xf32>
    %404 = arith.divf %402, %403 : vector<8x1xf32>
    %405 = vector.broadcast %397 : vector<8x1xf32> to vector<8x64xf32>
    %406 = arith.subf %389, %405 : vector<8x64xf32>
    %cst_156 = arith.constant 9.99999974E-6 : f32
    %407 = vector.broadcast %cst_156 : f32 to vector<8x1xf32>
    %408 = arith.addf %404, %407 : vector<8x1xf32>
    %409 = math.rsqrt %408 : vector<8x1xf32>
    %410 = vector.broadcast %409 : vector<8x1xf32> to vector<8x64xf32>
    %411 = arith.mulf %406, %410 : vector<8x64xf32>
    %412 = vector.broadcast %391 : vector<1x64xf32> to vector<8x64xf32>
    %413 = arith.mulf %411, %412 : vector<8x64xf32>
    %414 = vector.broadcast %393 : vector<1x64xf32> to vector<8x64xf32>
    %415 = arith.addf %413, %414 : vector<8x64xf32>
    %c1_157 = arith.constant 1 : index
    %c0_158 = arith.constant 0 : index
    %c0_159 = arith.constant 0 : index
    %416 = vector.load %arg11[%c1_157, %c0_158, %c0_159] : memref<2x64x32xf32, #tpu.memory_space<vmem>>, vector<1x64x32xf32>
    %417 = vector.shape_cast %416 : vector<1x64x32xf32> to vector<64x32xf32>
    %c1_160 = arith.constant 1 : index
    %c0_161 = arith.constant 0 : index
    %c0_162 = arith.constant 0 : index
    %418 = vector.load %arg12[%c1_160, %c0_161, %c0_162] : memref<2x1x32xf32, #tpu.memory_space<vmem>>, vector<1x1x32xf32>
    %419 = vector.shape_cast %418 : vector<1x1x32xf32> to vector<1x32xf32>
    %420 = arith.truncf %415 : vector<8x64xf32> to vector<8x64xbf16>
    %421 = arith.truncf %417 : vector<64x32xf32> to vector<64x32xbf16>
    %cst_163 = arith.constant dense<0.000000e+00> : vector<8x32xf32>
    %422 = tpu.matmul %420, %421, %cst_163 {dimension_numbers = #tpu.dot_dimension_numbers<[1], [0], [0], [1], [0, 0, 1, 1], [], []>} : vector<8x64xbf16>, vector<64x32xbf16>, vector<8x32xf32> -> vector<8x32xf32>
    %423 = vector.broadcast %419 : vector<1x32xf32> to vector<8x32xf32>
    %424 = arith.addf %422, %423 : vector<8x32xf32>
    %cst_164 = arith.constant 5.000000e-01 : f32
    %425 = vector.broadcast %cst_164 : f32 to vector<8x32xf32>
    %426 = arith.mulf %425, %424 : vector<8x32xf32>
    %cst_165 = arith.constant 0.707106769 : f32
    %427 = vector.broadcast %cst_165 : f32 to vector<8x32xf32>
    %428 = arith.mulf %424, %427 : vector<8x32xf32>
    %cst_166 = arith.constant 0.000000e+00 : f32
    %429 = vector.broadcast %cst_166 : f32 to vector<8x32xf32>
    %430 = arith.cmpf oge, %428, %429 : vector<8x32xf32>
    %cst_167 = arith.constant 1.000000e+00 : f32
    %cst_168 = arith.constant -1.000000e+00 : f32
    %431 = vector.broadcast %cst_167 : f32 to vector<8x32xf32>
    %432 = vector.broadcast %cst_168 : f32 to vector<8x32xf32>
    %433 = arith.select %430, %431, %432 : vector<8x32xi1>, vector<8x32xf32>
    %434 = math.absf %428 : vector<8x32xf32>
    %cst_169 = arith.constant 0.327591091 : f32
    %435 = vector.broadcast %cst_169 : f32 to vector<8x32xf32>
    %436 = arith.mulf %435, %434 : vector<8x32xf32>
    %cst_170 = arith.constant 1.000000e+00 : f32
    %437 = vector.broadcast %cst_170 : f32 to vector<8x32xf32>
    %438 = arith.addf %437, %436 : vector<8x32xf32>
    %cst_171 = arith.constant 1.000000e+00 : f32
    %439 = vector.broadcast %cst_171 : f32 to vector<8x32xf32>
    %440 = arith.divf %439, %438 : vector<8x32xf32>
    %cst_172 = arith.constant 1.06140542 : f32
    %441 = vector.broadcast %cst_172 : f32 to vector<8x32xf32>
    %442 = arith.mulf %441, %440 : vector<8x32xf32>
    %cst_173 = arith.constant -1.45315206 : f32
    %443 = vector.broadcast %cst_173 : f32 to vector<8x32xf32>
    %444 = arith.addf %442, %443 : vector<8x32xf32>
    %445 = arith.mulf %444, %440 : vector<8x32xf32>
    %cst_174 = arith.constant 1.42141378 : f32
    %446 = vector.broadcast %cst_174 : f32 to vector<8x32xf32>
    %447 = arith.addf %445, %446 : vector<8x32xf32>
    %448 = arith.mulf %447, %440 : vector<8x32xf32>
    %cst_175 = arith.constant -0.284496725 : f32
    %449 = vector.broadcast %cst_175 : f32 to vector<8x32xf32>
    %450 = arith.addf %448, %449 : vector<8x32xf32>
    %451 = arith.mulf %450, %440 : vector<8x32xf32>
    %cst_176 = arith.constant 0.254829586 : f32
    %452 = vector.broadcast %cst_176 : f32 to vector<8x32xf32>
    %453 = arith.addf %451, %452 : vector<8x32xf32>
    %454 = arith.mulf %453, %440 : vector<8x32xf32>
    %cst_177 = arith.constant 0.000000e+00 : f32
    %455 = vector.broadcast %cst_177 : f32 to vector<8x32xf32>
    %456 = arith.subf %455, %434 : vector<8x32xf32>
    %457 = arith.mulf %456, %434 : vector<8x32xf32>
    %458 = math.exp %457 : vector<8x32xf32>
    %459 = arith.mulf %454, %458 : vector<8x32xf32>
    %cst_178 = arith.constant 1.000000e+00 : f32
    %460 = vector.broadcast %cst_178 : f32 to vector<8x32xf32>
    %461 = arith.subf %460, %459 : vector<8x32xf32>
    %462 = arith.mulf %433, %461 : vector<8x32xf32>
    %cst_179 = arith.constant 1.000000e+00 : f32
    %463 = vector.broadcast %cst_179 : f32 to vector<8x32xf32>
    %464 = arith.addf %463, %462 : vector<8x32xf32>
    %465 = arith.mulf %426, %464 : vector<8x32xf32>
    %c1_180 = arith.constant 1 : index
    %c0_181 = arith.constant 0 : index
    %c0_182 = arith.constant 0 : index
    %466 = vector.load %arg13[%c1_180, %c0_181, %c0_182] : memref<2x32x64xf32, #tpu.memory_space<vmem>>, vector<1x32x64xf32>
    %467 = vector.shape_cast %466 : vector<1x32x64xf32> to vector<32x64xf32>
    %c1_183 = arith.constant 1 : index
    %c0_184 = arith.constant 0 : index
    %c0_185 = arith.constant 0 : index
    %468 = vector.load %arg14[%c1_183, %c0_184, %c0_185] : memref<2x1x64xf32, #tpu.memory_space<vmem>>, vector<1x1x64xf32>
    %469 = vector.shape_cast %468 : vector<1x1x64xf32> to vector<1x64xf32>
    %470 = arith.truncf %465 : vector<8x32xf32> to vector<8x32xbf16>
    %471 = arith.truncf %467 : vector<32x64xf32> to vector<32x64xbf16>
    %cst_186 = arith.constant dense<0.000000e+00> : vector<8x64xf32>
    %472 = tpu.matmul %470, %471, %cst_186 {dimension_numbers = #tpu.dot_dimension_numbers<[1], [0], [0], [1], [0, 0, 1, 1], [], []>} : vector<8x32xbf16>, vector<32x64xbf16>, vector<8x64xf32> -> vector<8x64xf32>
    %473 = vector.broadcast %469 : vector<1x64xf32> to vector<8x64xf32>
    %474 = arith.addf %472, %473 : vector<8x64xf32>
    %475 = arith.addf %415, %474 : vector<8x64xf32>
    %c1_187 = arith.constant 1 : index
    %c0_188 = arith.constant 0 : index
    %c0_189 = arith.constant 0 : index
    %476 = vector.load %arg15[%c1_187, %c0_188, %c0_189] : memref<2x1x64xf32, #tpu.memory_space<vmem>>, vector<1x1x64xf32>
    %477 = vector.shape_cast %476 : vector<1x1x64xf32> to vector<1x64xf32>
    %c1_190 = arith.constant 1 : index
    %c0_191 = arith.constant 0 : index
    %c0_192 = arith.constant 0 : index
    %478 = vector.load %arg16[%c1_190, %c0_191, %c0_192] : memref<2x1x64xf32, #tpu.memory_space<vmem>>, vector<1x1x64xf32>
    %479 = vector.shape_cast %478 : vector<1x1x64xf32> to vector<1x64xf32>
    %cst_193 = arith.constant dense<0.000000e+00> : vector<8xf32>
    %480 = vector.multi_reduction <add>, %475, %cst_193 [1] : vector<8x64xf32> to vector<8xf32>
    %481 = vector.shape_cast %480 : vector<8xf32> to vector<8x1xf32>
    %cst_194 = arith.constant 6.400000e+01 : f32
    %482 = vector.broadcast %cst_194 : f32 to vector<8x1xf32>
    %483 = arith.divf %481, %482 : vector<8x1xf32>
    %484 = vector.broadcast %483 : vector<8x1xf32> to vector<8x64xf32>
    %485 = arith.subf %475, %484 : vector<8x64xf32>
    %486 = arith.mulf %485, %485 : vector<8x64xf32>
    %cst_195 = arith.constant dense<0.000000e+00> : vector<8xf32>
    %487 = vector.multi_reduction <add>, %486, %cst_195 [1] : vector<8x64xf32> to vector<8xf32>
    %488 = vector.shape_cast %487 : vector<8xf32> to vector<8x1xf32>
    %cst_196 = arith.constant 6.400000e+01 : f32
    %489 = vector.broadcast %cst_196 : f32 to vector<8x1xf32>
    %490 = arith.divf %488, %489 : vector<8x1xf32>
    %491 = vector.broadcast %483 : vector<8x1xf32> to vector<8x64xf32>
    %492 = arith.subf %475, %491 : vector<8x64xf32>
    %cst_197 = arith.constant 9.99999974E-6 : f32
    %493 = vector.broadcast %cst_197 : f32 to vector<8x1xf32>
    %494 = arith.addf %490, %493 : vector<8x1xf32>
    %495 = math.rsqrt %494 : vector<8x1xf32>
    %496 = vector.broadcast %495 : vector<8x1xf32> to vector<8x64xf32>
    %497 = arith.mulf %492, %496 : vector<8x64xf32>
    %498 = vector.broadcast %477 : vector<1x64xf32> to vector<8x64xf32>
    %499 = arith.mulf %497, %498 : vector<8x64xf32>
    %500 = vector.broadcast %479 : vector<1x64xf32> to vector<8x64xf32>
    %501 = arith.addf %499, %500 : vector<8x64xf32>
    %c0_198 = arith.constant 0 : index
    %c0_199 = arith.constant 0 : index
    %502 = vector.load %arg17[%c0_198, %c0_199] : memref<1x64xf32, #tpu.memory_space<vmem>>, vector<1x64xf32>
    %c0_200 = arith.constant 0 : index
    %c0_201 = arith.constant 0 : index
    %503 = vector.load %arg18[%c0_200, %c0_201] : memref<1x64xf32, #tpu.memory_space<vmem>>, vector<1x64xf32>
    %cst_202 = arith.constant dense<0.000000e+00> : vector<8xf32>
    %504 = vector.multi_reduction <add>, %501, %cst_202 [1] : vector<8x64xf32> to vector<8xf32>
    %505 = vector.shape_cast %504 : vector<8xf32> to vector<8x1xf32>
    %cst_203 = arith.constant 6.400000e+01 : f32
    %506 = vector.broadcast %cst_203 : f32 to vector<8x1xf32>
    %507 = arith.divf %505, %506 : vector<8x1xf32>
    %508 = vector.broadcast %507 : vector<8x1xf32> to vector<8x64xf32>
    %509 = arith.subf %501, %508 : vector<8x64xf32>
    %510 = arith.mulf %509, %509 : vector<8x64xf32>
    %cst_204 = arith.constant dense<0.000000e+00> : vector<8xf32>
    %511 = vector.multi_reduction <add>, %510, %cst_204 [1] : vector<8x64xf32> to vector<8xf32>
    %512 = vector.shape_cast %511 : vector<8xf32> to vector<8x1xf32>
    %cst_205 = arith.constant 6.400000e+01 : f32
    %513 = vector.broadcast %cst_205 : f32 to vector<8x1xf32>
    %514 = arith.divf %512, %513 : vector<8x1xf32>
    %515 = vector.broadcast %507 : vector<8x1xf32> to vector<8x64xf32>
    %516 = arith.subf %501, %515 : vector<8x64xf32>
    %cst_206 = arith.constant 9.99999974E-6 : f32
    %517 = vector.broadcast %cst_206 : f32 to vector<8x1xf32>
    %518 = arith.addf %514, %517 : vector<8x1xf32>
    %519 = math.rsqrt %518 : vector<8x1xf32>
    %520 = vector.broadcast %519 : vector<8x1xf32> to vector<8x64xf32>
    %521 = arith.mulf %516, %520 : vector<8x64xf32>
    %522 = vector.broadcast %502 : vector<1x64xf32> to vector<8x64xf32>
    %523 = arith.mulf %521, %522 : vector<8x64xf32>
    %524 = vector.broadcast %503 : vector<1x64xf32> to vector<8x64xf32>
    %525 = arith.addf %523, %524 : vector<8x64xf32>
    %c0_207 = arith.constant 0 : index
    %c0_208 = arith.constant 0 : index
    %526 = vector.load %arg19[%c0_207, %c0_208] : memref<64x32xf32, #tpu.memory_space<vmem>>, vector<64x32xf32>
    %c0_209 = arith.constant 0 : index
    %c0_210 = arith.constant 0 : index
    %527 = vector.load %arg20[%c0_209, %c0_210] : memref<1x32xf32, #tpu.memory_space<vmem>>, vector<1x32xf32>
    %528 = arith.truncf %525 : vector<8x64xf32> to vector<8x64xbf16>
    %529 = arith.truncf %526 : vector<64x32xf32> to vector<64x32xbf16>
    %cst_211 = arith.constant dense<0.000000e+00> : vector<8x32xf32>
    %530 = tpu.matmul %528, %529, %cst_211 {dimension_numbers = #tpu.dot_dimension_numbers<[1], [0], [0], [1], [0, 0, 1, 1], [], []>} : vector<8x64xbf16>, vector<64x32xbf16>, vector<8x32xf32> -> vector<8x32xf32>
    %531 = vector.broadcast %527 : vector<1x32xf32> to vector<8x32xf32>
    %532 = arith.addf %530, %531 : vector<8x32xf32>
    %cst_212 = arith.constant 0.000000e+00 : f32
    %533 = vector.broadcast %cst_212 : f32 to vector<8x32xf32>
    %534 = arith.cmpf ogt, %532, %533 : vector<8x32xf32>
    %cst_213 = arith.constant 0.000000e+00 : f32
    %535 = vector.broadcast %cst_213 : f32 to vector<8x32xf32>
    %536 = arith.minimumf %532, %535 : vector<8x32xf32>
    %537 = math.exp %536 : vector<8x32xf32>
    %cst_214 = arith.constant 1.000000e+00 : f32
    %538 = vector.broadcast %cst_214 : f32 to vector<8x32xf32>
    %539 = arith.subf %537, %538 : vector<8x32xf32>
    %cst_215 = arith.constant 1.67326319 : f32
    %540 = vector.broadcast %cst_215 : f32 to vector<8x32xf32>
    %541 = arith.mulf %540, %539 : vector<8x32xf32>
    %542 = arith.select %534, %532, %541 : vector<8x32xi1>, vector<8x32xf32>
    %cst_216 = arith.constant 1.05070102 : f32
    %543 = vector.broadcast %cst_216 : f32 to vector<8x32xf32>
    %544 = arith.mulf %543, %542 : vector<8x32xf32>
    %c0_217 = arith.constant 0 : index
    %c0_218 = arith.constant 0 : index
    %c0_219 = arith.constant 0 : index
    %545 = vector.load %arg21[%c0_217, %c0_218, %c0_219] : memref<4x32x32xf32, #tpu.memory_space<vmem>>, vector<1x32x32xf32>
    %546 = vector.shape_cast %545 : vector<1x32x32xf32> to vector<32x32xf32>
    %c0_220 = arith.constant 0 : index
    %c0_221 = arith.constant 0 : index
    %c0_222 = arith.constant 0 : index
    %547 = vector.load %arg22[%c0_220, %c0_221, %c0_222] : memref<4x1x32xf32, #tpu.memory_space<vmem>>, vector<1x1x32xf32>
    %548 = vector.shape_cast %547 : vector<1x1x32xf32> to vector<1x32xf32>
    %549 = arith.truncf %544 : vector<8x32xf32> to vector<8x32xbf16>
    %550 = arith.truncf %546 : vector<32x32xf32> to vector<32x32xbf16>
    %cst_223 = arith.constant dense<0.000000e+00> : vector<8x32xf32>
    %551 = tpu.matmul %549, %550, %cst_223 {dimension_numbers = #tpu.dot_dimension_numbers<[1], [0], [0], [1], [0, 0, 1, 1], [], []>} : vector<8x32xbf16>, vector<32x32xbf16>, vector<8x32xf32> -> vector<8x32xf32>
    %552 = vector.broadcast %548 : vector<1x32xf32> to vector<8x32xf32>
    %553 = arith.addf %551, %552 : vector<8x32xf32>
    %c0_224 = arith.constant 0 : index
    %c0_225 = arith.constant 0 : index
    %c0_226 = arith.constant 0 : index
    %554 = vector.load %arg23[%c0_224, %c0_225, %c0_226] : memref<4x1x32xf32, #tpu.memory_space<vmem>>, vector<1x1x32xf32>
    %555 = vector.shape_cast %554 : vector<1x1x32xf32> to vector<1x32xf32>
    %c0_227 = arith.constant 0 : index
    %c0_228 = arith.constant 0 : index
    %c0_229 = arith.constant 0 : index
    %556 = vector.load %arg24[%c0_227, %c0_228, %c0_229] : memref<4x1x32xf32, #tpu.memory_space<vmem>>, vector<1x1x32xf32>
    %557 = vector.shape_cast %556 : vector<1x1x32xf32> to vector<1x32xf32>
    %cst_230 = arith.constant dense<0.000000e+00> : vector<8xf32>
    %558 = vector.multi_reduction <add>, %553, %cst_230 [1] : vector<8x32xf32> to vector<8xf32>
    %559 = vector.shape_cast %558 : vector<8xf32> to vector<8x1xf32>
    %cst_231 = arith.constant 3.200000e+01 : f32
    %560 = vector.broadcast %cst_231 : f32 to vector<8x1xf32>
    %561 = arith.divf %559, %560 : vector<8x1xf32>
    %562 = vector.broadcast %561 : vector<8x1xf32> to vector<8x32xf32>
    %563 = arith.subf %553, %562 : vector<8x32xf32>
    %564 = arith.mulf %563, %563 : vector<8x32xf32>
    %cst_232 = arith.constant dense<0.000000e+00> : vector<8xf32>
    %565 = vector.multi_reduction <add>, %564, %cst_232 [1] : vector<8x32xf32> to vector<8xf32>
    %566 = vector.shape_cast %565 : vector<8xf32> to vector<8x1xf32>
    %cst_233 = arith.constant 3.200000e+01 : f32
    %567 = vector.broadcast %cst_233 : f32 to vector<8x1xf32>
    %568 = arith.divf %566, %567 : vector<8x1xf32>
    %569 = vector.broadcast %561 : vector<8x1xf32> to vector<8x32xf32>
    %570 = arith.subf %553, %569 : vector<8x32xf32>
    %cst_234 = arith.constant 9.99999974E-6 : f32
    %571 = vector.broadcast %cst_234 : f32 to vector<8x1xf32>
    %572 = arith.addf %568, %571 : vector<8x1xf32>
    %573 = math.rsqrt %572 : vector<8x1xf32>
    %574 = vector.broadcast %573 : vector<8x1xf32> to vector<8x32xf32>
    %575 = arith.mulf %570, %574 : vector<8x32xf32>
    %576 = vector.broadcast %555 : vector<1x32xf32> to vector<8x32xf32>
    %577 = arith.mulf %575, %576 : vector<8x32xf32>
    %578 = vector.broadcast %557 : vector<1x32xf32> to vector<8x32xf32>
    %579 = arith.addf %577, %578 : vector<8x32xf32>
    %cst_235 = arith.constant 0.000000e+00 : f32
    %580 = vector.broadcast %cst_235 : f32 to vector<8x32xf32>
    %581 = arith.cmpf ogt, %579, %580 : vector<8x32xf32>
    %cst_236 = arith.constant 0.000000e+00 : f32
    %582 = vector.broadcast %cst_236 : f32 to vector<8x32xf32>
    %583 = arith.minimumf %579, %582 : vector<8x32xf32>
    %584 = math.exp %583 : vector<8x32xf32>
    %cst_237 = arith.constant 1.000000e+00 : f32
    %585 = vector.broadcast %cst_237 : f32 to vector<8x32xf32>
    %586 = arith.subf %584, %585 : vector<8x32xf32>
    %cst_238 = arith.constant 1.67326319 : f32
    %587 = vector.broadcast %cst_238 : f32 to vector<8x32xf32>
    %588 = arith.mulf %587, %586 : vector<8x32xf32>
    %589 = arith.select %581, %579, %588 : vector<8x32xi1>, vector<8x32xf32>
    %cst_239 = arith.constant 1.05070102 : f32
    %590 = vector.broadcast %cst_239 : f32 to vector<8x32xf32>
    %591 = arith.mulf %590, %589 : vector<8x32xf32>
    %592 = arith.addf %591, %544 : vector<8x32xf32>
    %c1_240 = arith.constant 1 : index
    %c0_241 = arith.constant 0 : index
    %c0_242 = arith.constant 0 : index
    %593 = vector.load %arg21[%c1_240, %c0_241, %c0_242] : memref<4x32x32xf32, #tpu.memory_space<vmem>>, vector<1x32x32xf32>
    %594 = vector.shape_cast %593 : vector<1x32x32xf32> to vector<32x32xf32>
    %c1_243 = arith.constant 1 : index
    %c0_244 = arith.constant 0 : index
    %c0_245 = arith.constant 0 : index
    %595 = vector.load %arg22[%c1_243, %c0_244, %c0_245] : memref<4x1x32xf32, #tpu.memory_space<vmem>>, vector<1x1x32xf32>
    %596 = vector.shape_cast %595 : vector<1x1x32xf32> to vector<1x32xf32>
    %597 = arith.truncf %592 : vector<8x32xf32> to vector<8x32xbf16>
    %598 = arith.truncf %594 : vector<32x32xf32> to vector<32x32xbf16>
    %cst_246 = arith.constant dense<0.000000e+00> : vector<8x32xf32>
    %599 = tpu.matmul %597, %598, %cst_246 {dimension_numbers = #tpu.dot_dimension_numbers<[1], [0], [0], [1], [0, 0, 1, 1], [], []>} : vector<8x32xbf16>, vector<32x32xbf16>, vector<8x32xf32> -> vector<8x32xf32>
    %600 = vector.broadcast %596 : vector<1x32xf32> to vector<8x32xf32>
    %601 = arith.addf %599, %600 : vector<8x32xf32>
    %c1_247 = arith.constant 1 : index
    %c0_248 = arith.constant 0 : index
    %c0_249 = arith.constant 0 : index
    %602 = vector.load %arg23[%c1_247, %c0_248, %c0_249] : memref<4x1x32xf32, #tpu.memory_space<vmem>>, vector<1x1x32xf32>
    %603 = vector.shape_cast %602 : vector<1x1x32xf32> to vector<1x32xf32>
    %c1_250 = arith.constant 1 : index
    %c0_251 = arith.constant 0 : index
    %c0_252 = arith.constant 0 : index
    %604 = vector.load %arg24[%c1_250, %c0_251, %c0_252] : memref<4x1x32xf32, #tpu.memory_space<vmem>>, vector<1x1x32xf32>
    %605 = vector.shape_cast %604 : vector<1x1x32xf32> to vector<1x32xf32>
    %cst_253 = arith.constant dense<0.000000e+00> : vector<8xf32>
    %606 = vector.multi_reduction <add>, %601, %cst_253 [1] : vector<8x32xf32> to vector<8xf32>
    %607 = vector.shape_cast %606 : vector<8xf32> to vector<8x1xf32>
    %cst_254 = arith.constant 3.200000e+01 : f32
    %608 = vector.broadcast %cst_254 : f32 to vector<8x1xf32>
    %609 = arith.divf %607, %608 : vector<8x1xf32>
    %610 = vector.broadcast %609 : vector<8x1xf32> to vector<8x32xf32>
    %611 = arith.subf %601, %610 : vector<8x32xf32>
    %612 = arith.mulf %611, %611 : vector<8x32xf32>
    %cst_255 = arith.constant dense<0.000000e+00> : vector<8xf32>
    %613 = vector.multi_reduction <add>, %612, %cst_255 [1] : vector<8x32xf32> to vector<8xf32>
    %614 = vector.shape_cast %613 : vector<8xf32> to vector<8x1xf32>
    %cst_256 = arith.constant 3.200000e+01 : f32
    %615 = vector.broadcast %cst_256 : f32 to vector<8x1xf32>
    %616 = arith.divf %614, %615 : vector<8x1xf32>
    %617 = vector.broadcast %609 : vector<8x1xf32> to vector<8x32xf32>
    %618 = arith.subf %601, %617 : vector<8x32xf32>
    %cst_257 = arith.constant 9.99999974E-6 : f32
    %619 = vector.broadcast %cst_257 : f32 to vector<8x1xf32>
    %620 = arith.addf %616, %619 : vector<8x1xf32>
    %621 = math.rsqrt %620 : vector<8x1xf32>
    %622 = vector.broadcast %621 : vector<8x1xf32> to vector<8x32xf32>
    %623 = arith.mulf %618, %622 : vector<8x32xf32>
    %624 = vector.broadcast %603 : vector<1x32xf32> to vector<8x32xf32>
    %625 = arith.mulf %623, %624 : vector<8x32xf32>
    %626 = vector.broadcast %605 : vector<1x32xf32> to vector<8x32xf32>
    %627 = arith.addf %625, %626 : vector<8x32xf32>
    %cst_258 = arith.constant 0.000000e+00 : f32
    %628 = vector.broadcast %cst_258 : f32 to vector<8x32xf32>
    %629 = arith.cmpf ogt, %627, %628 : vector<8x32xf32>
    %cst_259 = arith.constant 0.000000e+00 : f32
    %630 = vector.broadcast %cst_259 : f32 to vector<8x32xf32>
    %631 = arith.minimumf %627, %630 : vector<8x32xf32>
    %632 = math.exp %631 : vector<8x32xf32>
    %cst_260 = arith.constant 1.000000e+00 : f32
    %633 = vector.broadcast %cst_260 : f32 to vector<8x32xf32>
    %634 = arith.subf %632, %633 : vector<8x32xf32>
    %cst_261 = arith.constant 1.67326319 : f32
    %635 = vector.broadcast %cst_261 : f32 to vector<8x32xf32>
    %636 = arith.mulf %635, %634 : vector<8x32xf32>
    %637 = arith.select %629, %627, %636 : vector<8x32xi1>, vector<8x32xf32>
    %cst_262 = arith.constant 1.05070102 : f32
    %638 = vector.broadcast %cst_262 : f32 to vector<8x32xf32>
    %639 = arith.mulf %638, %637 : vector<8x32xf32>
    %640 = arith.addf %639, %592 : vector<8x32xf32>
    %c2 = arith.constant 2 : index
    %c0_263 = arith.constant 0 : index
    %c0_264 = arith.constant 0 : index
    %641 = vector.load %arg21[%c2, %c0_263, %c0_264] : memref<4x32x32xf32, #tpu.memory_space<vmem>>, vector<1x32x32xf32>
    %642 = vector.shape_cast %641 : vector<1x32x32xf32> to vector<32x32xf32>
    %c2_265 = arith.constant 2 : index
    %c0_266 = arith.constant 0 : index
    %c0_267 = arith.constant 0 : index
    %643 = vector.load %arg22[%c2_265, %c0_266, %c0_267] : memref<4x1x32xf32, #tpu.memory_space<vmem>>, vector<1x1x32xf32>
    %644 = vector.shape_cast %643 : vector<1x1x32xf32> to vector<1x32xf32>
    %645 = arith.truncf %640 : vector<8x32xf32> to vector<8x32xbf16>
    %646 = arith.truncf %642 : vector<32x32xf32> to vector<32x32xbf16>
    %cst_268 = arith.constant dense<0.000000e+00> : vector<8x32xf32>
    %647 = tpu.matmul %645, %646, %cst_268 {dimension_numbers = #tpu.dot_dimension_numbers<[1], [0], [0], [1], [0, 0, 1, 1], [], []>} : vector<8x32xbf16>, vector<32x32xbf16>, vector<8x32xf32> -> vector<8x32xf32>
    %648 = vector.broadcast %644 : vector<1x32xf32> to vector<8x32xf32>
    %649 = arith.addf %647, %648 : vector<8x32xf32>
    %c2_269 = arith.constant 2 : index
    %c0_270 = arith.constant 0 : index
    %c0_271 = arith.constant 0 : index
    %650 = vector.load %arg23[%c2_269, %c0_270, %c0_271] : memref<4x1x32xf32, #tpu.memory_space<vmem>>, vector<1x1x32xf32>
    %651 = vector.shape_cast %650 : vector<1x1x32xf32> to vector<1x32xf32>
    %c2_272 = arith.constant 2 : index
    %c0_273 = arith.constant 0 : index
    %c0_274 = arith.constant 0 : index
    %652 = vector.load %arg24[%c2_272, %c0_273, %c0_274] : memref<4x1x32xf32, #tpu.memory_space<vmem>>, vector<1x1x32xf32>
    %653 = vector.shape_cast %652 : vector<1x1x32xf32> to vector<1x32xf32>
    %cst_275 = arith.constant dense<0.000000e+00> : vector<8xf32>
    %654 = vector.multi_reduction <add>, %649, %cst_275 [1] : vector<8x32xf32> to vector<8xf32>
    %655 = vector.shape_cast %654 : vector<8xf32> to vector<8x1xf32>
    %cst_276 = arith.constant 3.200000e+01 : f32
    %656 = vector.broadcast %cst_276 : f32 to vector<8x1xf32>
    %657 = arith.divf %655, %656 : vector<8x1xf32>
    %658 = vector.broadcast %657 : vector<8x1xf32> to vector<8x32xf32>
    %659 = arith.subf %649, %658 : vector<8x32xf32>
    %660 = arith.mulf %659, %659 : vector<8x32xf32>
    %cst_277 = arith.constant dense<0.000000e+00> : vector<8xf32>
    %661 = vector.multi_reduction <add>, %660, %cst_277 [1] : vector<8x32xf32> to vector<8xf32>
    %662 = vector.shape_cast %661 : vector<8xf32> to vector<8x1xf32>
    %cst_278 = arith.constant 3.200000e+01 : f32
    %663 = vector.broadcast %cst_278 : f32 to vector<8x1xf32>
    %664 = arith.divf %662, %663 : vector<8x1xf32>
    %665 = vector.broadcast %657 : vector<8x1xf32> to vector<8x32xf32>
    %666 = arith.subf %649, %665 : vector<8x32xf32>
    %cst_279 = arith.constant 9.99999974E-6 : f32
    %667 = vector.broadcast %cst_279 : f32 to vector<8x1xf32>
    %668 = arith.addf %664, %667 : vector<8x1xf32>
    %669 = math.rsqrt %668 : vector<8x1xf32>
    %670 = vector.broadcast %669 : vector<8x1xf32> to vector<8x32xf32>
    %671 = arith.mulf %666, %670 : vector<8x32xf32>
    %672 = vector.broadcast %651 : vector<1x32xf32> to vector<8x32xf32>
    %673 = arith.mulf %671, %672 : vector<8x32xf32>
    %674 = vector.broadcast %653 : vector<1x32xf32> to vector<8x32xf32>
    %675 = arith.addf %673, %674 : vector<8x32xf32>
    %cst_280 = arith.constant 0.000000e+00 : f32
    %676 = vector.broadcast %cst_280 : f32 to vector<8x32xf32>
    %677 = arith.cmpf ogt, %675, %676 : vector<8x32xf32>
    %cst_281 = arith.constant 0.000000e+00 : f32
    %678 = vector.broadcast %cst_281 : f32 to vector<8x32xf32>
    %679 = arith.minimumf %675, %678 : vector<8x32xf32>
    %680 = math.exp %679 : vector<8x32xf32>
    %cst_282 = arith.constant 1.000000e+00 : f32
    %681 = vector.broadcast %cst_282 : f32 to vector<8x32xf32>
    %682 = arith.subf %680, %681 : vector<8x32xf32>
    %cst_283 = arith.constant 1.67326319 : f32
    %683 = vector.broadcast %cst_283 : f32 to vector<8x32xf32>
    %684 = arith.mulf %683, %682 : vector<8x32xf32>
    %685 = arith.select %677, %675, %684 : vector<8x32xi1>, vector<8x32xf32>
    %cst_284 = arith.constant 1.05070102 : f32
    %686 = vector.broadcast %cst_284 : f32 to vector<8x32xf32>
    %687 = arith.mulf %686, %685 : vector<8x32xf32>
    %688 = arith.addf %687, %640 : vector<8x32xf32>
    %c3 = arith.constant 3 : index
    %c0_285 = arith.constant 0 : index
    %c0_286 = arith.constant 0 : index
    %689 = vector.load %arg21[%c3, %c0_285, %c0_286] : memref<4x32x32xf32, #tpu.memory_space<vmem>>, vector<1x32x32xf32>
    %690 = vector.shape_cast %689 : vector<1x32x32xf32> to vector<32x32xf32>
    %c3_287 = arith.constant 3 : index
    %c0_288 = arith.constant 0 : index
    %c0_289 = arith.constant 0 : index
    %691 = vector.load %arg22[%c3_287, %c0_288, %c0_289] : memref<4x1x32xf32, #tpu.memory_space<vmem>>, vector<1x1x32xf32>
    %692 = vector.shape_cast %691 : vector<1x1x32xf32> to vector<1x32xf32>
    %693 = arith.truncf %688 : vector<8x32xf32> to vector<8x32xbf16>
    %694 = arith.truncf %690 : vector<32x32xf32> to vector<32x32xbf16>
    %cst_290 = arith.constant dense<0.000000e+00> : vector<8x32xf32>
    %695 = tpu.matmul %693, %694, %cst_290 {dimension_numbers = #tpu.dot_dimension_numbers<[1], [0], [0], [1], [0, 0, 1, 1], [], []>} : vector<8x32xbf16>, vector<32x32xbf16>, vector<8x32xf32> -> vector<8x32xf32>
    %696 = vector.broadcast %692 : vector<1x32xf32> to vector<8x32xf32>
    %697 = arith.addf %695, %696 : vector<8x32xf32>
    %c3_291 = arith.constant 3 : index
    %c0_292 = arith.constant 0 : index
    %c0_293 = arith.constant 0 : index
    %698 = vector.load %arg23[%c3_291, %c0_292, %c0_293] : memref<4x1x32xf32, #tpu.memory_space<vmem>>, vector<1x1x32xf32>
    %699 = vector.shape_cast %698 : vector<1x1x32xf32> to vector<1x32xf32>
    %c3_294 = arith.constant 3 : index
    %c0_295 = arith.constant 0 : index
    %c0_296 = arith.constant 0 : index
    %700 = vector.load %arg24[%c3_294, %c0_295, %c0_296] : memref<4x1x32xf32, #tpu.memory_space<vmem>>, vector<1x1x32xf32>
    %701 = vector.shape_cast %700 : vector<1x1x32xf32> to vector<1x32xf32>
    %cst_297 = arith.constant dense<0.000000e+00> : vector<8xf32>
    %702 = vector.multi_reduction <add>, %697, %cst_297 [1] : vector<8x32xf32> to vector<8xf32>
    %703 = vector.shape_cast %702 : vector<8xf32> to vector<8x1xf32>
    %cst_298 = arith.constant 3.200000e+01 : f32
    %704 = vector.broadcast %cst_298 : f32 to vector<8x1xf32>
    %705 = arith.divf %703, %704 : vector<8x1xf32>
    %706 = vector.broadcast %705 : vector<8x1xf32> to vector<8x32xf32>
    %707 = arith.subf %697, %706 : vector<8x32xf32>
    %708 = arith.mulf %707, %707 : vector<8x32xf32>
    %cst_299 = arith.constant dense<0.000000e+00> : vector<8xf32>
    %709 = vector.multi_reduction <add>, %708, %cst_299 [1] : vector<8x32xf32> to vector<8xf32>
    %710 = vector.shape_cast %709 : vector<8xf32> to vector<8x1xf32>
    %cst_300 = arith.constant 3.200000e+01 : f32
    %711 = vector.broadcast %cst_300 : f32 to vector<8x1xf32>
    %712 = arith.divf %710, %711 : vector<8x1xf32>
    %713 = vector.broadcast %705 : vector<8x1xf32> to vector<8x32xf32>
    %714 = arith.subf %697, %713 : vector<8x32xf32>
    %cst_301 = arith.constant 9.99999974E-6 : f32
    %715 = vector.broadcast %cst_301 : f32 to vector<8x1xf32>
    %716 = arith.addf %712, %715 : vector<8x1xf32>
    %717 = math.rsqrt %716 : vector<8x1xf32>
    %718 = vector.broadcast %717 : vector<8x1xf32> to vector<8x32xf32>
    %719 = arith.mulf %714, %718 : vector<8x32xf32>
    %720 = vector.broadcast %699 : vector<1x32xf32> to vector<8x32xf32>
    %721 = arith.mulf %719, %720 : vector<8x32xf32>
    %722 = vector.broadcast %701 : vector<1x32xf32> to vector<8x32xf32>
    %723 = arith.addf %721, %722 : vector<8x32xf32>
    %cst_302 = arith.constant 0.000000e+00 : f32
    %724 = vector.broadcast %cst_302 : f32 to vector<8x32xf32>
    %725 = arith.cmpf ogt, %723, %724 : vector<8x32xf32>
    %cst_303 = arith.constant 0.000000e+00 : f32
    %726 = vector.broadcast %cst_303 : f32 to vector<8x32xf32>
    %727 = arith.minimumf %723, %726 : vector<8x32xf32>
    %728 = math.exp %727 : vector<8x32xf32>
    %cst_304 = arith.constant 1.000000e+00 : f32
    %729 = vector.broadcast %cst_304 : f32 to vector<8x32xf32>
    %730 = arith.subf %728, %729 : vector<8x32xf32>
    %cst_305 = arith.constant 1.67326319 : f32
    %731 = vector.broadcast %cst_305 : f32 to vector<8x32xf32>
    %732 = arith.mulf %731, %730 : vector<8x32xf32>
    %733 = arith.select %725, %723, %732 : vector<8x32xi1>, vector<8x32xf32>
    %cst_306 = arith.constant 1.05070102 : f32
    %734 = vector.broadcast %cst_306 : f32 to vector<8x32xf32>
    %735 = arith.mulf %734, %733 : vector<8x32xf32>
    %736 = arith.addf %735, %688 : vector<8x32xf32>
    %c0_307 = arith.constant 0 : index
    %c0_308 = arith.constant 0 : index
    %737 = vector.load %arg25[%c0_307, %c0_308] : memref<32x8xf32, #tpu.memory_space<vmem>>, vector<32x8xf32>
    %c0_309 = arith.constant 0 : index
    %c0_310 = arith.constant 0 : index
    %738 = vector.load %arg26[%c0_309, %c0_310] : memref<1x8xf32, #tpu.memory_space<vmem>>, vector<1x8xf32>
    %739 = arith.truncf %736 : vector<8x32xf32> to vector<8x32xbf16>
    %740 = arith.truncf %737 : vector<32x8xf32> to vector<32x8xbf16>
    %cst_311 = arith.constant dense<0.000000e+00> : vector<8x8xf32>
    %741 = tpu.matmul %739, %740, %cst_311 {dimension_numbers = #tpu.dot_dimension_numbers<[1], [0], [0], [1], [0, 0, 1, 1], [], []>} : vector<8x32xbf16>, vector<32x8xbf16>, vector<8x8xf32> -> vector<8x8xf32>
    %742 = vector.broadcast %738 : vector<1x8xf32> to vector<8x8xf32>
    %743 = arith.addf %741, %742 : vector<8x8xf32>
    %c0_312 = arith.constant 0 : index
    %c0_313 = arith.constant 0 : index
    %744 = vector.load %arg27[%c0_312, %c0_313] : memref<1x8xf32, #tpu.memory_space<vmem>>, vector<1x8xf32>
    %c0_314 = arith.constant 0 : index
    %c0_315 = arith.constant 0 : index
    %745 = vector.load %arg28[%c0_314, %c0_315] : memref<1x8xf32, #tpu.memory_space<vmem>>, vector<1x8xf32>
    %cst_316 = arith.constant dense<0.000000e+00> : vector<8xf32>
    %746 = vector.multi_reduction <add>, %743, %cst_316 [1] : vector<8x8xf32> to vector<8xf32>
    %747 = vector.shape_cast %746 : vector<8xf32> to vector<8x1xf32>
    %cst_317 = arith.constant 8.000000e+00 : f32
    %748 = vector.broadcast %cst_317 : f32 to vector<8x1xf32>
    %749 = arith.divf %747, %748 : vector<8x1xf32>
    %750 = vector.broadcast %749 : vector<8x1xf32> to vector<8x8xf32>
    %751 = arith.subf %743, %750 : vector<8x8xf32>
    %752 = arith.mulf %751, %751 : vector<8x8xf32>
    %cst_318 = arith.constant dense<0.000000e+00> : vector<8xf32>
    %753 = vector.multi_reduction <add>, %752, %cst_318 [1] : vector<8x8xf32> to vector<8xf32>
    %754 = vector.shape_cast %753 : vector<8xf32> to vector<8x1xf32>
    %cst_319 = arith.constant 8.000000e+00 : f32
    %755 = vector.broadcast %cst_319 : f32 to vector<8x1xf32>
    %756 = arith.divf %754, %755 : vector<8x1xf32>
    %757 = vector.broadcast %749 : vector<8x1xf32> to vector<8x8xf32>
    %758 = arith.subf %743, %757 : vector<8x8xf32>
    %cst_320 = arith.constant 9.99999974E-6 : f32
    %759 = vector.broadcast %cst_320 : f32 to vector<8x1xf32>
    %760 = arith.addf %756, %759 : vector<8x1xf32>
    %761 = math.rsqrt %760 : vector<8x1xf32>
    %762 = vector.broadcast %761 : vector<8x1xf32> to vector<8x8xf32>
    %763 = arith.mulf %758, %762 : vector<8x8xf32>
    %764 = vector.broadcast %744 : vector<1x8xf32> to vector<8x8xf32>
    %765 = arith.mulf %763, %764 : vector<8x8xf32>
    %766 = vector.broadcast %745 : vector<1x8xf32> to vector<8x8xf32>
    %767 = arith.addf %765, %766 : vector<8x8xf32>
    %768 = vector.shape_cast %767 : vector<8x8xf32> to vector<1x8x8xf32>
    %c0_321 = arith.constant 0 : index
    %c0_322 = arith.constant 0 : index
    %c0_323 = arith.constant 0 : index
    %769 = vector.load %arg29[%c0_321, %c0_322, %c0_323] : memref<1x8x8xf32, #tpu.memory_space<vmem>>, vector<1x8x8xf32>
    tpu.vector_store %arg29[%c0_321, %c0_322, %c0_323], %768 {strides = array<i32>} : memref<1x8x8xf32, #tpu.memory_space<vmem>>, vector<1x8x8xf32>,
    return
  }
  func.func @transform_0(%arg0: i32) -> (i32, i32, i32) {
    %c0_i32 = arith.constant 0 : i32
    %c0_i32_0 = arith.constant 0 : i32
    %c0_i32_1 = arith.constant 0 : i32
    return %arg0, %c0_i32, %c0_i32_0 : i32, i32, i32
  }
  func.func @transform_1(%arg0: i32) -> (i32, i32, i32) {
    %c0_i32 = arith.constant 0 : i32
    %c0_i32_0 = arith.constant 0 : i32
    %c0_i32_1 = arith.constant 0 : i32
    return %arg0, %c0_i32, %c0_i32_0 : i32, i32, i32
  }
  func.func @transform_2(%arg0: i32) -> (i32, i32) {
    %c0_i32 = arith.constant 0 : i32
    %c0_i32_0 = arith.constant 0 : i32
    %c0_i32_1 = arith.constant 0 : i32
    return %c0_i32, %c0_i32_0 : i32, i32
  }
  func.func @transform_3(%arg0: i32) -> (i32, i32) {
    %c0_i32 = arith.constant 0 : i32
    %c0_i32_0 = arith.constant 0 : i32
    %c0_i32_1 = arith.constant 0 : i32
    return %c0_i32, %c0_i32_0 : i32, i32
  }
  func.func @transform_4(%arg0: i32) -> (i32, i32, i32) {
    %c0_i32 = arith.constant 0 : i32
    %c0_i32_0 = arith.constant 0 : i32
    %c0_i32_1 = arith.constant 0 : i32
    %c0_i32_2 = arith.constant 0 : i32
    return %c0_i32, %c0_i32_0, %c0_i32_1 : i32, i32, i32
  }
  func.func @transform_5(%arg0: i32) -> (i32, i32, i32) {
    %c0_i32 = arith.constant 0 : i32
    %c0_i32_0 = arith.constant 0 : i32
    %c0_i32_1 = arith.constant 0 : i32
    %c0_i32_2 = arith.constant 0 : i32
    return %c0_i32, %c0_i32_0, %c0_i32_1 : i32, i32, i32
  }
  func.func @transform_6(%arg0: i32) -> (i32, i32, i32) {
    %c0_i32 = arith.constant 0 : i32
    %c0_i32_0 = arith.constant 0 : i32
    %c0_i32_1 = arith.constant 0 : i32
    %c0_i32_2 = arith.constant 0 : i32
    return %c0_i32, %c0_i32_0, %c0_i32_1 : i32, i32, i32
  }
  func.func @transform_7(%arg0: i32) -> (i32, i32, i32) {
    %c0_i32 = arith.constant 0 : i32
    %c0_i32_0 = arith.constant 0 : i32
    %c0_i32_1 = arith.constant 0 : i32
    %c0_i32_2 = arith.constant 0 : i32
    return %c0_i32, %c0_i32_0, %c0_i32_1 : i32, i32, i32
  }
  func.func @transform_8(%arg0: i32) -> (i32, i32, i32) {
    %c0_i32 = arith.constant 0 : i32
    %c0_i32_0 = arith.constant 0 : i32
    %c0_i32_1 = arith.constant 0 : i32
    %c0_i32_2 = arith.constant 0 : i32
    return %c0_i32, %c0_i32_0, %c0_i32_1 : i32, i32, i32
  }
  func.func @transform_9(%arg0: i32) -> (i32, i32, i32) {
    %c0_i32 = arith.constant 0 : i32
    %c0_i32_0 = arith.constant 0 : i32
    %c0_i32_1 = arith.constant 0 : i32
    %c0_i32_2 = arith.constant 0 : i32
    return %c0_i32, %c0_i32_0, %c0_i32_1 : i32, i32, i32
  }
  func.func @transform_10(%arg0: i32) -> (i32, i32, i32) {
    %c0_i32 = arith.constant 0 : i32
    %c0_i32_0 = arith.constant 0 : i32
    %c0_i32_1 = arith.constant 0 : i32
    %c0_i32_2 = arith.constant 0 : i32
    return %c0_i32, %c0_i32_0, %c0_i32_1 : i32, i32, i32
  }
  func.func @transform_11(%arg0: i32) -> (i32, i32, i32) {
    %c0_i32 = arith.constant 0 : i32
    %c0_i32_0 = arith.constant 0 : i32
    %c0_i32_1 = arith.constant 0 : i32
    %c0_i32_2 = arith.constant 0 : i32
    return %c0_i32, %c0_i32_0, %c0_i32_1 : i32, i32, i32
  }
  func.func @transform_12(%arg0: i32) -> (i32, i32, i32) {
    %c0_i32 = arith.constant 0 : i32
    %c0_i32_0 = arith.constant 0 : i32
    %c0_i32_1 = arith.constant 0 : i32
    %c0_i32_2 = arith.constant 0 : i32
    return %c0_i32, %c0_i32_0, %c0_i32_1 : i32, i32, i32
  }
  func.func @transform_13(%arg0: i32) -> (i32, i32, i32) {
    %c0_i32 = arith.constant 0 : i32
    %c0_i32_0 = arith.constant 0 : i32
    %c0_i32_1 = arith.constant 0 : i32
    %c0_i32_2 = arith.constant 0 : i32
    return %c0_i32, %c0_i32_0, %c0_i32_1 : i32, i32, i32
  }
  func.func @transform_14(%arg0: i32) -> (i32, i32, i32) {
    %c0_i32 = arith.constant 0 : i32
    %c0_i32_0 = arith.constant 0 : i32
    %c0_i32_1 = arith.constant 0 : i32
    %c0_i32_2 = arith.constant 0 : i32
    return %c0_i32, %c0_i32_0, %c0_i32_1 : i32, i32, i32
  }
  func.func @transform_15(%arg0: i32) -> (i32, i32, i32) {
    %c0_i32 = arith.constant 0 : i32
    %c0_i32_0 = arith.constant 0 : i32
    %c0_i32_1 = arith.constant 0 : i32
    %c0_i32_2 = arith.constant 0 : i32
    return %c0_i32, %c0_i32_0, %c0_i32_1 : i32, i32, i32
  }
  func.func @transform_16(%arg0: i32) -> (i32, i32) {
    %c0_i32 = arith.constant 0 : i32
    %c0_i32_0 = arith.constant 0 : i32
    %c0_i32_1 = arith.constant 0 : i32
    return %c0_i32, %c0_i32_0 : i32, i32
  }
  func.func @transform_17(%arg0: i32) -> (i32, i32) {
    %c0_i32 = arith.constant 0 : i32
    %c0_i32_0 = arith.constant 0 : i32
    %c0_i32_1 = arith.constant 0 : i32
    return %c0_i32, %c0_i32_0 : i32, i32
  }
  func.func @transform_18(%arg0: i32) -> (i32, i32) {
    %c0_i32 = arith.constant 0 : i32
    %c0_i32_0 = arith.constant 0 : i32
    %c0_i32_1 = arith.constant 0 : i32
    return %c0_i32, %c0_i32_0 : i32, i32
  }
  func.func @transform_19(%arg0: i32) -> (i32, i32) {
    %c0_i32 = arith.constant 0 : i32
    %c0_i32_0 = arith.constant 0 : i32
    %c0_i32_1 = arith.constant 0 : i32
    return %c0_i32, %c0_i32_0 : i32, i32
  }
  func.func @transform_20(%arg0: i32) -> (i32, i32, i32) {
    %c0_i32 = arith.constant 0 : i32
    %c0_i32_0 = arith.constant 0 : i32
    %c0_i32_1 = arith.constant 0 : i32
    %c0_i32_2 = arith.constant 0 : i32
    return %c0_i32, %c0_i32_0, %c0_i32_1 : i32, i32, i32
  }
  func.func @transform_21(%arg0: i32) -> (i32, i32, i32) {
    %c0_i32 = arith.constant 0 : i32
    %c0_i32_0 = arith.constant 0 : i32
    %c0_i32_1 = arith.constant 0 : i32
    %c0_i32_2 = arith.constant 0 : i32
    return %c0_i32, %c0_i32_0, %c0_i32_1 : i32, i32, i32
  }
  func.func @transform_22(%arg0: i32) -> (i32, i32, i32) {
    %c0_i32 = arith.constant 0 : i32
    %c0_i32_0 = arith.constant 0 : i32
    %c0_i32_1 = arith.constant 0 : i32
    %c0_i32_2 = arith.constant 0 : i32
    return %c0_i32, %c0_i32_0, %c0_i32_1 : i32, i32, i32
  }
  func.func @transform_23(%arg0: i32) -> (i32, i32, i32) {
    %c0_i32 = arith.constant 0 : i32
    %c0_i32_0 = arith.constant 0 : i32
    %c0_i32_1 = arith.constant 0 : i32
    %c0_i32_2 = arith.constant 0 : i32
    return %c0_i32, %c0_i32_0, %c0_i32_1 : i32, i32, i32
  }
  func.func @transform_24(%arg0: i32) -> (i32, i32) {
    %c0_i32 = arith.constant 0 : i32
    %c0_i32_0 = arith.constant 0 : i32
    %c0_i32_1 = arith.constant 0 : i32
    return %c0_i32, %c0_i32_0 : i32, i32
  }
  func.func @transform_25(%arg0: i32) -> (i32, i32) {
    %c0_i32 = arith.constant 0 : i32
    %c0_i32_0 = arith.constant 0 : i32
    %c0_i32_1 = arith.constant 0 : i32
    return %c0_i32, %c0_i32_0 : i32, i32
  }
  func.func @transform_26(%arg0: i32) -> (i32, i32) {
    %c0_i32 = arith.constant 0 : i32
    %c0_i32_0 = arith.constant 0 : i32
    %c0_i32_1 = arith.constant 0 : i32
    return %c0_i32, %c0_i32_0 : i32, i32
  }
  func.func @transform_27(%arg0: i32) -> (i32, i32) {
    %c0_i32 = arith.constant 0 : i32
    %c0_i32_0 = arith.constant 0 : i32
    %c0_i32_1 = arith.constant 0 : i32
    return %c0_i32, %c0_i32_0 : i32, i32
  }
  func.func @transform_28(%arg0: i32) -> (i32, i32, i32) {
    %c0_i32 = arith.constant 0 : i32
    %c0_i32_0 = arith.constant 0 : i32
    %c0_i32_1 = arith.constant 0 : i32
    return %arg0, %c0_i32, %c0_i32_0 : i32, i32, i32
  }
}

</mosaic_0001>

<bundles_post_ra>
// kernel: transformer_enc_only_forward.1
= control target key start
LH: loop header
LB: loop body
LE: loop exit
PB: predicated region body
PF: predicated region fallthrough
CT: control target
= control target key end

     0   :  { %s6795_s0 = inlined_call_operand.vmem [shape: f32[2,8,32], index: 0, kind: input, shape index: {}]   ;;  %s6796_s1 = inlined_call_operand.vmem [shape: s32[2,1,8], index: 1, kind: input, shape index: {}]   ;;  %s6797_s2 = inlined_call_operand.hbm [shape: f32[32,64], index: 2, kind: input, shape index: {}]   ;;  %s6798_s3 = inlined_call_operand.vmem [shape: f32[1,64], index: 3, kind: input, shape index: {}]   ;;  %s6799_s4 = inlined_call_operand.vmem [shape: f32[2,64,192], index: 4, kind: input, shape index: {}]   ;;  %s6800_s5 = inlined_call_operand.hbm [shape: f32[2,1,192], index: 5, kind: input, shape index: {}]   ;;  %s6801_s6 = inlined_call_operand.vmem [shape: f32[2,64,64], index: 6, kind: input, shape index: {}]   ;;  %s6802_s7 = inlined_call_operand.hbm [shape: f32[2,1,64], index: 7, kind: input, shape index: {}]   ;;  %s6803_s8 = inlined_call_operand.hbm [shape: f32[2,1,64], index: 8, kind: input, shape index: {}]   ;;  %s6804_s9 = inlined_call_operand.hbm [shape: f32[2,1,64], index: 9, kind: input, shape index: {}]   ;;  %s6805_s10 = inlined_call_operand.vmem [shape: f32[2,64,32], index: 10, kind: input, shape index: {}]   ;;  %s6806_s11 = inlined_call_operand.hbm [shape: f32[2,1,32], index: 11, kind: input, shape index: {}]   ;;  %s6807_s12 = inlined_call_operand.hbm [shape: f32[2,32,64], index: 12, kind: input, shape index: {}]   ;;  %s6808_s13 = inlined_call_operand.hbm [shape: f32[2,1,64], index: 13, kind: input, shape index: {}]   ;;  %s6809_s14 = inlined_call_operand.hbm [shape: f32[2,1,64], index: 14, kind: input, shape index: {}]   ;;  %s6810_s15 = inlined_call_operand.hbm [shape: f32[2,1,64], index: 15, kind: input, shape index: {}]   ;;  %s6811_s16 = inlined_call_operand.hbm [shape: f32[1,64], index: 16, kind: input, shape index: {}]   ;;  %s6812_s17 = inlined_call_operand.hbm [shape: f32[1,64], index: 17, kind: input, shape index: {}]   ;;  %s6813_s18 = inlined_call_operand.vmem [shape: f32[64,32], index: 18, kind: input, shape index: {}]   ;;  %s6814_s19 = inlined_call_operand.hbm [shape: f32[1,32], index: 19, kind: input, shape index: {}]   ;;  %s6815_s20 = inlined_call_operand.hbm [shape: f32[4,32,32], index: 20, kind: input, shape index: {}]   ;;  %s6816_s21 = inlined_call_operand.hbm [shape: f32[4,1,32], index: 21, kind: input, shape index: {}]   ;;  %s6817_s22 = inlined_call_operand.hbm [shape: f32[4,1,32], index: 22, kind: input, shape index: {}]   ;;  %s6818_s23 = inlined_call_operand.hbm [shape: f32[4,1,32], index: 23, kind: input, shape index: {}]   ;;  %s6819_s24 = inlined_call_operand.vmem [shape: f32[32,8], index: 24, kind: input, shape index: {}]   ;;  %s6820_s25 = inlined_call_operand.hbm [shape: f32[1,8], index: 25, kind: input, shape index: {}]   ;;  %s6821_s26 = inlined_call_operand.hbm [shape: f32[1,8], index: 26, kind: input, shape index: {}]   ;;  %s6822_s27 = inlined_call_operand.hbm [shape: f32[1,8], index: 27, kind: input, shape index: {}]   ;;  %s6823_s28 = inlined_call_operand.hbm [shape: f32[2,8,8], index: 28, kind: output, shape index: {}]  }
   0x1   :  { %6875 = sst [smem:[#allocation58_spill]] %s6795_s0 }
   0x2   :  { %6876 = sst [smem:[#allocation59_spill]] %s6796_s1 }
   0x3   :  { %6877 = sst [smem:[#allocation60_spill]] %s6797_s2 }
   0x4   :  { %6878 = sst [smem:[#allocation61_spill]] %s6798_s3 }
   0x5   :  { %6879 = sst [smem:[#allocation62_spill]] %s6799_s4 }
   0x6   :  { %6880 = sst [smem:[#allocation63_spill]] %s6800_s5 }
   0x7   :  { %6881 = sst [smem:[#allocation64_spill]] %s6801_s6 }
   0x8   :  { %6882 = sst [smem:[#allocation65_spill]] %s6802_s7 }
   0x9   :  { %6883 = sst [smem:[#allocation66_spill]] %s6803_s8 }
   0xa   :  { %6884 = sst [smem:[#allocation67_spill]] %s6804_s9 }
   0xb   :  { %6885 = sst [smem:[#allocation68_spill]] %s6805_s10 }
   0xc   :  { %6886 = sst [smem:[#allocation69_spill]] %s6806_s11 }
   0xd   :  { %6887 = sst [smem:[#allocation70_spill]] %s6807_s12 }
   0xe   :  { %6888 = sst [smem:[#allocation71_spill]] %s6808_s13 }
   0xf   :  { %6889 = sst [smem:[#allocation72_spill]] %s6810_s15 }
  0x10   :  { %6890 = sst [smem:[#allocation73_spill]] %s6813_s18 }
  0x11   :  { %6891 = sst [smem:[#allocation74_spill]] %s6819_s24 }
  0x12   :  { %6892 = sst [smem:[#allocation75_spill]] %s6822_s27 }
  0x13   :  { %6893 = sst [smem:[#allocation76_spill]] %s6823_s28 }
  0x14   :  { %33 = vsyncpa [#allocation4], 0 }
  0x15   :  { %34 = vsyncpa [#allocation7], 0 }
  0x16   :  { %35 = vsyncpa [#allocation10], 0 }
  0x17   :  { %36 = vsyncpa [#allocation13], 0 }
  0x18   :  { %37 = vsyncpa [#allocation16], 0 }
  0x19   :  { %38 = vsyncpa [#allocation19], 0 }
  0x1a   :  { %39 = vsyncpa [#allocation22], 0 }
  0x1b   :  { %40 = vsyncpa [#allocation25], 0 }
  0x1c   :  { %41 = vsyncpa [#allocation28], 0 }
  0x1d   :  { %42 = vsyncpa [#allocation31], 0 }
  0x1e   :  { %43 = vsyncpa [#allocation34], 0 }
  0x1f   :  { %44 = vsyncpa [#allocation5], 0 }
  0x20   :  { %46 = vsyncpa [#allocation5 + $0x1], 0  ;;  %s5638_s8 = smov 0   ;;  %s5640_s5 = smov 0  }
  0x21   :  { %s5642_s9 = smov 0   ;;  %s5644_s30 = smov 0  }
  0x22 LB: > { %6894 = sst [smem:[#allocation48_spill]] %s5441_s8  ;;  %s5659_s3 = sadd.s32 4294967295, %s5453_s30   ;;  %s5453_s30 = sphi %s5644_s30, %s6975_s30   ;;  %s5449_s9 = sphi %s5642_s9, %s6978_s9   ;;  %s5445_s5 = sphi %s5640_s5, %s6977_s5   ;;  %s5441_s8 = sphi %s5638_s8, %s6976_s8  }
  0x23   : > { %6895 = sst [smem:[#allocation49_spill]] %s5445_s5  ;;  %s3948_s6 = sadd.s32 4294967294, %s5453_s30  }
  0x24   : > { %6896 = sst [smem:[#allocation50_spill]] %s5449_s9  ;;  %s5663_s10 = sadd.s32 1, %s5453_s30  }
  0x25   : > { %6897 = sst [smem:[#allocation51_spill]] %s5453_s30  ;;  %s657_s0 = sadd.s32 1, %s5449_s9 }
  0x26   : > { %6898 = sst [smem:[#allocation52_spill]] %s5659_s3  ;;  %s654_s11 = ssub.s32 %s5453_s30, %s5663_s10 }
  0x27   : > { %6899 = sst [smem:[#allocation53_spill]] %s5663_s10  ;;  %p667_p0 = scmp.ne.s32.totalorder %s5449_s9, %s5445_s5 }
  0x28   : > { %p655_p1 = scmp.eq.s32.totalorder %s654_s11, 0  ;;  %p668_p2 = scmp.eq.s32.totalorder %s5659_s3, 1 }
  0x29   : > { %p673_p3 = scmp.ne.s32.totalorder %s5445_s5, %s5441_s8  ;;  %p674_p4 = scmp.eq.s32.totalorder %s3948_s6, 1 }
  0x2a   : > { %s5674_s29 = scalar_select %p655_p1, %s5449_s9, %s657_s0  }
  0x2b   : > { %p5676_p5 = por %p668_p2, %p667_p0  ;;  %p5680_p6 = por %p674_p4, %p673_p3 }
  0x2c   : > { %6900 = sst [smem:[#allocation54_spill]] %s5674_s29  ;;  %p3949_p7 = scmp.ge.s32.totalorder %s5453_s30, 1 }
  0x2d   : > { %s6901_s2 = scalar_select %p5676_p5, 1, 0 }
  0x2e   : > { %s6903_s7 = scalar_select %p5680_p6, 1, 0 }
  0x2f   : > { %6902 = sst [smem:[#allocation55_spill]] %s6901_s2  ;;  %p681_p8 = scmp.lt.s32.totalorder %s5453_s30, 3 }
  0x30   : > { %6904 = sst [smem:[#allocation56_spill]] %s6903_s7  ;;  %p6843_p9 = scmp.eq.s32.totalorder %s5659_s3, 0 }
  0x31   : > { %p5687_p10 = pnand %p3949_p7, %p681_p8  ;;  %s5455_s1 = smov [#allocation6]  }
  0x32   : > { %s712_s4 = sshll.u32 %s5455_s1, 4  ;;  %s5456_s0 = smov [#allocation9]   ;;  %s713_s4 = int_to_ptr.vmem [resolvable:$true] %s712_s4 }
  0x33   : > { %s6905_s12 = scalar_select %p5687_p10, 1, 0 }
  0x34   : > { %p4542_p11 = pneg %p5687_p10  ;;  %s741_s11 = sshll.u32 %s5456_s0, 4  ;;  %s742_s11 = int_to_ptr.vmem [resolvable:$true] %s741_s11 }
  0x35   : > { %6906 = sst [smem:[#allocation57_spill]] %s6905_s12  ;;  %s6908_s10 = sld [smem:[#allocation63_spill]] }
  0x36   : > { %p5695_p12 = pnand %p6843_p9, %p4542_p11 }
  0x38   : > { %p5707_p0 = pneg %p5695_p12 }
  0x3b   : > { %s4787_s7 = scalar_lea.hbm %s6908_s10, 64 }
  0x3c   : > { %p4788_p13 = scmp.ne.s32.totalorder %s6908_s10, %s4787_s7  ;;  %p4794_p3 = scmp.lt.u32.totalorder %s4787_s7, %s6908_s10 }
  0x3e   : > { %p4790_p1 = pnand %p5707_p0, %p4788_p13 }
  0x40   : > { %p4791_p2 = pneg %p4790_p1 }
  0x42   : > { %p4796_p4 = pnand %p4794_p3, %p4791_p2 }
  0x44   : > { %4799 = shalt.err (!%p4796_p4)
}
  0x45   : > { %s4800_s9 = scalar_lea.vmem %s713_s4, 64  ;;  %p4808_p9 = scmp.lt.s32.totalorder %s713_s4, %s713_s4 }
  0x46   : > { %p4801_p7 = scmp.ne.s32.totalorder %s713_s4, %s4800_s9  ;;  %p4809_p6 = scmp.lt.s32.totalorder %s4800_s9, %s4800_s9 }
  0x48   : > { %p4803_p8 = pnand %p4801_p7, %p5707_p0  ;;  %p4810_p5 = por %p4809_p6, %p4808_p9 }
  0x4a   : > { %p4804_p11 = pneg %p4803_p8 }
  0x4c   : > { %p4811_p10 = pnand %p4810_p5, %p4804_p11 }
  0x4e   : > { %4814 = shalt.err (!%p4811_p10)
}
  0x4f   : > { %s5457_s8 = smov 32   ;;  %s5458_s30 = smov 2  }
  0x50   : > { %4548 = dma.hbm_to_vmem [thread:$0]  (!%p5695_p12), %s6908_s10, 64, %s713_s4, [#allocation7], %s5457_s8, %s5457_s8, %s5458_s30  }
  0x51   : > { %s5459_s2 = smov [#allocation12]   ;;  %s6910_s24 = sld [smem:[#allocation66_spill]] }
  0x52   : > { %s770_s7 = sshll.u32 %s5459_s2, 4  ;;  %s771_s7 = int_to_ptr.vmem [resolvable:$true] %s770_s7 }
  0x57   : > { %s4815_s18 = scalar_lea.hbm %s6910_s24, 32 }
  0x58   : > { %p4816_p5 = scmp.ne.s32.totalorder %s6910_s24, %s4815_s18  ;;  %p4822_p10 = scmp.lt.u32.totalorder %s4815_s18, %s6910_s24 }
  0x5a   : > { %p4818_p6 = pnand %p4816_p5, %p5707_p0 }
  0x5c   : > { %p4819_p9 = pneg %p4818_p6 }
  0x5e   : > { %p4824_p13 = pnand %p4822_p10, %p4819_p9 }
  0x60   : > { %4827 = shalt.err (!%p4824_p13)
}
  0x61   : > { %s4828_s4 = scalar_lea.vmem %s742_s11, 32  ;;  %p4836_p4 = scmp.lt.s32.totalorder %s742_s11, %s742_s11 }
  0x62   : > { %p4829_p1 = scmp.ne.s32.totalorder %s742_s11, %s4828_s4  ;;  %p4837_p7 = scmp.lt.s32.totalorder %s4828_s4, %s4828_s4 }
  0x64   : > { %p4831_p2 = pnand %p4829_p1, %p5707_p0  ;;  %p4838_p8 = por %p4837_p7, %p4836_p4 }
  0x66   : > { %p4832_p3 = pneg %p4831_p2 }
  0x68   : > { %p4839_p11 = pnand %p4838_p8, %p4832_p3 }
  0x6a   : > { %4842 = shalt.err (!%p4839_p11)
}
  0x6b   : > { %s6856_s5 = smov 16   ;;  %s6858_s3 = smov 1  }
  0x6c   : > { %4554 = dma.hbm_to_vmem [thread:$0]  (!%p5695_p12), %s6910_s24, 32, %s742_s11, [#allocation10], %s6856_s5, %s6856_s5, %s6858_s3  }
  0x6d   : > { %s6911_s30 = sld [smem:[#allocation69_spill]] }
  0x73   : > { %s6912_s28 = smov %s6911_s30  ;;  %s4843_s29 = scalar_lea.hbm %s6911_s30, 32 }
  0x74   : > { %p4844_p5 = scmp.ne.s32.totalorder %s6912_s28, %s4843_s29  ;;  %p4850_p10 = scmp.lt.u32.totalorder %s4843_s29, %s6912_s28 }
  0x76   : > { %p4846_p6 = pnand %p4844_p5, %p5707_p0 }
  0x78   : > { %p4847_p9 = pneg %p4846_p6 }
  0x7a   : > { %p4852_p13 = pnand %p4850_p10, %p4847_p9 }
  0x7c   : > { %4855 = shalt.err (!%p4852_p13)
}
  0x7d   : > { %s4856_s18 = scalar_lea.vmem %s771_s7, 32  ;;  %p4864_p4 = scmp.lt.s32.totalorder %s771_s7, %s771_s7 }
  0x7e   : > { %p4857_p1 = scmp.ne.s32.totalorder %s771_s7, %s4856_s18  ;;  %p4865_p7 = scmp.lt.s32.totalorder %s4856_s18, %s4856_s18 }
  0x80   : > { %p4859_p2 = pnand %p4857_p1, %p5707_p0  ;;  %p4866_p8 = por %p4865_p7, %p4864_p4 }
  0x82   : > { %p4860_p3 = pneg %p4859_p2 }
  0x84   : > { %p4867_p11 = pnand %p4866_p8, %p4860_p3 }
  0x86   : > { %4870 = shalt.err (!%p4867_p11)
}
  0x87   : > { %4560 = dma.hbm_to_vmem [thread:$0]  (!%p5695_p12), %s6912_s28, 32, %s771_s7, [#allocation13], %s6856_s5, %s6856_s5, %s6858_s3  }
  0x88   : > { %s5462_s12 = smov [#allocation15]   ;;  %s5463_s30 = smov [#allocation18]  }
  0x89   : > { %s796_s8 = sshll.u32 %s5462_s12, 4  ;;  %s822_s29 = sshll.u32 %s5463_s30, 4  ;;  %s797_s8 = int_to_ptr.vmem [resolvable:$true] %s796_s8  ;;  %s823_s29 = int_to_ptr.vmem [resolvable:$true] %s822_s29 }
  0x8a   : > { %s6913_s13 = sld [smem:[#allocation71_spill]] }
  0x90   : > { %s4871_s9 = scalar_lea.hbm %s6913_s13, 32 }
  0x91   : > { %p4872_p5 = scmp.ne.s32.totalorder %s6913_s13, %s4871_s9  ;;  %p4878_p10 = scmp.lt.u32.totalorder %s4871_s9, %s6913_s13 }
  0x93   : > { %p4874_p6 = pnand %p4872_p5, %p5707_p0 }
  0x95   : > { %p4875_p9 = pneg %p4874_p6 }
  0x97   : > { %p4880_p13 = pnand %p4878_p10, %p4875_p9 }
  0x99   : > { %4883 = shalt.err (!%p4880_p13)
}
  0x9a   : > { %s4884_s7 = scalar_lea.vmem %s797_s8, 32  ;;  %p4892_p4 = scmp.lt.s32.totalorder %s797_s8, %s797_s8 }
  0x9b   : > { %p4885_p1 = scmp.ne.s32.totalorder %s797_s8, %s4884_s7  ;;  %p4893_p7 = scmp.lt.s32.totalorder %s4884_s7, %s4884_s7 }
  0x9d   : > { %p4887_p2 = pnand %p4885_p1, %p5707_p0  ;;  %p4894_p8 = por %p4893_p7, %p4892_p4 }
  0x9f   : > { %p4888_p3 = pneg %p4887_p2 }
  0xa1   : > { %p4895_p11 = pnand %p4894_p8, %p4888_p3 }
  0xa3   : > { %4898 = shalt.err (!%p4895_p11)
}
  0xa4   : > { %4566 = dma.hbm_to_vmem [thread:$0]  (!%p5695_p12), %s6913_s13, 32, %s797_s8, [#allocation16], %s6856_s5, %s6856_s5, %s6858_s3  }
  0xa5   : > { %s6914_s15 = sld [smem:[#allocation72_spill]] }
  0xab   : > { %s4899_s2 = scalar_lea.hbm %s6914_s15, 32 }
  0xac   : > { %p4900_p5 = scmp.ne.s32.totalorder %s6914_s15, %s4899_s2  ;;  %p4906_p10 = scmp.lt.u32.totalorder %s4899_s2, %s6914_s15 }
  0xae   : > { %p4902_p6 = pnand %p4900_p5, %p5707_p0 }
  0xb0   : > { %p4903_p9 = pneg %p4902_p6 }
  0xb2   : > { %p4908_p13 = pnand %p4906_p10, %p4903_p9 }
  0xb4   : > { %4911 = shalt.err (!%p4908_p13)
}
  0xb5   : > { %s4912_s11 = scalar_lea.vmem %s823_s29, 32  ;;  %p4920_p4 = scmp.lt.s32.totalorder %s823_s29, %s823_s29 }
  0xb6   : > { %p4913_p1 = scmp.ne.s32.totalorder %s823_s29, %s4912_s11  ;;  %p4921_p7 = scmp.lt.s32.totalorder %s4912_s11, %s4912_s11 }
  0xb8   : > { %p4915_p2 = pnand %p4913_p1, %p5707_p0  ;;  %p4922_p8 = por %p4921_p7, %p4920_p4 }
  0xba   : > { %p4916_p3 = pneg %p4915_p2 }
  0xbc   : > { %p4923_p11 = pnand %p4922_p8, %p4916_p3 }
  0xbe   : > { %4926 = shalt.err (!%p4923_p11)
}
  0xbf   : > { %4572 = dma.hbm_to_vmem [thread:$0]  (!%p5695_p12), %s6914_s15, 32, %s823_s29, [#allocation19], %s6856_s5, %s6856_s5, %s6858_s3  }
  0xc0   : > { %s5464_s10 = smov [#allocation21]   ;;  %s4927_s2 = scalar_lea.hbm %s6812_s17, 16 }
  0xc1   : > { %s847_s27 = sshll.u32 %s5464_s10, 4  ;;  %p4928_p5 = scmp.ne.s32.totalorder %s6812_s17, %s4927_s2  ;;  %s848_s27 = int_to_ptr.vmem [resolvable:$true] %s847_s27 }
  0xc2   : > { %p4934_p10 = scmp.lt.u32.totalorder %s4927_s2, %s6812_s17 }
  0xc3   : > { %p4930_p6 = pnand %p4928_p5, %p5707_p0 }
  0xc5   : > { %p4931_p9 = pneg %p4930_p6 }
  0xc7   : > { %p4936_p13 = pnand %p4934_p10, %p4931_p9 }
  0xc9   : > { %4939 = shalt.err (!%p4936_p13)
}
  0xca   : > { %s4940_s29 = scalar_lea.vmem %s848_s27, 16  ;;  %s4947_s11 = scalar_lea.vmem %s848_s27, 32 }
  0xcb   : > { %p4941_p1 = scmp.ne.s32.totalorder %s848_s27, %s4940_s29  ;;  %p4948_p4 = scmp.lt.s32.totalorder %s848_s27, %s848_s27 }
  0xcc   : > { %p4949_p7 = scmp.lt.s32.totalorder %s4947_s11, %s4940_s29 }
  0xcd   : > { %p4943_p2 = pnand %p4941_p1, %p5707_p0 }
  0xce   : > { %p4950_p8 = por %p4949_p7, %p4948_p4 }
  0xcf   : > { %p4944_p3 = pneg %p4943_p2 }
  0xd1   : > { %p4951_p11 = pnand %p4950_p8, %p4944_p3 }
  0xd3   : > { %4954 = shalt.err (!%p4951_p11)
}
  0xd4   : > { %4578 = dma.hbm_to_vmem [thread:$0]  (!%p5695_p12), %s6812_s17, 16, %s848_s27, [#allocation22]  }
  0xd5   : > { %s5465_s10 = smov [#allocation24]   ;;  %s5466_s30 = smov [#allocation27]  }
  0xd6   : > { %s871_s12 = sshll.u32 %s5465_s10, 4  ;;  %s897_s2 = sshll.u32 %s5466_s30, 4  ;;  %s872_s12 = int_to_ptr.vmem [resolvable:$true] %s871_s12  ;;  %s5825_s2 = int_to_ptr.vmem [resolvable:$true] %s897_s2 }
  0xd7   : > { %s4955_s4 = scalar_lea.hbm %s6815_s20, 2048 }
  0xd8   : > { %p4956_p5 = scmp.ne.s32.totalorder %s6815_s20, %s4955_s4  ;;  %p4962_p10 = scmp.lt.u32.totalorder %s4955_s4, %s6815_s20 }
  0xda   : > { %p4958_p6 = pnand %p4956_p5, %p5707_p0 }
  0xdc   : > { %p4959_p9 = pneg %p4958_p6 }
  0xde   : > { %p4964_p13 = pnand %p4962_p10, %p4959_p9 }
  0xe0   : > { %4967 = shalt.err (!%p4964_p13)
}
  0xe1   : > { %s4968_s8 = scalar_lea.vmem %s872_s12, 2048  ;;  %p4976_p4 = scmp.lt.s32.totalorder %s872_s12, %s872_s12 }
  0xe2   : > { %p4969_p1 = scmp.ne.s32.totalorder %s872_s12, %s4968_s8  ;;  %p4977_p7 = scmp.lt.s32.totalorder %s4968_s8, %s4968_s8 }
  0xe4   : > { %p4971_p2 = pnand %p4969_p1, %p5707_p0  ;;  %p4978_p8 = por %p4977_p7, %p4976_p4 }
  0xe6   : > { %p4972_p3 = pneg %p4971_p2 }
  0xe8   : > { %p4979_p11 = pnand %p4978_p8, %p4972_p3 }
  0xea   : > { %4982 = shalt.err (!%p4979_p11)
}
  0xeb   : > { %s6854_s7 = smov 128   ;;  %s6860_s10 = smov 8  }
  0xec   : > { %4584 = dma.hbm_to_vmem [thread:$0]  (!%p5695_p12), %s6815_s20, 2048, %s872_s12, [#allocation25], %s6854_s7, %s6854_s7, %s6860_s10  }
  0xed   : > { %s4983_s18 = scalar_lea.hbm %s6817_s22, 64 }
  0xee   : > { %p4984_p5 = scmp.ne.s32.totalorder %s6817_s22, %s4983_s18  ;;  %p4990_p10 = scmp.lt.u32.totalorder %s4983_s18, %s6817_s22 }
  0xf0   : > { %p4986_p6 = pnand %p4984_p5, %p5707_p0 }
  0xf2   : > { %p4987_p9 = pneg %p4986_p6 }
  0xf4   : > { %p4992_p13 = pnand %p4990_p10, %p4987_p9 }
  0xf6   : > { %4995 = shalt.err (!%p4992_p13)
}
  0xf7   : > { %s4996_s12 = scalar_lea.vmem %s5825_s2, 64  ;;  %p5004_p4 = scmp.lt.s32.totalorder %s5825_s2, %s5825_s2 }
  0xf8   : > { %p4997_p1 = scmp.ne.s32.totalorder %s5825_s2, %s4996_s12  ;;  %p5005_p7 = scmp.lt.s32.totalorder %s4996_s12, %s4996_s12 }
  0xfa   : > { %p4999_p2 = pnand %p4997_p1, %p5707_p0  ;;  %p5006_p8 = por %p5005_p7, %p5004_p4 }
  0xfc   : > { %p5000_p3 = pneg %p4999_p2 }
  0xfe   : > { %p5007_p11 = pnand %p5006_p8, %p5000_p3 }
 0x100   : > { %5010 = shalt.err (!%p5007_p11)
}
 0x101   : > { %4590 = dma.hbm_to_vmem [thread:$0]  (!%p5695_p12), %s6817_s22, 64, %s5825_s2, [#allocation28], %s6856_s5, %s6856_s5, %s6858_s3  }
 0x102   : > { %s5469_s9 = smov [#allocation30]   ;;  %s5470_s18 = smov [#allocation3]  }
 0x103   : > { %s927_s4 = sshll.u32 %s5469_s9, 4  ;;  %s693_s29 = sshll.u32 %s5470_s18, 4  ;;  %s928_s4 = int_to_ptr.vmem [resolvable:$true] %s927_s4  ;;  %s5874_s29 = int_to_ptr.vmem [resolvable:$true] %s693_s29 }
 0x104   : > { %s5011_s8 = scalar_lea.hbm %s6820_s25, 16 }
 0x105   : > { %p5012_p5 = scmp.ne.s32.totalorder %s6820_s25, %s5011_s8  ;;  %p5018_p10 = scmp.lt.u32.totalorder %s5011_s8, %s6820_s25 }
 0x107   : > { %p5014_p6 = pnand %p5012_p5, %p5707_p0 }
 0x109   : > { %p5015_p9 = pneg %p5014_p6 }
 0x10b   : > { %p5020_p13 = pnand %p5018_p10, %p5015_p9 }
 0x10d   : > { %5023 = shalt.err (!%p5020_p13)
}
 0x10e   : > { %s5024_s0 = scalar_lea.vmem %s928_s4, 16  ;;  %s5031_s9 = scalar_lea.vmem %s928_s4, 32 }
 0x10f   : > { %p5025_p1 = scmp.ne.s32.totalorder %s928_s4, %s5024_s0  ;;  %p5032_p4 = scmp.lt.s32.totalorder %s928_s4, %s928_s4 }
 0x110   : > { %p5033_p7 = scmp.lt.s32.totalorder %s5031_s9, %s5024_s0 }
 0x111   : > { %p5027_p2 = pnand %p5025_p1, %p5707_p0 }
 0x112   : > { %p5034_p8 = por %p5033_p7, %p5032_p4 }
 0x113   : > { %p5028_p3 = pneg %p5027_p2 }
 0x115   : > { %p5035_p11 = pnand %p5034_p8, %p5028_p3 }
 0x117   : > { %5038 = shalt.err (!%p5035_p11)
}
 0x118   : > { %4596 = dma.hbm_to_vmem [thread:$0]  (!%p5695_p12), %s6820_s25, 16, %s928_s4, [#allocation31]  }
 0x119   : > { %s6915_s8 = sld [smem:[#allocation60_spill]] }
 0x11f   : > { %s6916_s12 = smov %s6915_s8  ;;  %s5039_s30 = scalar_lea.hbm %s6915_s8, 512 }
 0x120   : > { %p5040_p5 = scmp.ne.s32.totalorder %s6916_s12, %s5039_s30  ;;  %p5046_p10 = scmp.lt.u32.totalorder %s5039_s30, %s6916_s12 }
 0x122   : > { %p5042_p6 = pnand %p5040_p5, %p5707_p0 }
 0x124   : > { %p5043_p9 = pneg %p5042_p6 }
 0x126   : > { %p5048_p13 = pnand %p5046_p10, %p5043_p9 }
 0x128   : > { %5051 = shalt.err (!%p5048_p13)
}
 0x129   : > { %s5052_s4 = scalar_lea.vmem %s5874_s29, 512  ;;  %p5060_p4 = scmp.lt.s32.totalorder %s5874_s29, %s5874_s29 }
 0x12a   : > { %p5053_p1 = scmp.ne.s32.totalorder %s5874_s29, %s5052_s4  ;;  %p5061_p7 = scmp.lt.s32.totalorder %s5052_s4, %s5052_s4 }
 0x12c   : > { %p5055_p2 = pnand %p5053_p1, %p5707_p0  ;;  %p5062_p8 = por %p5061_p7, %p5060_p4 }
 0x12e   : > { %p5056_p3 = pneg %p5055_p2 }
 0x130   : > { %p5063_p11 = pnand %p5062_p8, %p5056_p3 }
 0x132   : > { %5066 = shalt.err (!%p5063_p11)
}
 0x133   : > { %s6917_s5 = smov 128   ;;  %s5471_s11 = smov [#allocation8]  }
 0x134   : > { %4545 = dma.hbm_to_vmem [thread:$0]  (!%p5695_p12), %s6916_s12, 512, %s5874_s29, [#allocation4], %s6917_s5, %s6917_s5, %s6860_s10  }
 0x135   : > { %s728_s27 = sshll.u32 %s5471_s11, 4  ;;  %s5472_s8 = smov [#allocation11]   ;;  %s729_s27 = int_to_ptr.vmem [resolvable:$true] %s728_s27 }
 0x136   : > { %s754_s30 = sshll.u32 %s5472_s8, 4  ;;  %s6918_s9 = sld [smem:[#allocation65_spill]]  ;;  %s5920_s30 = int_to_ptr.vmem [resolvable:$true] %s754_s30 }
 0x13c   : > { %s6919_s4 = smov %s6918_s9  ;;  %s5067_s3 = scalar_lea.hbm %s6918_s9, 32 }
 0x13d   : > { %p5068_p5 = scmp.ne.s32.totalorder %s6919_s4, %s5067_s3  ;;  %p5074_p10 = scmp.lt.u32.totalorder %s5067_s3, %s6919_s4 }
 0x13f   : > { %p5070_p6 = pnand %p5068_p5, %p5707_p0 }
 0x141   : > { %p5071_p9 = pneg %p5070_p6 }
 0x143   : > { %p5076_p13 = pnand %p5074_p10, %p5071_p9 }
 0x145   : > { %5079 = shalt.err (!%p5076_p13)
}
 0x146   : > { %s5080_s18 = scalar_lea.vmem %s729_s27, 32  ;;  %p5088_p4 = scmp.lt.s32.totalorder %s729_s27, %s729_s27 }
 0x147   : > { %p5081_p1 = scmp.ne.s32.totalorder %s729_s27, %s5080_s18  ;;  %p5089_p7 = scmp.lt.s32.totalorder %s5080_s18, %s5080_s18 }
 0x149   : > { %p5083_p2 = pnand %p5081_p1, %p5707_p0  ;;  %p5090_p8 = por %p5089_p7, %p5088_p4 }
 0x14b   : > { %p5084_p3 = pneg %p5083_p2 }
 0x14d   : > { %p5091_p11 = pnand %p5090_p8, %p5084_p3 }
 0x14f   : > { %5094 = shalt.err (!%p5091_p11)
}
 0x150   : > { %s6920_s13 = smov 1   ;;  %s6921_s15 = smov 16  }
 0x151   : > { %4551 = dma.hbm_to_vmem [thread:$0]  (!%p5695_p12), %s6919_s4, 32, %s729_s27, [#allocation7], %s6921_s15, %s6921_s15, %s6920_s13  }
 0x152   : > { %s6922_s0 = sld [smem:[#allocation67_spill]] }
 0x158   : > { %s5095_s9 = scalar_lea.hbm %s6922_s0, 32 }
 0x159   : > { %p5096_p5 = scmp.ne.s32.totalorder %s6922_s0, %s5095_s9  ;;  %p5102_p10 = scmp.lt.u32.totalorder %s5095_s9, %s6922_s0 }
 0x15b   : > { %p5098_p6 = pnand %p5096_p5, %p5707_p0 }
 0x15d   : > { %p5099_p9 = pneg %p5098_p6 }
 0x15f   : > { %p5104_p13 = pnand %p5102_p10, %p5099_p9 }
 0x161   : > { %5107 = shalt.err (!%p5104_p13)
}
 0x162   : > { %s5108_s27 = scalar_lea.vmem %s5920_s30, 32  ;;  %p5116_p4 = scmp.lt.s32.totalorder %s5920_s30, %s5920_s30 }
 0x163   : > { %p5109_p1 = scmp.ne.s32.totalorder %s5920_s30, %s5108_s27  ;;  %p5117_p7 = scmp.lt.s32.totalorder %s5108_s27, %s5108_s27 }
 0x165   : > { %p5111_p2 = pnand %p5109_p1, %p5707_p0  ;;  %p5118_p8 = por %p5117_p7, %p5116_p4 }
 0x167   : > { %p5112_p3 = pneg %p5111_p2 }
 0x169   : > { %p5119_p11 = pnand %p5118_p8, %p5112_p3 }
 0x16b   : > { %5122 = shalt.err (!%p5119_p11)
}
 0x16c   : > { %4557 = dma.hbm_to_vmem [thread:$0]  (!%p5695_p12), %s6922_s0, 32, %s5920_s30, [#allocation10], %s6921_s15, %s6921_s15, %s6920_s13  }
 0x16d   : > { %s5473_s3 = smov [#allocation14]   ;;  %s5474_s2 = smov [#allocation17]  }
 0x16e   : > { %s783_s8 = sshll.u32 %s5473_s3, 4  ;;  %s809_s9 = sshll.u32 %s5474_s2, 4  ;;  %s784_s8 = int_to_ptr.vmem [resolvable:$true] %s783_s8  ;;  %s5969_s9 = int_to_ptr.vmem [resolvable:$true] %s809_s9 }
 0x16f   : > { %s6923_s18 = sld [smem:[#allocation70_spill]] }
 0x175   : > { %s5123_s27 = scalar_lea.hbm %s6923_s18, 1024 }
 0x176   : > { %p5124_p5 = scmp.ne.s32.totalorder %s6923_s18, %s5123_s27  ;;  %p5130_p10 = scmp.lt.u32.totalorder %s5123_s27, %s6923_s18 }
 0x178   : > { %p5126_p6 = pnand %p5124_p5, %p5707_p0 }
 0x17a   : > { %p5127_p9 = pneg %p5126_p6 }
 0x17c   : > { %p5132_p13 = pnand %p5130_p10, %p5127_p9 }
 0x17e   : > { %5135 = shalt.err (!%p5132_p13)
}
 0x17f   : > { %s5136_s11 = scalar_lea.vmem %s784_s8, 1024  ;;  %p5144_p4 = scmp.lt.s32.totalorder %s784_s8, %s784_s8 }
 0x180   : > { %p5137_p1 = scmp.ne.s32.totalorder %s784_s8, %s5136_s11  ;;  %p5145_p7 = scmp.lt.s32.totalorder %s5136_s11, %s5136_s11 }
 0x182   : > { %p5139_p2 = pnand %p5137_p1, %p5707_p0  ;;  %p5146_p8 = por %p5145_p7, %p5144_p4 }
 0x184   : > { %p5140_p3 = pneg %p5139_p2 }
 0x186   : > { %p5147_p11 = pnand %p5146_p8, %p5140_p3 }
 0x188   : > { %5150 = shalt.err (!%p5147_p11)
}
 0x189   : > { %s6924_s12 = smov 8   ;;  %s5151_s29 = scalar_lea.hbm %s6809_s14, 32 }
 0x18a   : > { %4563 = dma.hbm_to_vmem [thread:$0]  (!%p5695_p12), %s6923_s18, 1024, %s784_s8, [#allocation13], %s6917_s5, %s6917_s5, %s6924_s12  }
 0x18b   : > { %p5152_p5 = scmp.ne.s32.totalorder %s6809_s14, %s5151_s29  ;;  %p5158_p10 = scmp.lt.u32.totalorder %s5151_s29, %s6809_s14 }
 0x18d   : > { %p5154_p6 = pnand %p5152_p5, %p5707_p0 }
 0x18f   : > { %p5155_p9 = pneg %p5154_p6 }
 0x191   : > { %p5160_p13 = pnand %p5158_p10, %p5155_p9 }
 0x193   : > { %5163 = shalt.err (!%p5160_p13)
}
 0x194   : > { %s5164_s5 = scalar_lea.vmem %s5969_s9, 32  ;;  %p5172_p4 = scmp.lt.s32.totalorder %s5969_s9, %s5969_s9 }
 0x195   : > { %p5165_p1 = scmp.ne.s32.totalorder %s5969_s9, %s5164_s5  ;;  %p5173_p7 = scmp.lt.s32.totalorder %s5164_s5, %s5164_s5 }
 0x197   : > { %p5167_p2 = pnand %p5165_p1, %p5707_p0  ;;  %p5174_p8 = por %p5173_p7, %p5172_p4 }
 0x199   : > { %p5168_p3 = pneg %p5167_p2 }
 0x19b   : > { %p5175_p11 = pnand %p5174_p8, %p5168_p3 }
 0x19d   : > { %5178 = shalt.err (!%p5175_p11)
}
 0x19e   : > { %4569 = dma.hbm_to_vmem [thread:$0]  (!%p5695_p12), %s6809_s14, 32, %s5969_s9, [#allocation16], %s6921_s15, %s6921_s15, %s6920_s13  }
 0x19f   : > { %s5475_s4 = smov [#allocation20]   ;;  %s5476_s2 = smov [#allocation23]  }
 0x1a0   : > { %s836_s3 = sshll.u32 %s5475_s4, 4  ;;  %s861_s7 = sshll.u32 %s5476_s2, 4  ;;  %s837_s3 = int_to_ptr.vmem [resolvable:$true] %s836_s3  ;;  %s6018_s7 = int_to_ptr.vmem [resolvable:$true] %s861_s7 }
 0x1a1   : > { %s5179_s10 = scalar_lea.hbm %s6811_s16, 16 }
 0x1a2   : > { %p5180_p5 = scmp.ne.s32.totalorder %s6811_s16, %s5179_s10  ;;  %p5186_p10 = scmp.lt.u32.totalorder %s5179_s10, %s6811_s16 }
 0x1a4   : > { %p5182_p6 = pnand %p5180_p5, %p5707_p0 }
 0x1a6   : > { %p5183_p9 = pneg %p5182_p6 }
 0x1a8   : > { %p5188_p13 = pnand %p5186_p10, %p5183_p9 }
 0x1aa   : > { %5191 = shalt.err (!%p5188_p13)
}
 0x1ab   : > { %s5192_s8 = scalar_lea.vmem %s837_s3, 16  ;;  %s5199_s12 = scalar_lea.vmem %s837_s3, 32 }
 0x1ac   : > { %p5193_p1 = scmp.ne.s32.totalorder %s837_s3, %s5192_s8  ;;  %p5200_p4 = scmp.lt.s32.totalorder %s837_s3, %s837_s3 }
 0x1ad   : > { %p5201_p7 = scmp.lt.s32.totalorder %s5199_s12, %s5192_s8 }
 0x1ae   : > { %p5195_p2 = pnand %p5193_p1, %p5707_p0 }
 0x1af   : > { %p5202_p8 = por %p5201_p7, %p5200_p4 }
 0x1b0   : > { %p5196_p3 = pneg %p5195_p2 }
 0x1b2   : > { %p5203_p11 = pnand %p5202_p8, %p5196_p3 }
 0x1b4   : > { %5206 = shalt.err (!%p5203_p11)
}
 0x1b5   : > { %4575 = dma.hbm_to_vmem [thread:$0]  (!%p5695_p12), %s6811_s16, 16, %s837_s3, [#allocation19]  }
 0x1b6   : > { %s5207_s10 = scalar_lea.hbm %s6814_s19, 16 }
 0x1b7   : > { %p5208_p5 = scmp.ne.s32.totalorder %s6814_s19, %s5207_s10  ;;  %p5214_p10 = scmp.lt.u32.totalorder %s5207_s10, %s6814_s19 }
 0x1b9   : > { %p5210_p6 = pnand %p5208_p5, %p5707_p0 }
 0x1bb   : > { %p5211_p9 = pneg %p5210_p6 }
 0x1bd   : > { %p5216_p13 = pnand %p5214_p10, %p5211_p9 }
 0x1bf   : > { %5219 = shalt.err (!%p5216_p13)
}
 0x1c0   : > { %s5220_s3 = scalar_lea.vmem %s6018_s7, 16  ;;  %s5227_s8 = scalar_lea.vmem %s6018_s7, 32 }
 0x1c1   : > { %p5221_p1 = scmp.ne.s32.totalorder %s6018_s7, %s5220_s3  ;;  %p5228_p4 = scmp.lt.s32.totalorder %s6018_s7, %s6018_s7 }
 0x1c2   : > { %p5229_p7 = scmp.lt.s32.totalorder %s5227_s8, %s5220_s3 }
 0x1c3   : > { %p5223_p2 = pnand %p5221_p1, %p5707_p0 }
 0x1c4   : > { %p5230_p8 = por %p5229_p7, %p5228_p4 }
 0x1c5   : > { %p5224_p3 = pneg %p5223_p2 }
 0x1c7   : > { %p5231_p11 = pnand %p5230_p8, %p5224_p3 }
 0x1c9   : > { %5234 = shalt.err (!%p5231_p11)
}
 0x1ca   : > { %4581 = dma.hbm_to_vmem [thread:$0]  (!%p5695_p12), %s6814_s19, 16, %s6018_s7, [#allocation22]  }
 0x1cb   : > { %s5477_s2 = smov [#allocation26]   ;;  %s5478_s27 = smov [#allocation29]  }
 0x1cc   : > { %s884_s29 = sshll.u32 %s5477_s2, 4  ;;  %s910_s10 = sshll.u32 %s5478_s27, 4  ;;  %s885_s29 = int_to_ptr.vmem [resolvable:$true] %s884_s29  ;;  %s6062_s10 = int_to_ptr.vmem [resolvable:$true] %s910_s10 }
 0x1cd   : > { %s5235_s5 = scalar_lea.hbm %s6816_s21, 64 }
 0x1ce   : > { %p5236_p5 = scmp.ne.s32.totalorder %s6816_s21, %s5235_s5  ;;  %p5242_p10 = scmp.lt.u32.totalorder %s5235_s5, %s6816_s21 }
 0x1d0   : > { %p5238_p6 = pnand %p5236_p5, %p5707_p0 }
 0x1d2   : > { %p5239_p9 = pneg %p5238_p6 }
 0x1d4   : > { %p5244_p13 = pnand %p5242_p10, %p5239_p9 }
 0x1d6   : > { %5247 = shalt.err (!%p5244_p13)
}
 0x1d7   : > { %s5248_s12 = scalar_lea.vmem %s885_s29, 64  ;;  %p5256_p4 = scmp.lt.s32.totalorder %s885_s29, %s885_s29 }
 0x1d8   : > { %p5249_p1 = scmp.ne.s32.totalorder %s885_s29, %s5248_s12  ;;  %p5257_p7 = scmp.lt.s32.totalorder %s5248_s12, %s5248_s12 }
 0x1da   : > { %p5251_p2 = pnand %p5249_p1, %p5707_p0  ;;  %p5258_p8 = por %p5257_p7, %p5256_p4 }
 0x1dc   : > { %p5252_p3 = pneg %p5251_p2 }
 0x1de   : > { %p5259_p11 = pnand %p5258_p8, %p5252_p3 }
 0x1e0   : > { %5262 = shalt.err (!%p5259_p11)
}
 0x1e1   : > { %4587 = dma.hbm_to_vmem [thread:$0]  (!%p5695_p12), %s6816_s21, 64, %s885_s29, [#allocation25], %s6921_s15, %s6921_s15, %s6920_s13  }
 0x1e2   : > { %s5263_s11 = scalar_lea.hbm %s6818_s23, 64 }
 0x1e3   : > { %p5264_p5 = scmp.ne.s32.totalorder %s6818_s23, %s5263_s11  ;;  %p5270_p10 = scmp.lt.u32.totalorder %s5263_s11, %s6818_s23 }
 0x1e5   : > { %p5266_p6 = pnand %p5264_p5, %p5707_p0 }
 0x1e7   : > { %p5267_p9 = pneg %p5266_p6 }
 0x1e9   : > { %p5272_p13 = pnand %p5270_p10, %p5267_p9 }
 0x1eb   : > { %5275 = shalt.err (!%p5272_p13)
}
 0x1ec   : > { %s5276_s29 = scalar_lea.vmem %s6062_s10, 64  ;;  %p5284_p4 = scmp.lt.s32.totalorder %s6062_s10, %s6062_s10 }
 0x1ed   : > { %p5277_p1 = scmp.ne.s32.totalorder %s6062_s10, %s5276_s29  ;;  %p5285_p7 = scmp.lt.s32.totalorder %s5276_s29, %s5276_s29 }
 0x1ef   : > { %p5279_p2 = pnand %p5277_p1, %p5707_p0  ;;  %p5286_p8 = por %p5285_p7, %p5284_p4 }
 0x1f1   : > { %p5280_p3 = pneg %p5279_p2 }
 0x1f3   : > { %p5287_p11 = pnand %p5286_p8, %p5280_p3 }
 0x1f5   : > { %5290 = shalt.err (!%p5287_p11)
}
 0x1f6   : > { %4593 = dma.hbm_to_vmem [thread:$0]  (!%p5695_p12), %s6818_s23, 64, %s6062_s10, [#allocation28], %s6921_s15, %s6921_s15, %s6920_s13  }
 0x1f7   : > { %s5479_s4 = smov [#allocation32]   ;;  %s5480_s27 = smov [#allocation33]  }
 0x1f8   : > { %s938_s2 = sshll.u32 %s5479_s4, 4  ;;  %s949_s30 = sshll.u32 %s5480_s27, 4  ;;  %s939_s2 = int_to_ptr.vmem [resolvable:$true] %s938_s2  ;;  %s6111_s30 = int_to_ptr.vmem [resolvable:$true] %s949_s30 }
 0x1f9   : > { %s5291_s9 = scalar_lea.hbm %s6821_s26, 16 }
 0x1fa   : > { %p5292_p5 = scmp.ne.s32.totalorder %s6821_s26, %s5291_s9  ;;  %p5298_p10 = scmp.lt.u32.totalorder %s5291_s9, %s6821_s26 }
 0x1fc   : > { %p5294_p6 = pnand %p5292_p5, %p5707_p0 }
 0x1fe   : > { %p5295_p9 = pneg %p5294_p6 }
 0x200   : > { %p5300_p13 = pnand %p5298_p10, %p5295_p9 }
 0x202   : > { %5303 = shalt.err (!%p5300_p13)
}
 0x203   : > { %s5304_s15 = scalar_lea.vmem %s939_s2, 16  ;;  %s5311_s10 = scalar_lea.vmem %s939_s2, 32 }
 0x204   : > { %p5305_p1 = scmp.ne.s32.totalorder %s939_s2, %s5304_s15  ;;  %p5312_p4 = scmp.lt.s32.totalorder %s939_s2, %s939_s2 }
 0x205   : > { %p5313_p7 = scmp.lt.s32.totalorder %s5311_s10, %s5304_s15 }
 0x206   : > { %p5307_p2 = pnand %p5305_p1, %p5707_p0 }
 0x207   : > { %p5314_p8 = por %p5313_p7, %p5312_p4 }
 0x208   : > { %p5308_p3 = pneg %p5307_p2 }
 0x20a   : > { %p5315_p11 = pnand %p5314_p8, %p5308_p3 }
 0x20c   : > { %5318 = shalt.err (!%p5315_p11)
}
 0x20d   : > { %4599 = dma.hbm_to_vmem [thread:$0]  (!%p5695_p12), %s6821_s26, 16, %s939_s2, [#allocation31]  }
 0x20e   : > { %s6925_s11 = sld [smem:[#allocation75_spill]] }
 0x214   : > { %s5319_s5 = scalar_lea.hbm %s6925_s11, 16 }
 0x215   : > { %p5320_p5 = scmp.ne.s32.totalorder %s6925_s11, %s5319_s5  ;;  %p5326_p10 = scmp.lt.u32.totalorder %s5319_s5, %s6925_s11 }
 0x217   : > { %p5322_p6 = pnand %p5320_p5, %p5707_p0 }
 0x219   : > { %p5323_p9 = pneg %p5322_p6 }
 0x21b   : > { %p5328_p13 = pnand %p5326_p10, %p5323_p9 }
 0x21d   : > { %5331 = shalt.err (!%p5328_p13)
}
 0x21e   : > { %s5332_s2 = scalar_lea.vmem %s6111_s30, 16  ;;  %s5339_s13 = scalar_lea.vmem %s6111_s30, 32 }
 0x21f   : > { %p5333_p1 = scmp.ne.s32.totalorder %s6111_s30, %s5332_s2  ;;  %p5340_p4 = scmp.lt.s32.totalorder %s6111_s30, %s6111_s30 }
 0x220   : > { %p5341_p7 = scmp.lt.s32.totalorder %s5339_s13, %s5332_s2 }
 0x221   : > { %p5335_p2 = pnand %p5333_p1, %p5707_p0 }
 0x222   : > { %p5342_p8 = por %p5341_p7, %p5340_p4 }
 0x223   : > { %p5336_p3 = pneg %p5335_p2 }
 0x225   : > { %p5343_p11 = pnand %p5342_p8, %p5336_p3 }
 0x227   : > { %5346 = shalt.err (!%p5343_p11)
}
 0x228   : > { %4602 = dma.hbm_to_vmem [thread:$0]  (!%p5695_p12), %s6925_s11, 16, %s6111_s30, [#allocation34]  }
 0x229   : > { %s6926_s7 = sld [smem:[#allocation57_spill]] }
 0x22f   : > { %p6927_p5 = scmp.ne.s32.totalorder %s6926_s7, 0 }
 0x230   : > { %s6928_s1 = sld [smem:[#allocation52_spill]] (!%p6927_p5) }
 0x231   : > { %975 = sbr.rel (%p6927_p5) target bundleno = 11143 (0x2b87), region = 132 }
 0x236   : > { %p6929_p0 = scmp.eq.s32.totalorder (!%p6927_p5), %s6928_s1, 0 }
 0x238   : > { %5392 = dma.done.wait (%p6929_p0), [#allocation4], 512   ;;  %p6930_p6 = pmov %p6929_p0 }
 0x239   : > { %p6931_p9 = pmov %p6929_p0 }
 0x23a   : > { %5394 = vsyncadd (%p6930_p6), [#allocation4], 4294966784 }
 0x23b   : > { %5396 = dma.done.wait (%p6931_p9), [#allocation7], 96   ;;  %p6932_p10 = pmov %p6929_p0 }
 0x23c   : > { %p6933_p13 = pmov %p6929_p0 }
 0x23d   : > { %5398 = vsyncadd (%p6932_p10), [#allocation7], 4294967200 }
 0x23e   : > { %5400 = dma.done.wait (%p6933_p13), [#allocation10], 64   ;;  %p6934_p12 = pmov %p6929_p0 }
 0x23f   : > { %p6935_p1 = pmov %p6929_p0 }
 0x240   : > { %5402 = vsyncadd (%p6934_p12), [#allocation10], 4294967232 }
 0x241   : > { %5404 = dma.done.wait (%p6935_p1), [#allocation13], 1056   ;;  %p6936_p2 = pmov %p6929_p0 }
 0x242   : > { %p6937_p3 = pmov %p6929_p0 }
 0x243   : > { %5406 = vsyncadd (%p6936_p2), [#allocation13], 4294966240 }
 0x244   : > { %5408 = dma.done.wait (%p6937_p3), [#allocation16], 64   ;;  %p6938_p4 = pmov %p6929_p0 }
 0x245   : > { %p6939_p7 = pmov %p6929_p0 }
 0x246   : > { %5410 = vsyncadd (%p6938_p4), [#allocation16], 4294967232 }
 0x247   : > { %5412 = dma.done.wait (%p6939_p7), [#allocation19], 48   ;;  %p6940_p8 = pmov %p6929_p0 }
 0x248   : > { %p6941_p11 = pmov %p6929_p0 }
 0x249   : > { %5414 = vsyncadd (%p6940_p8), [#allocation19], 4294967248 }
 0x24a   : > { %5416 = dma.done.wait (%p6941_p11), [#allocation22], 32   ;;  %p6942_p5 = pmov %p6929_p0 }
 0x24c   : > { %5418 = vsyncadd (%p6942_p5), [#allocation22], 4294967264 }
 0x24d   : > { %5420 = dma.done.wait (%p6929_p0), [#allocation25], 2112   ;;  %p6943_p6 = pmov %p6929_p0 }
 0x24e   : > { %p6944_p9 = pmov %p6929_p0 }
 0x24f   : > { %5422 = vsyncadd (%p6943_p6), [#allocation25], 4294965184 }
 0x250   : > { %5424 = dma.done.wait (%p6944_p9), [#allocation28], 128   ;;  %p6945_p10 = pmov %p6929_p0 }
 0x251   : > { %p6946_p13 = pmov %p6929_p0 }
 0x252   : > { %5426 = vsyncadd (%p6945_p10), [#allocation28], 4294967168 }
 0x253   : > { %5428 = dma.done.wait (%p6946_p13), [#allocation31], 32   ;;  %p6947_p12 = pmov %p6929_p0 }
 0x254   : > { %p6948_p1 = pmov %p6929_p0 }
 0x255   : > { %5430 = vsyncadd (%p6947_p12), [#allocation31], 4294967264 }
 0x256   : > { %5432 = dma.done.wait (%p6948_p1), [#allocation34], 16   ;;  %p6949_p2 = pmov %p6929_p0 }
 0x257   : > { %p1127_p3 = scmp.lt.s32.totalorder %s6928_s1, 1  ;;  %v5481_v0 = vmov 0.0   ;;  %vm5482_vm0 = vmmov 0   ;;  %s6950_s27 = sld [smem:[#allocation58_spill]]  ;;  %v1136_v1 = vld [vmem:[#allocation3] sm:$0xff]  ;;  %v1137_v2 = vld [vmem:[#allocation3 + $0x8] sm:$0xff]  ;;  %v1224_v41 = vlaneseq }
 0x258   : > { %5434 = vsyncadd (%p6949_p2), [#allocation34], 4294967280  ;;  %4192 = vmatprep.subr.bf16.mxu0 %v5481_v0  ;;  %4196 = vmatprep.mubr.msk.bf16.mxu0 %vm5482_vm0, %v5481_v0  ;;  %v1138_v3 = vld [vmem:[#allocation3 + $0x10] sm:$0xff]  ;;  %v1142_v4 = vpack.c.bf16 %v1137_v2, %v1136_v1  ;;  %v1139_v5 = vld [vmem:[#allocation3 + $0x18] sm:$0xff]  ;;  %s6951_s8 = sld [smem:[#allocation62_spill]]  ;;  %vm1150_vm1 = vcmask 261120  }
 0x259   : > { %s6206_s6 = scalar_select %p1127_p3, %s6928_s1, 1  ;;  %v1143_v11 = vpack.c.bf16 %v1139_v5, %v1138_v3  ;;  %v5483_v33 = vmov 0   ;;  %vm1234_vm2 = vcmask 523264   ;;  %v6277_v42 = vshrl.u32 %v1224_v41, 7  ;;  %v1213_v44 = vld [vmem:[#allocation6] sm:$0x3] }
 0x25a   : > { %4193 = vmatpush3.bf16.msra.mxu0 %v1142_v4  ;;  %1270 = vmatprep.mubr.bf16.mxu1 %v5483_v33  ;;  %s6953_s12 = sld [smem:[#allocation61_spill]]  ;;  %s6869_s4 = smov 112   ;;  %vm1296_vm3 = vcmask 130048   ;;  %vm1367_vm4 = vcmask 1043456   ;;  %vm1351_vm6 = vcmask 64512  }
 0x25b   : > { %s3993_s30 = sshll.u32 %s6206_s6, 3  ;;  %4194 = vmatprep.subr.bf16.mxu0 %v5481_v0  ;;  %v6280_v43 = vsub.s32 0, %v6277_v42  ;;  %v1230_v52 = vsub.s32 1, %v6277_v42  ;;  %s6866_s13 = smov 96  }
 0x25c   : > { %s6955_s7 = sld [smem:[#allocation64_spill]]  ;;  %s6864_s15 = smov 80  }
 0x25d   : > { %s1130_s5 = scalar_lea.vmem %s6950_s27, %s3993_s30  ;;  %v1227_v45 = vrot.slane %v1213_v44, %v6280_v43  ;;  %s5485_s27 = smov 64   ;;  %v1231_v53 = vrot.slane %v1213_v44, %v1230_v52 }
 0x25e   : > { %v1135_v6 = vld [vmem:[%s1130_s5] sm:$0xff]  ;;  %s6952_s29 = smov %s6951_s8  ;;  %v1198_v7 = vld [vmem:[%s6951_s8 + $0x8] sm:$0xff]  ;;  %4195 = vmatpush3.bf16.msra.mxu0 %v1143_v11  ;;  %s5486_s5 = smov 48  }
 0x25f   : > { %v1200_v8 = vld [vmem:[%s6952_s29 + $0x18] sm:$0xff]  ;;  %v1197_v9 = vld [vmem:[%s6952_s29] sm:$0xff]  ;;  %v1199_v10 = vld [vmem:[%s6952_s29 + $0x10] sm:$0xff]  ;;  %v1141_v21 = vpack.c.bf16 %v1135_v6, %v1135_v6  ;;  %4200 = vmatprep.subr.bf16.mxu0 %v5481_v0  ;;  %s6954_s8 = sld [smem:[#allocation59_spill]]  ;;  %s6863_s10 = smov 16  }
 0x260   : > { %v1216_v12 = vpack.c.bf16 %v1200_v8, %v1198_v7  ;;  %v1215_v13 = vpack.c.bf16 %v1199_v10, %v1197_v9  ;;  %v1202_v14 = vld [vmem:[%s6952_s29 + $0x28] sm:$0xff]  ;;  %v1204_v15 = vld [vmem:[%s6952_s29 + $0x38] sm:$0xff]  ;;  %v1201_v16 = vld [vmem:[%s6952_s29 + $0x20] sm:$0xff]  ;;  %s6958_s3 = smov 112   ;;  %s6961_s9 = smov 80  }
 0x261   : > { %v1218_v17 = vpack.c.bf16 %v1204_v15, %v1202_v14  ;;  %v1203_v18 = vld [vmem:[%s6952_s29 + $0x30] sm:$0xff]  ;;  %v1206_v19 = vld [vmem:[%s6952_s29 + $0x48] sm:$0xff]  ;;  %v1208_v20 = vld [vmem:[%s6952_s29 + $0x58] sm:$0xff]  ;;  %4197 = vmatmul.mubr.msk.bf16.vlgmr.msra.gmra.mrb[0].mxu0 %vm1150_vm1, %v1141_v21  ;;  %s6968_s30 = sld [smem:[#allocation76_spill]] }
 0x262   : > { %1238 = vmatprep.subr.bf16.mxu1 %v1216_v12  ;;  %v1217_v22 = vpack.c.bf16 %v1203_v18, %v1201_v16  ;;  %v1220_v23 = vpack.c.bf16 %v1208_v20, %v1206_v19  ;;  %v1205_v24 = vld [vmem:[%s6952_s29 + $0x40] sm:$0xff]  ;;  %v1207_v25 = vld [vmem:[%s6952_s29 + $0x50] sm:$0xff]  ;;  %4202 = vmatprep.mubr.msk.bf16.mxu0 %vm5482_vm0, %v5481_v0  ;;  %v1210_v27 = vld [vmem:[%s6952_s29 + $0x68] sm:$0xff] }
 0x263   : > { %1239 = vmatpush1.bf16.msra.mxu1 %v1215_v13  ;;  %v1219_v26 = vpack.c.bf16 %v1207_v25, %v1205_v24  ;;  %v1212_v28 = vld [vmem:[%s6952_s29 + $0x78] sm:$0xff]  ;;  %v1209_v30 = vld [vmem:[%s6952_s29 + $0x60] sm:$0xff]  ;;  %v1211_v31 = vld [vmem:[%s6952_s29 + $0x70] sm:$0xff] }
 0x264   : > { %1240 = vmatprep.subr.bf16.mxu1 %v1218_v17  ;;  %v1222_v29 = vpack.c.bf16 %v1212_v28, %v1210_v27  ;;  %v1221_v32 = vpack.c.bf16 %v1211_v31, %v1209_v30  ;;  %v3994_v34 = vld [vmem:[%s6953_s12] ss:$0 sm:$0xff]  ;;  %v1281_v41 = vld [vmem:[%s6955_s7 + $0x10] sm:$0xff]  ;;  %v1282_v44 = vld [vmem:[%s6955_s7 + $0x18] sm:$0xff]  ;;  %s6965_s12 = sld [smem:[#allocation74_spill]] }
 0x265   : > { %s1133_s2 = scalar_lea.vmem %s6954_s8, %s6206_s6  ;;  %s6868_s6 = smov 32  }
 0x266   : > { %v1194_v62 = vld [vmem:[%s1133_s2] sm:$0x1]  ;;  %s6956_s8 = sld [smem:[#allocation68_spill]] }
 0x267   : > { %1241 = vmatpush1.bf16.msra.mxu1 %v1217_v22  ;;  %vm1195_vm5 = vcmp.ne.s32.totalorder %v1194_v62, 0  ;;  %s6969_s0 = smov %s6968_s30 }
 0x268   : > { %1242 = vmatprep.subr.bf16.mxu1 %v1220_v23  ;;  %v1196_v63 = vsel %vm1195_vm5, -1e+30, %v5481_v0 }
 0x269   : > { %v6316_v1 = vrot.slane %v1196_v63, %v6280_v43 }
 0x26b   : > { %1243 = vmatpush1.bf16.msra.mxu1 %v1219_v26 }
 0x26c   : > { %1244 = vmatprep.subr.bf16.mxu1 %v1222_v29  ;;  %s6957_s2 = smov %s6956_s8 }
 0x26f   : > { %1245 = vmatpush1.bf16.msra.mxu1 %v1221_v32 }
 0x270   : > { %4212 = vmatprep.subr.bf16.mxu1 %v5481_v0 }
 0x334   : > { %v1188_v35 = vpop.f32.mrb[0].mxu0 }
 0x335   : > { %v6270_v36 = vadd.f32 %v3994_v34, %v1188_v35  ;;  %v4198_v37 = vpop.f32.mrb[1].mxu0 }
 0x336   : > { %v1191_v38 = vpop.f32.mrb[2].mxu0 }
 0x337   : > { %v1214_v39 = vpack.c.bf16 %v6270_v36, %v6270_v36  ;;  %v4199_v40 = vpop.f32.mrb[3].mxu0 }
 0x339   : > { %3996 = vmatmul.mubr.msk.bf16.vlgmr.msra.gmra.mrb[0].mxu1 %vm1234_vm2, %v1214_v39 }
 0x33a   : > { %4214 = vmatprep.mubr.msk.bf16.mxu1 %vm5482_vm0, %v5481_v0 }
 0x40c   : > { %v1272_v46 = vpop.f32.mrb[0].mxu1 }
 0x40d   : > { %v1273_v47 = vadd.f32 %v1272_v46, %v1227_v45  ;;  %v1274_v48 = vpop.f32.mrb[1].mxu1  ;;  %v1288_v45 = vpack.c.bf16 %v1282_v44, %v1281_v41 }
 0x40e   : > { %v1276_v49 = vpop.f32.mrb[2].mxu1  ;;  %v1275_v55 = vadd.f32 %v1274_v48, %v1231_v53  ;;  %v1280_v53 = vld [vmem:[%s6955_s7 + $0x8] sm:$0xff] }
 0x40f   : > { %v6283_v50 = vpack.c.bf16 %v1273_v47, %v1273_v47  ;;  %v1277_v51 = vpop.f32.mrb[3].mxu1 }
 0x410   : > { %v6296_v58 = vpack.c.bf16 %v1275_v55, %v1275_v55  ;;  %v1279_v51 = vld [vmem:[%s6955_s7] sm:$0xff] }
 0x411   : > { %1412 = vrot.lane.b32.xlu1 %v6283_v50, %s6869_s4  ;;  %1294 = vrot.lane.b32.xlu0 %v6283_v50, %s5485_s27  ;;  %v1287_v55 = vpack.c.bf16 %v1280_v53, %v1279_v51 }
 0x412   : > { %v1369_v60 = vsel %vm1367_vm4, %v6296_v58, 0 }
 0x415   : > { %1414 = vrot.lane.b32.xlu0 %v6283_v50, %s5486_s5 }
 0x483   : > { %v1295_v54 = vpop.permute.xlu0 %1294  ;;  %v1413_v61 = vpop.permute.xlu1 %1412 }
 0x484   : > { %v1301_v56 = vsel %vm1296_vm3, %v1295_v54, 0 }
 0x485   : > { %4201 = vmatpush3.bf16.xpose.msra.mxu0 %v1301_v56 }
 0x486   : > { %4206 = vmatprep.subr.bf16.mxu0 %v5481_v0 }
 0x487   : > { %v1415_v57 = vpop.permute.xlu0 %1414 }
 0x488   : > { %v1420_v59 = vsel %vm1296_vm3, %v1415_v57, 0 }
 0x489   : > { %4213 = vmatpush3.bf16.xpose.msra.mxu1 %v1420_v59 }
 0x48a   : > { %4224 = vmatprep.subr.bf16.mxu1 %v5481_v0 }
 0x48c   : > { %4203 = vmatmul.mubr.msk.bf16.vlgmr.msra.gmra.mrb[4].mxu0 %vm1296_vm3, %v6283_v50 }
 0x48d   : > { %4207 = vmatpush3.bf16.msra.mxu0 %v1369_v60  ;;  %4208 = vmatprep.mubr.msk.bf16.mxu0 %vm5482_vm0, %v5481_v0 }
 0x48e   : > { %4218 = vmatprep.subr.bf16.mxu0 %v5481_v0 }
 0x490   : > { %4215 = vmatmul.mubr.msk.bf16.vlgmr.msra.gmra.mrb[4].mxu1 %vm1296_vm3, %v1413_v61 }
 0x491   : > { %4226 = vmatprep.mubr.msk.bf16.mxu1 %vm5482_vm0, %v5481_v0  ;;  %4225 = vmatpush3.bf16.msra.mxu1 %v1288_v45 }
 0x492   : > { %4230 = vmatprep.subr.bf16.mxu1 %v5481_v0 }
 0x55f   : > { %v1337_v2 = vpop.f32.mrb[4].mxu0 }
 0x560   : > { %v1343_v3 = vmul.f32 0.25, %v1337_v2  ;;  %v4204_v4 = vpop.f32.mrb[5].mxu0 }
 0x561   : > { %v1340_v5 = vpop.f32.mrb[6].mxu0 }
 0x562   : > { %v4205_v6 = vpop.f32.mrb[7].mxu0  ;;  %v1350_v7 = vadd.f32 %v6316_v1, %v1343_v3 }
 0x563   : > { %v1456_v8 = vpop.f32.mrb[4].mxu1 }
 0x564   : > { %v1462_v9 = vmul.f32 0.25, %v1456_v8  ;;  %v4216_v10 = vpop.f32.mrb[5].mxu1  ;;  %v1352_v11 = vsel %vm1351_vm6, %v1350_v7, -inf }
 0x565   : > { %v1459_v12 = vpop.f32.mrb[6].mxu1  ;;  %1353 = vmax.xlane.f32.xlu1 %v1352_v11 }
 0x566   : > { %v4217_v13 = vpop.f32.mrb[7].mxu1  ;;  %v1463_v14 = vadd.f32 %v1462_v9, %v6316_v1 }
 0x568   : > { %v1464_v15 = vsel %vm1351_vm6, %v1463_v14, -inf }
 0x569   : > { %1465 = vmax.xlane.f32.xlu0 %v1464_v15 }
 0x5f2   : > { %v1354_v16 = vpop.xlane.xlu1 %1353 }
 0x5f3   : > { %v1355_v17 = vsub.f32 %v1350_v7, %v1354_v16 }
 0x5f5   : > { %v1356_v18 = vmul.f32 1.442695, %v1355_v17 }
 0x5f6   : > { %v1466_v19 = vpop.xlane.xlu0 %1465 }
 0x5f7   : > { %4717 = vpow2.f32 %v1356_v18  ;;  %v1467_v20 = vsub.f32 %v1463_v14, %v1466_v19 }
 0x5f9   : > { %v1468_v21 = vmul.f32 1.442695, %v1467_v20 }
 0x5fb   : > { %4719 = vpow2.f32 %v1468_v21  ;;  %v1284_v21 = vld [vmem:[%s6955_s7 + $0x28] sm:$0xff] }
 0x601   : > { %v4718_v22 = vpop.eup %4717 }
 0x602   : > { %v1358_v23 = vsel %vm1351_vm6, %v4718_v22, 0.0 }
 0x603   : > { %1359 = vadd.xlane.f32.xlu0 %v1358_v23 }
 0x605   : > { %v4720_v24 = vpop.eup %4719 }
 0x606   : > { %v1470_v25 = vsel %vm1351_vm6, %v4720_v24, 0.0 }
 0x607   : > { %1471 = vadd.xlane.f32.xlu1 %v1470_v25 }
 0x618   : > { %1614 = vrot.lane.b32.xlu1 %v6283_v50, %s6868_s6 }
 0x619   : > { %1477 = vrot.lane.b32.xlu0 %v6296_v58, %s6869_s4 }
 0x61c   : > { %1612 = vrot.lane.b32.xlu1 %v6283_v50, %s6866_s13 }
 0x690   : > { %v1360_v26 = vpop.xlane.xlu0 %1359 }
 0x691   : > { %4721 = vrcp.f32 %v1360_v26 }
 0x694   : > { %v1472_v27 = vpop.xlane.xlu1 %1471  ;;  %v1478_v30 = vpop.permute.xlu0 %1477 }
 0x695   : > { %4723 = vrcp.f32 %v1472_v27  ;;  %v1483_v34 = vsel %vm1367_vm4, %v1478_v30, 0 }
 0x698   : > { %v1615_v37 = vpop.permute.xlu1 %1614 }
 0x699   : > { %v1620_v39 = vsel %vm1296_vm3, %v1615_v37, 0 }
 0x69b   : > { %v4722_v28 = vpop.eup %4721 }
 0x69c   : > { %v1362_v29 = vmul.f32 %v4722_v28, %v4718_v22  ;;  %v1613_v40 = vpop.permute.xlu1 %1612 }
 0x69e   : > { %v1363_v31 = vpack.c.bf16 %v1362_v29, %v1362_v29 }
 0x69f   : > { %v4724_v32 = vpop.eup %4723 }
 0x6a0   : > { %4209 = vmatmul.mubr.msk.bf16.vlgmr.msra.gmra.mrb[8].mxu0 %vm1351_vm6, %v1363_v31  ;;  %v1474_v35 = vmul.f32 %v4724_v32, %v4720_v24 }
 0x6a1   : > { %4219 = vmatpush3.bf16.msra.mxu0 %v1483_v34  ;;  %4220 = vmatprep.mubr.msk.bf16.mxu0 %vm5482_vm0, %v5481_v0 }
 0x6a2   : > { %4236 = vmatprep.subr.bf16.mxu0 %v5481_v0  ;;  %v1475_v38 = vpack.c.bf16 %v1474_v35, %v1474_v35 }
 0x6a8   : > { %4221 = vmatmul.mubr.msk.bf16.vlgmr.msra.gmra.mrb[12].mxu0 %vm1351_vm6, %v1475_v38 }
 0x6a9   : > { %4238 = vmatprep.mubr.msk.bf16.mxu0 %vm5482_vm0, %v5481_v0 }
 0x6aa   : > { %4237 = vmatpush3.bf16.xpose.msra.mxu0 %v1620_v39 }
 0x6ab   : > { %4242 = vmatprep.subr.bf16.mxu0 %v5481_v0 }
 0x6b1   : > { %4239 = vmatmul.mubr.msk.bf16.vlgmr.msra.gmra.mrb[16].mxu0 %vm1296_vm3, %v1613_v40 }
 0x6b2   : > { %4244 = vmatprep.mubr.msk.bf16.mxu0 %vm5482_vm0, %v5481_v0 }
 0x773   : > { %v1405_v46 = vpop.f32.mrb[8].mxu0 }
 0x774   : > { %v4210_v47 = vpop.f32.mrb[9].mxu0  ;;  %v1411_v5 = vpack.c.bf16 %v1405_v46, %v1405_v46 }
 0x775   : > { %v1408_v48 = vpop.f32.mrb[10].mxu0  ;;  %v1285_v47 = vld [vmem:[%s6955_s7 + $0x30] sm:$0xff] }
 0x776   : > { %v4211_v49 = vpop.f32.mrb[11].mxu0  ;;  %v1286_v48 = vld [vmem:[%s6955_s7 + $0x38] sm:$0xff] }
 0x777   : > { %v1290_v53 = vpack.c.bf16 %v1286_v48, %v1285_v47 }
 0x77b   : > { %v1519_v54 = vpop.f32.mrb[12].mxu0 }
 0x77c   : > { %v1525_v56 = vpack.c.bf16 %v1519_v54, %v1519_v54  ;;  %v4222_v57 = vpop.f32.mrb[13].mxu0 }
 0x77d   : > { %v1522_v59 = vpop.f32.mrb[14].mxu0 }
 0x77e   : > { %v4223_v60 = vpop.f32.mrb[15].mxu0  ;;  %4227 = vmatmul.mubr.msk.bf16.vlgmr.msra.gmra.mrb[8].mxu1 %vm1296_vm3, %v1525_v56 }
 0x77f   : > { %4231 = vmatpush3.bf16.msra.mxu1 %v1287_v55  ;;  %4232 = vmatprep.mubr.msk.bf16.mxu1 %vm5482_vm0, %v5481_v0 }
 0x780   : > { %4248 = vmatprep.subr.bf16.mxu1 %v5481_v0 }
 0x784   : > { %v1656_v61 = vpop.f32.mrb[16].mxu0 }
 0x785   : > { %v1662_v62 = vmul.f32 0.25, %v1656_v61  ;;  %v4240_v63 = vpop.f32.mrb[17].mxu0 }
 0x786   : > { %v1659_v2 = vpop.f32.mrb[18].mxu0 }
 0x787   : > { %v4241_v3 = vpop.f32.mrb[19].mxu0  ;;  %v1663_v4 = vadd.f32 %v1662_v62, %v6316_v1  ;;  %v4009_v2 = vld [vmem:[#allocation8] ss:$0 sm:$0xff] }
 0x789   : > { %v1664_v6 = vsel %vm1351_vm6, %v1663_v4, -inf }
 0x78a   : > { %1665 = vmax.xlane.f32.xlu0 %v1664_v6  ;;  %4233 = vmatmul.mubr.msk.bf16.vlgmr.msra.gmra.mrb[8].mxu1 %vm1296_vm3, %v1411_v5 }
 0x78b   : > { %4250 = vmatprep.mubr.msk.bf16.mxu1 %vm5482_vm0, %v5481_v0 }
 0x7a0   : > { %1676 = vrot.lane.b32.xlu0 %v6296_v58, %s6866_s13  ;;  %s6967_s13 = sld [smem:[#allocation55_spill]] }
 0x7a4   : > { %1769 = vrot.lane.b32.xlu0 %v6283_v50, %s6864_s15 }
 0x7a6   : > { %p6970_p7 = scmp.ne.s32.totalorder %s6967_s13, 0 }
 0x817   : > { %v1666_v7 = vpop.xlane.xlu0 %1665 }
 0x818   : > { %v1667_v8 = vsub.f32 %v1663_v4, %v1666_v7 }
 0x81a   : > { %v1668_v9 = vmul.f32 1.442695, %v1667_v8 }
 0x81b   : > { %v1677_v10 = vpop.permute.xlu0 %1676 }
 0x81c   : > { %4725 = vpow2.f32 %v1668_v9  ;;  %v1682_v11 = vsel %vm1367_vm4, %v1677_v10, 0 }
 0x81d   : > { %4243 = vmatpush3.bf16.msra.mxu0 %v1682_v11 }
 0x81e   : > { %4254 = vmatprep.subr.bf16.mxu0 %v5481_v0 }
 0x81f   : > { %v1770_v20 = vpop.permute.xlu0 %1769 }
 0x826   : > { %v4726_v12 = vpop.eup %4725 }
 0x827   : > { %v1670_v13 = vsel %vm1351_vm6, %v4726_v12, 0.0 }
 0x828   : > { %1671 = vadd.xlane.f32.xlu1 %v1670_v13  ;;  %v1968_v13 = vld [vmem:[%s6957_s2 + $0x8] sm:$0xff] }
 0x839   : > { %1771 = vrot.lane.b32.xlu1 %v6283_v50, %s6863_s10  ;;  %v1283_v50 = vld [vmem:[%s6955_s7 + $0x20] sm:$0xff]  ;;  %s6966_s10 = sld [smem:[#allocation49_spill]] }
 0x83a   : > { %v1289_v22 = vpack.c.bf16 %v1284_v21, %v1283_v50  ;;  %v1974_v50 = vld [vmem:[%s6957_s2 + $0x38] sm:$0xff] }
 0x83c   : > { %4249 = vmatpush3.bf16.msra.mxu1 %v1289_v22 }
 0x83d   : > { %4260 = vmatprep.subr.bf16.mxu1 %v5481_v0 }
 0x83f   : > { %s1124_s6 = sand.u32 1, %s6966_s10  }
 0x840   : > { %s3992_s4 = sshll.u32 %s1124_s6, 3  ;;  %s3674_s10 = scalar_lea.sflag [#allocation5], %s1124_s6 }
 0x8b5   : > { %v1672_v14 = vpop.xlane.xlu1 %1671 }
 0x8b6   : > { %4727 = vrcp.f32 %v1672_v14 }
 0x8b9   : > { %v1772_v17 = vpop.permute.xlu1 %1771 }
 0x8ba   : > { %v1777_v19 = vsel %vm1296_vm3, %v1772_v17, 0  ;;  %v1971_v17 = vld [vmem:[%s6957_s2 + $0x20] sm:$0xff] }
 0x8c0   : > { %v4728_v15 = vpop.eup %4727 }
 0x8c1   : > { %v1674_v16 = vmul.f32 %v4728_v15, %v4726_v12  ;;  %v1967_v12 = vld [vmem:[%s6956_s8] sm:$0xff]  ;;  %v1970_v15 = vld [vmem:[%s6957_s2 + $0x18] sm:$0xff]  ;;  %s6963_s8 = sld [smem:[#allocation73_spill]] }
 0x8c2   : > { %v1977_v14 = vpack.c.bf16 %v1968_v13, %v1967_v12 }
 0x8c3   : > { %v1675_v18 = vpack.c.bf16 %v1674_v16, %v1674_v16 }
 0x8c5   : > { %4245 = vmatmul.mubr.msk.bf16.vlgmr.msra.gmra.mrb[20].mxu0 %vm1351_vm6, %v1675_v18  ;;  %v1972_v18 = vld [vmem:[%s6957_s2 + $0x28] sm:$0xff] }
 0x8c6   : > { %4255 = vmatpush3.bf16.xpose.msra.mxu0 %v1777_v19  ;;  %4256 = vmatprep.mubr.msk.bf16.mxu0 %vm5482_vm0, %v5481_v0  ;;  %v1979_v19 = vpack.c.bf16 %v1972_v18, %v1971_v17 }
 0x8c7   : > { %4272 = vmatprep.subr.bf16.mxu0 %v5481_v0 }
 0x8cd   : > { %4257 = vmatmul.mubr.msk.bf16.vlgmr.msra.gmra.mrb[24].mxu0 %vm1296_vm3, %v1770_v20  ;;  %v1973_v20 = vld [vmem:[%s6957_s2 + $0x30] sm:$0xff] }
 0x8ce   : > { %4280 = vmatprep.mubr.msk.bf16.mxu0 %vm5482_vm0, %v5481_v0  ;;  %4273 = vmatpush3.bf16.msra.mxu0 %v1977_v14  ;;  %v1980_v21 = vpack.c.bf16 %v1974_v50, %v1973_v20  ;;  %v4014_v14 = vld [vmem:[#allocation15] ss:$0 sm:$0xff] }
 0x8cf   : > { %4274 = vmatprep.subr.bf16.mxu0 %v5481_v0 }
 0x998   : > { %v1718_v23 = vpop.f32.mrb[20].mxu0 }
 0x999   : > { %v1724_v24 = vpack.c.bf16 %v1718_v23, %v1718_v23  ;;  %v4246_v25 = vpop.f32.mrb[21].mxu0 }
 0x99a   : > { %v1721_v26 = vpop.f32.mrb[22].mxu0 }
 0x99b   : > { %v4247_v27 = vpop.f32.mrb[23].mxu0  ;;  %4251 = vmatmul.mubr.msk.bf16.vlgmr.msra.gmra.mrb[8].mxu1 %vm1296_vm3, %v1724_v24  ;;  %v4010_v26 = vld [vmem:[#allocation9] ss:$0 sm:$0xff] }
 0x99c   : > { %4262 = vmatprep.mubr.msk.bf16.mxu1 %vm5482_vm0, %v5481_v0 }
 0x9a0   : > { %v1813_v28 = vpop.f32.mrb[24].mxu0 }
 0x9a1   : > { %v1819_v29 = vmul.f32 0.25, %v1813_v28  ;;  %v4258_v30 = vpop.f32.mrb[25].mxu0  ;;  %v4011_v28 = vld [vmem:[#allocation11] ss:$0 sm:$0xff] }
 0x9a2   : > { %v1816_v31 = vpop.f32.mrb[26].mxu0 }
 0x9a3   : > { %v4259_v32 = vpop.f32.mrb[27].mxu0  ;;  %v1820_v34 = vadd.f32 %v1819_v29, %v6316_v1 }
 0x9a4   : > { %v2057_v32 = vld [vmem:[#allocation14] sm:$0xff] }
 0x9a5   : > { %v1821_v35 = vsel %vm1351_vm6, %v1820_v34, -inf }
 0x9a6   : > { %1822 = vmax.xlane.f32.xlu1 %v1821_v35 }
 0xa33   : > { %v1823_v37 = vpop.xlane.xlu1 %1822 }
 0xa34   : > { %v1824_v38 = vsub.f32 %v1820_v34, %v1823_v37  ;;  %v2058_v34 = vld [vmem:[#allocation14 + $0x8] sm:$0xff]  ;;  %v2059_v37 = vld [vmem:[#allocation14 + $0x10] sm:$0xff] }
 0xa35   : > { %v2063_v35 = vpack.c.bf16 %v2058_v34, %v2057_v32  ;;  %v4025_v32 = vld [vmem:[%s6952_s29 + $0xb8] sm:$0xff] }
 0xa36   : > { %v1825_v39 = vmul.f32 1.442695, %v1824_v38  ;;  %v2060_v38 = vld [vmem:[#allocation14 + $0x18] sm:$0xff] }
 0xa38   : > { %4729 = vpow2.f32 %v1825_v39  ;;  %v2064_v39 = vpack.c.bf16 %v2060_v38, %v2059_v37  ;;  %v4024_v37 = vld [vmem:[%s6952_s29 + $0xb0] sm:$0xff] }
 0xa42   : > { %v4730_v40 = vpop.eup %4729 }
 0xa43   : > { %v1827_v41 = vsel %vm1351_vm6, %v4730_v40, 0.0 }
 0xa44   : > { %1828 = vadd.xlane.f32.xlu0 %v1827_v41 }
 0xa5a   : > { %1833 = vrot.lane.b32.xlu0 %v6296_v58, %s6864_s15  ;;  %s6964_s15 = smov %s6963_s8 }
 0xad1   : > { %v1829_v44 = vpop.xlane.xlu0 %1828 }
 0xad2   : > { %4731 = vrcp.f32 %v1829_v44 }
 0xad5   : > { %v1834_v45 = vpop.permute.xlu0 %1833 }
 0xad6   : > { %v1839_v46 = vsel %vm1367_vm4, %v1834_v45, 0 }
 0xad7   : > { %4261 = vmatpush3.bf16.msra.mxu1 %v1839_v46 }
 0xad8   : > { %4266 = vmatprep.subr.bf16.mxu1 %v5481_v0 }
 0xadc   : > { %v4732_v49 = vpop.eup %4731 }
 0xadd   : > { %v1831_v51 = vmul.f32 %v4732_v49, %v4730_v40  ;;  %v4012_v40 = vld [vmem:[#allocation12] ss:$0 sm:$0xff] }
 0xadf   : > { %v1832_v58 = vpack.c.bf16 %v1831_v51, %v1831_v51 }
 0xae1   : > { %4263 = vmatmul.mubr.msk.bf16.vlgmr.msra.gmra.mrb[12].mxu1 %vm1351_vm6, %v1832_v58 }
 0xae2   : > { %4267 = vmatpush3.bf16.msra.mxu1 %v1290_v53  ;;  %4268 = vmatprep.mubr.msk.bf16.mxu1 %vm5482_vm0, %v5481_v0 }
 0xae3   : > { %4284 = vmatprep.subr.bf16.mxu1 %v5481_v0 }
 0xbb4   : > { %v1875_v54 = vpop.f32.mrb[12].mxu1 }
 0xbb5   : > { %v1881_v55 = vpack.c.bf16 %v1875_v54, %v1875_v54  ;;  %v4264_v56 = vpop.f32.mrb[13].mxu1 }
 0xbb6   : > { %v1878_v57 = vpop.f32.mrb[14].mxu1 }
 0xbb7   : > { %v4265_v59 = vpop.f32.mrb[15].mxu1  ;;  %4269 = vmatmul.mubr.msk.bf16.vlgmr.msra.gmra.mrb[8].mxu1 %vm1296_vm3, %v1881_v55 }
 0xbb8   : > { %4288 = vmatprep.mubr.msk.bf16.mxu1 %vm5482_vm0, %v5481_v0  ;;  %4285 = vmatpush3.bf16.msra.mxu1 %v2063_v35  ;;  %v4022_v35 = vld [vmem:[%s6952_s29 + $0xa0] sm:$0xff] }
 0xbb9   : > { %4286 = vmatprep.subr.bf16.mxu1 %v5481_v0  ;;  %v2166_v38 = vpack.c.bf16 %v4024_v37, %v4022_v35 }
 0xbbc   : > { %4287 = vmatpush3.bf16.msra.mxu1 %v2064_v39  ;;  %v4027_v39 = vld [vmem:[%s6952_s29 + $0xc8] sm:$0xff] }
 0xbbd   : > { %4292 = vmatprep.subr.bf16.mxu1 %v5481_v0 }
 0xc8a   : > { %v1919_v60 = vpop.f32.mrb[8].mxu1 }
 0xc8b   : > { %1926 = vst.msk [vmem:[#allocation2] sm:$0xff] %vm1234_vm2, %v1919_v60  ;;  %v4270_v61 = vpop.f32.mrb[9].mxu1 }
 0xc8c   : > { %v1922_v62 = vpop.f32.mrb[10].mxu1 }
 0xc8d   : > { %v4271_v63 = vpop.f32.mrb[11].mxu1 }
 0xc92   : > { %v1927_v3 = vld [vmem:[#allocation2] sm:$0xff] }
 0xc93   : > { %v1935_v4 = vadd.f32 %v4009_v2, %v1927_v3 }
 0xc95   : > { %v1936_v5 = vadd.f32 %v1935_v4, %v6270_v36  ;;  %v1969_v36 = vld [vmem:[%s6957_s2 + $0x10] sm:$0xff] }
 0xc96   : > { %v1978_v16 = vpack.c.bf16 %v1970_v15, %v1969_v36 }
 0xc97   : > { %v1939_v6 = vsel %vm1234_vm2, %v1936_v5, 0.0 }
 0xc98   : > { %1940 = vadd.xlane.f32.xlu1 %v1939_v6  ;;  %4275 = vmatpush3.bf16.msra.mxu0 %v1978_v16 }
 0xc99   : > { %4276 = vmatprep.subr.bf16.mxu0 %v5481_v0 }
 0xc9c   : > { %4277 = vmatpush3.bf16.msra.mxu0 %v1979_v19 }
 0xc9d   : > { %4278 = vmatprep.subr.bf16.mxu0 %v5481_v0 }
 0xca0   : > { %4279 = vmatpush3.bf16.msra.mxu0 %v1980_v21 }
 0xd25   : > { %v1941_v7 = vpop.xlane.xlu1 %1940 }
 0xd26   : > { %v1943_v8 = vmul.f32 0.015625, %v1941_v7  ;;  %v5491_v7 = vmov -1.0  }
 0xd28   : > { %v1944_v9 = vsub.f32 %v1936_v5, %v1943_v8 }
 0xd2a   : > { %v1945_v10 = vmul.f32 %v1944_v9, %v1944_v9 }
 0xd2c   : > { %v1946_v11 = vsel %vm1234_vm2, %v1945_v10, 0.0 }
 0xd2d   : > { %1947 = vadd.xlane.f32.xlu1 %v1946_v11 }
 0xdba   : > { %v1948_v22 = vpop.xlane.xlu1 %1947 }
 0xdbb   : > { %v1949_v23 = vmul.f32 0.015625, %v1948_v22 }
 0xdbd   : > { %v1950_v24 = vadd.f32 1e-05, %v1949_v23 }
 0xdbf   : > { %4733 = vrsqrt.f32 %v1950_v24 }
 0xdc9   : > { %v4734_v25 = vpop.eup %4733 }
 0xdca   : > { %v1952_v27 = vmul.f32 %v4734_v25, %v1944_v9  ;;  %v4019_v25 = vld [vmem:[%s6952_s29 + $0x88] sm:$0xff] }
 0xdcc   : > { %v1959_v29 = vmul.f32 %v4010_v26, %v1952_v27  ;;  %v4021_v26 = vld [vmem:[%s6952_s29 + $0x98] sm:$0xff] }
 0xdcd   : > { %v2165_v27 = vpack.c.bf16 %v4021_v26, %v4019_v25 }
 0xdce   : > { %v1966_v30 = vadd.f32 %v4011_v28, %v1959_v29  ;;  %v4018_v28 = vld [vmem:[%s6952_s29 + $0x80] sm:$0xff]  ;;  %v4020_v29 = vld [vmem:[%s6952_s29 + $0x90] sm:$0xff] }
 0xdcf   : > { %2186 = vmatprep.subr.bf16.mxu0 %v2165_v27 }
 0xdd0   : > { %v1976_v31 = vpack.c.bf16 %v1966_v30, %v1966_v30 }
 0xdd2   : > { %4281 = vmatmul.mubr.msk.bf16.vlgmr.msra.gmra.mrb[28].mxu0 %vm1234_vm2, %v1976_v31  ;;  %v4023_v31 = vld [vmem:[%s6952_s29 + $0xa8] sm:$0xff] }
 0xdd3   : > { %2218 = vmatprep.mubr.bf16.mxu0 %v5483_v33  ;;  %v2167_v34 = vpack.c.bf16 %v4025_v32, %v4023_v31 }
 0xea5   : > { %v2024_v41 = vpop.f32.mrb[28].mxu0 }
 0xea6   : > { %v2025_v44 = vadd.f32 %v4012_v40, %v2024_v41  ;;  %v4282_v45 = vpop.f32.mrb[29].mxu0  ;;  %v4029_v40 = vld [vmem:[%s6952_s29 + $0xd8] sm:$0xff] }
 0xea7   : > { %v2027_v46 = vpop.f32.mrb[30].mxu0  ;;  %v2169_v41 = vpack.c.bf16 %v4029_v40, %v4027_v39  ;;  %v4028_v45 = vld [vmem:[%s6952_s29 + $0xd0] sm:$0xff] }
 0xea8   : > { %v2031_v47 = vmul.f32 0.70710677, %v2025_v44  ;;  %v4283_v48 = vpop.f32.mrb[31].mxu0  ;;  %v2030_v10 = vmul.f32 0.5, %v2025_v44  ;;  %v4026_v44 = vld [vmem:[%s6952_s29 + $0xc0] sm:$0xff] }
 0xea9   : > { %v2168_v46 = vpack.c.bf16 %v4028_v45, %v4026_v44  ;;  %v4033_v48 = vld [vmem:[%s6952_s29 + $0xf8] sm:$0xff] }
 0xeaa   : > { %v2034_v33 = vand.u32 2147483647, %v2031_v47  ;;  %vm2032_vm7 = vcmp.ge.f32.partialorder %v2031_v47, 0.0  ;;  %v4031_v47 = vld [vmem:[%s6952_s29 + $0xe8] sm:$0xff] }
 0xeab   : > { %v2033_v8 = vsel %vm2032_vm7, 1.0, %v5491_v7 }
 0xeac   : > { %v2035_v49 = vmul.f32 0.3275911, %v2034_v33  ;;  %v2048_v53 = vsub.f32 0.0, %v2034_v33 }
 0xeae   : > { %v2036_v51 = vadd.f32 1.0, %v2035_v49  ;;  %v2049_v54 = vmul.f32 %v2048_v53, %v2034_v33  ;;  %v4030_v33 = vld [vmem:[%s6952_s29 + $0xe0] sm:$0xff]  ;;  %v2171_v49 = vpack.c.bf16 %v4033_v48, %v4031_v47 }
 0xeb0   : > { %4735 = vrcp.f32 %v2036_v51  ;;  %v2050_v57 = vmul.f32 1.442695, %v2049_v54  ;;  %v4032_v51 = vld [vmem:[%s6952_s29 + $0xf0] sm:$0xff] }
 0xeb1   : > { %v2170_v53 = vpack.c.bf16 %v4032_v51, %v4030_v33 }
 0xeb2   : > { %4737 = vpow2.f32 %v2050_v57  ;;  %v4016_v57 = vld [vmem:[#allocation17] ss:$0 sm:$0xff] }
 0xeba   : > { %v4736_v58 = vpop.eup %4735 }
 0xebb   : > { %v2039_v55 = vmul.f32 1.0614054, %v4736_v58 }
 0xebc   : > { %v4738_v4 = vpop.eup %4737 }
 0xebd   : > { %v2040_v56 = vadd.f32 -1.4531521, %v2039_v55 }
 0xebf   : > { %v2041_v59 = vmul.f32 %v4736_v58, %v2040_v56 }
 0xec1   : > { %v2042_v60 = vadd.f32 1.4214138, %v2041_v59 }
 0xec3   : > { %v2043_v61 = vmul.f32 %v4736_v58, %v2042_v60  ;;  %v4017_v60 = vld [vmem:[#allocation18] ss:$0 sm:$0xff] }
 0xec5   : > { %v2044_v62 = vadd.f32 -0.28449672, %v2043_v61 }
 0xec7   : > { %v2045_v63 = vmul.f32 %v4736_v58, %v2044_v62 }
 0xec9   : > { %v2046_v2 = vadd.f32 0.2548296, %v2045_v63 }
 0xecb   : > { %v2047_v3 = vmul.f32 %v4736_v58, %v2046_v2  ;;  %v2162_v2 = vld [vmem:[#allocation6 + $0x2] sm:$0x3] }
 0xecd   : > { %v2052_v5 = vmul.f32 %v4738_v4, %v2047_v3  ;;  %v2176_v3 = vrot.slane %v2162_v2, %v6280_v43 }
 0xecf   : > { %v2053_v6 = vsub.f32 1.0, %v2052_v5 }
 0xed1   : > { %v2054_v9 = vmul.f32 %v2053_v6, %v2033_v8 }
 0xed3   : > { %v2055_v11 = vadd.f32 1.0, %v2054_v9 }
 0xed5   : > { %v2056_v12 = vmul.f32 %v2055_v11, %v2030_v10  ;;  %v2180_v11 = vrot.slane %v2162_v2, %v1230_v52 }
 0xed7   : > { %v2062_v13 = vpack.c.bf16 %v2056_v12, %v2056_v12 }
 0xed9   : > { %4289 = vmatmul.mubr.msk.bf16.vlgmr.msra.gmra.mrb[16].mxu1 %vm1150_vm1, %v2062_v13 }
 0xeda   : > { %4294 = vmatprep.mubr.msk.bf16.mxu1 %vm5482_vm0, %v5481_v0 }
 0xfac   : > { %v2108_v36 = vpop.f32.mrb[16].mxu1 }
 0xfad   : > { %v2109_v15 = vadd.f32 %v4014_v14, %v2108_v36  ;;  %v4290_v16 = vpop.f32.mrb[17].mxu1 }
 0xfae   : > { %v2111_v17 = vpop.f32.mrb[18].mxu1 }
 0xfaf   : > { %v4291_v18 = vpop.f32.mrb[19].mxu1  ;;  %v2114_v19 = vadd.f32 %v2109_v15, %v1966_v30  ;;  %v2164_v30 = vpack.c.bf16 %v4020_v29, %v4018_v28 }
 0xfb1   : > { %v2117_v20 = vsel %vm1234_vm2, %v2114_v19, 0.0  ;;  %2187 = vmatpush1.bf16.msra.mxu0 %v2164_v30 }
 0xfb2   : > { %2118 = vadd.xlane.f32.xlu1 %v2117_v20  ;;  %2188 = vmatprep.subr.bf16.mxu0 %v2167_v34 }
 0xfb5   : > { %2189 = vmatpush1.bf16.msra.mxu0 %v2166_v38 }
 0xfb6   : > { %2190 = vmatprep.subr.bf16.mxu0 %v2169_v41 }
 0xfb9   : > { %2191 = vmatpush1.bf16.msra.mxu0 %v2168_v46 }
 0xfba   : > { %2192 = vmatprep.subr.bf16.mxu0 %v2171_v49 }
 0xfbd   : > { %2193 = vmatpush1.bf16.msra.mxu0 %v2170_v53 }
 0xfbe   : > { %4304 = vmatprep.subr.bf16.mxu0 %v5481_v0 }
0x103f   : > { %v2119_v50 = vpop.xlane.xlu1 %2118 }
0x1040   : > { %v2120_v21 = vmul.f32 0.015625, %v2119_v50 }
0x1042   : > { %v2121_v22 = vsub.f32 %v2114_v19, %v2120_v21 }
0x1044   : > { %v2122_v23 = vmul.f32 %v2121_v22, %v2121_v22 }
0x1046   : > { %v2123_v24 = vsel %vm1234_vm2, %v2122_v23, 0.0 }
0x1047   : > { %2124 = vadd.xlane.f32.xlu1 %v2123_v24 }
0x10d4   : > { %v2125_v58 = vpop.xlane.xlu1 %2124 }
0x10d5   : > { %v2126_v54 = vmul.f32 0.015625, %v2125_v58 }
0x10d7   : > { %v2127_v55 = vadd.f32 1e-05, %v2126_v54 }
0x10d9   : > { %4739 = vrsqrt.f32 %v2127_v55 }
0x10e3   : > { %v4740_v56 = vpop.eup %4739 }
0x10e4   : > { %v2129_v59 = vmul.f32 %v4740_v56, %v2121_v22  ;;  %v4037_v56 = vld [vmem:[%s6955_s7 + $0x50] sm:$0xff] }
0x10e6   : > { %v2136_v61 = vmul.f32 %v4016_v57, %v2129_v59  ;;  %v4038_v57 = vld [vmem:[%s6955_s7 + $0x58] sm:$0xff] }
0x10e7   : > { %v2237_v59 = vpack.c.bf16 %v4038_v57, %v4037_v56  ;;  %v4042_v57 = vld [vmem:[%s6955_s7 + $0x78] sm:$0xff] }
0x10e8   : > { %v6502_v62 = vadd.f32 %v4017_v60, %v2136_v61 }
0x10ea   : > { %v2163_v63 = vpack.c.bf16 %v6502_v62, %v6502_v62 }
0x10ec   : > { %4034 = vmatmul.mubr.msk.bf16.vlgmr.msra.gmra.mrb[32].mxu0 %vm1234_vm2, %v2163_v63 }
0x10ed   : > { %4306 = vmatprep.mubr.msk.bf16.mxu0 %vm5482_vm0, %v5481_v0 }
0x11bf   : > { %v2220_v4 = vpop.f32.mrb[32].mxu0 }
0x11c0   : > { %v2221_v5 = vadd.f32 %v2220_v4, %v2176_v3  ;;  %v2222_v6 = vpop.f32.mrb[33].mxu0  ;;  %v4035_v3 = vld [vmem:[%s6955_s7 + $0x40] sm:$0xff]  ;;  %v4036_v4 = vld [vmem:[%s6955_s7 + $0x48] sm:$0xff] }
0x11c1   : > { %v2224_v8 = vpop.f32.mrb[34].mxu0  ;;  %v2223_v13 = vadd.f32 %v2222_v6, %v2180_v11  ;;  %v2236_v6 = vpack.c.bf16 %v4036_v4, %v4035_v3 }
0x11c2   : > { %v6510_v9 = vpack.c.bf16 %v2221_v5, %v2221_v5  ;;  %v2225_v10 = vpop.f32.mrb[35].mxu0 }
0x11c3   : > { %v6524_v15 = vpack.c.bf16 %v2223_v13, %v2223_v13 }
0x11c4   : > { %2354 = vrot.lane.b32.xlu0 %v6510_v9, %s5486_s5  ;;  %2243 = vrot.lane.b32.xlu1 %v6510_v9, %s5485_s27  ;;  %s6959_s27 = smov 32   ;;  %s6960_s5 = smov 96  }
0x11c5   : > { %v2309_v42 = vsel %vm1367_vm4, %v6524_v15, 0 }
0x11c8   : > { %2352 = vrot.lane.b32.xlu0 %v6510_v9, %s6958_s3 }
0x1236   : > { %v2355_v43 = vpop.permute.xlu0 %2354  ;;  %v2244_v12 = vpop.permute.xlu1 %2243 }
0x1237   : > { %v2360_v14 = vsel %vm1296_vm3, %v2355_v43, 0  ;;  %v2249_v36 = vsel %vm1296_vm3, %v2244_v12, 0 }
0x1238   : > { %4293 = vmatpush3.bf16.xpose.msra.mxu1 %v2249_v36  ;;  %4305 = vmatpush3.bf16.xpose.msra.mxu0 %v2360_v14 }
0x1239   : > { %4298 = vmatprep.subr.bf16.mxu1 %v5481_v0  ;;  %4316 = vmatprep.subr.bf16.mxu0 %v5481_v0 }
0x123a   : > { %v2353_v16 = vpop.permute.xlu0 %2352 }
0x123f   : > { %4295 = vmatmul.mubr.msk.bf16.vlgmr.msra.gmra.mrb[20].mxu1 %vm1296_vm3, %v6510_v9  ;;  %4307 = vmatmul.mubr.msk.bf16.vlgmr.msra.gmra.mrb[36].mxu0 %vm1296_vm3, %v2353_v16 }
0x1240   : > { %4299 = vmatpush3.bf16.msra.mxu1 %v2309_v42  ;;  %4300 = vmatprep.mubr.msk.bf16.mxu1 %vm5482_vm0, %v5481_v0 }
0x1241   : > { %4310 = vmatprep.subr.bf16.mxu1 %v5481_v0  ;;  %4318 = vmatprep.mubr.msk.bf16.mxu0 %vm5482_vm0, %v5481_v0 }
0x1242   : > { %4317 = vmatpush3.bf16.msra.mxu0 %v2237_v59 }
0x1243   : > { %4322 = vmatprep.subr.bf16.mxu0 %v5481_v0 }
0x1312   : > { %v2285_v52 = vpop.f32.mrb[20].mxu1  ;;  %v2396_v17 = vpop.f32.mrb[36].mxu0 }
0x1313   : > { %v2291_v18 = vmul.f32 0.25, %v2285_v52  ;;  %v2402_v19 = vmul.f32 0.25, %v2396_v17  ;;  %v4296_v20 = vpop.f32.mrb[21].mxu1  ;;  %v4308_v50 = vpop.f32.mrb[37].mxu0 }
0x1314   : > { %v2288_v21 = vpop.f32.mrb[22].mxu1  ;;  %v2399_v22 = vpop.f32.mrb[38].mxu0 }
0x1315   : > { %v4297_v23 = vpop.f32.mrb[23].mxu1  ;;  %v4309_v24 = vpop.f32.mrb[39].mxu0  ;;  %v2403_v25 = vadd.f32 %v2402_v19, %v6316_v1  ;;  %v2292_v26 = vadd.f32 %v2291_v18, %v6316_v1 }
0x1317   : > { %v2404_v27 = vsel %vm1351_vm6, %v2403_v25, -inf  ;;  %v2293_v28 = vsel %vm1351_vm6, %v2292_v26, -inf }
0x1318   : > { %2405 = vmax.xlane.f32.xlu1 %v2404_v27  ;;  %2294 = vmax.xlane.f32.xlu0 %v2293_v28 }
0x1329   : > { %2554 = vrot.lane.b32.xlu1 %v6510_v9, %s6959_s27 }
0x132d   : > { %2552 = vrot.lane.b32.xlu1 %v6510_v9, %s6960_s5 }
0x13a5   : > { %v2295_v29 = vpop.xlane.xlu0 %2294  ;;  %v2406_v30 = vpop.xlane.xlu1 %2405 }
0x13a6   : > { %v2296_v31 = vsub.f32 %v2292_v26, %v2295_v29  ;;  %v2407_v32 = vsub.f32 %v2403_v25, %v2406_v30 }
0x13a8   : > { %v2297_v34 = vmul.f32 1.442695, %v2296_v31  ;;  %v2408_v35 = vmul.f32 1.442695, %v2407_v32  ;;  %v4040_v31 = vld [vmem:[%s6955_s7 + $0x68] sm:$0xff] }
0x13a9   : > { %v2555_v53 = vpop.permute.xlu1 %2554 }
0x13aa   : > { %4741 = vpow2.f32 %v2297_v34  ;;  %v2560_v54 = vsel %vm1296_vm3, %v2555_v53, 0 }
0x13ab   : > { %4743 = vpow2.f32 %v2408_v35 }
0x13ad   : > { %v2553_v55 = vpop.permute.xlu1 %2552 }
0x13b4   : > { %v4742_v37 = vpop.eup %4741 }
0x13b5   : > { %v2299_v38 = vsel %vm1351_vm6, %v4742_v37, 0.0  ;;  %v4744_v39 = vpop.eup %4743 }
0x13b6   : > { %2300 = vadd.xlane.f32.xlu0 %v2299_v38  ;;  %v2410_v40 = vsel %vm1351_vm6, %v4744_v39, 0.0 }
0x13ba   : > { %2411 = vadd.xlane.f32.xlu0 %v2410_v40 }
0x13d0   : > { %2417 = vrot.lane.b32.xlu0 %v6524_v15, %s6958_s3  ;;  %s6962_s3 = smov 16  }
0x1443   : > { %v2301_v41 = vpop.xlane.xlu0 %2300 }
0x1444   : > { %4745 = vrcp.f32 %v2301_v41 }
0x1447   : > { %v2412_v44 = vpop.xlane.xlu0 %2411 }
0x1448   : > { %4747 = vrcp.f32 %v2412_v44 }
0x144b   : > { %v2418_v47 = vpop.permute.xlu0 %2417 }
0x144c   : > { %v2423_v49 = vsel %vm1367_vm4, %v2418_v47, 0 }
0x144e   : > { %v4746_v45 = vpop.eup %4745 }
0x144f   : > { %v2303_v46 = vmul.f32 %v4746_v45, %v4742_v37 }
0x1451   : > { %v2304_v48 = vpack.c.bf16 %v2303_v46, %v2303_v46 }
0x1452   : > { %v4748_v33 = vpop.eup %4747 }
0x1453   : > { %4301 = vmatmul.mubr.msk.bf16.vlgmr.msra.gmra.mrb[24].mxu1 %vm1351_vm6, %v2304_v48  ;;  %v2414_v51 = vmul.f32 %v4748_v33, %v4744_v39 }
0x1454   : > { %4311 = vmatpush3.bf16.msra.mxu1 %v2423_v49  ;;  %4312 = vmatprep.mubr.msk.bf16.mxu1 %vm5482_vm0, %v5481_v0 }
0x1455   : > { %4328 = vmatprep.subr.bf16.mxu1 %v5481_v0  ;;  %v2415_v58 = vpack.c.bf16 %v2414_v51, %v2414_v51 }
0x145b   : > { %4313 = vmatmul.mubr.msk.bf16.vlgmr.msra.gmra.mrb[28].mxu1 %vm1351_vm6, %v2415_v58 }
0x145c   : > { %4330 = vmatprep.mubr.msk.bf16.mxu1 %vm5482_vm0, %v5481_v0 }
0x145d   : > { %4329 = vmatpush3.bf16.xpose.msra.mxu1 %v2560_v54 }
0x145e   : > { %4334 = vmatprep.subr.bf16.mxu1 %v5481_v0 }
0x1464   : > { %4331 = vmatmul.mubr.msk.bf16.vlgmr.msra.gmra.mrb[32].mxu1 %vm1296_vm3, %v2553_v55 }
0x1465   : > { %4336 = vmatprep.mubr.msk.bf16.mxu1 %vm5482_vm0, %v5481_v0 }
0x1526   : > { %v2345_v60 = vpop.f32.mrb[24].mxu1 }
0x1527   : > { %v4302_v61 = vpop.f32.mrb[25].mxu1  ;;  %v2351_v52 = vpack.c.bf16 %v2345_v60, %v2345_v60 }
0x1528   : > { %v2348_v63 = vpop.f32.mrb[26].mxu1 }
0x1529   : > { %v4303_v2 = vpop.f32.mrb[27].mxu1 }
0x152e   : > { %v2459_v5 = vpop.f32.mrb[28].mxu1 }
0x152f   : > { %v2465_v8 = vpack.c.bf16 %v2459_v5, %v2459_v5  ;;  %v4314_v10 = vpop.f32.mrb[29].mxu1 }
0x1530   : > { %v2462_v11 = vpop.f32.mrb[30].mxu1 }
0x1531   : > { %v4315_v43 = vpop.f32.mrb[31].mxu1  ;;  %4319 = vmatmul.mubr.msk.bf16.vlgmr.msra.gmra.mrb[40].mxu0 %vm1296_vm3, %v2465_v8 }
0x1532   : > { %4323 = vmatpush3.bf16.msra.mxu0 %v2236_v6  ;;  %4324 = vmatprep.mubr.msk.bf16.mxu0 %vm5482_vm0, %v5481_v0  ;;  %v4055_v43 = vld [vmem:[#allocation8 + $0x1] ss:$0 sm:$0xff] }
0x1533   : > { %4340 = vmatprep.subr.bf16.mxu0 %v5481_v0 }
0x1537   : > { %v2596_v12 = vpop.f32.mrb[32].mxu1 }
0x1538   : > { %v2602_v13 = vmul.f32 0.25, %v2596_v12  ;;  %v4332_v14 = vpop.f32.mrb[33].mxu1 }
0x1539   : > { %v2599_v36 = vpop.f32.mrb[34].mxu1 }
0x153a   : > { %v4333_v16 = vpop.f32.mrb[35].mxu1  ;;  %v2603_v42 = vadd.f32 %v2602_v13, %v6316_v1 }
0x153c   : > { %v2604_v17 = vsel %vm1351_vm6, %v2603_v42, -inf }
0x153d   : > { %2605 = vmax.xlane.f32.xlu0 %v2604_v17  ;;  %4325 = vmatmul.mubr.msk.bf16.vlgmr.msra.gmra.mrb[40].mxu0 %vm1296_vm3, %v2351_v52 }
0x153e   : > { %4342 = vmatprep.mubr.msk.bf16.mxu0 %vm5482_vm0, %v5481_v0 }
0x1553   : > { %2616 = vrot.lane.b32.xlu0 %v6524_v15, %s6960_s5 }
0x1557   : > { %2709 = vrot.lane.b32.xlu0 %v6510_v9, %s6961_s9 }
0x15ca   : > { %v2606_v18 = vpop.xlane.xlu0 %2605 }
0x15cb   : > { %v2607_v19 = vsub.f32 %v2603_v42, %v2606_v18 }
0x15cd   : > { %v2608_v20 = vmul.f32 1.442695, %v2607_v19  ;;  %v4058_v19 = vld [vmem:[%s6957_s2 + $0x40] sm:$0xff] }
0x15ce   : > { %v2617_v50 = vpop.permute.xlu0 %2616 }
0x15cf   : > { %4749 = vpow2.f32 %v2608_v20  ;;  %v2622_v21 = vsel %vm1367_vm4, %v2617_v50, 0  ;;  %v4059_v20 = vld [vmem:[%s6957_s2 + $0x48] sm:$0xff] }
0x15d0   : > { %4335 = vmatpush3.bf16.msra.mxu1 %v2622_v21  ;;  %v2921_v50 = vpack.c.bf16 %v4059_v20, %v4058_v19  ;;  %v4061_v21 = vld [vmem:[%s6957_s2 + $0x58] sm:$0xff] }
0x15d1   : > { %4346 = vmatprep.subr.bf16.mxu1 %v5481_v0 }
0x15d2   : > { %v2710_v30 = vpop.permute.xlu0 %2709 }
0x15d9   : > { %v4750_v22 = vpop.eup %4749 }
0x15da   : > { %v2610_v23 = vsel %vm1351_vm6, %v4750_v22, 0.0 }
0x15db   : > { %2611 = vadd.xlane.f32.xlu1 %v2610_v23  ;;  %v4062_v23 = vld [vmem:[%s6957_s2 + $0x60] sm:$0xff] }
0x15ec   : > { %2711 = vrot.lane.b32.xlu1 %v6510_v9, %s6962_s3  ;;  %v4039_v9 = vld [vmem:[%s6955_s7 + $0x60] sm:$0xff]  ;;  %s1126_s3 = scalar_lea.vmem [#allocation35], %s3992_s4 }
0x15ed   : > { %v2238_v32 = vpack.c.bf16 %v4040_v31, %v4039_v9  ;;  %s3687_s27 = sshll.u32 %s1126_s3, 4  ;;  %s6754_s27 = int_to_ptr.vmem [resolvable:$true] %s3687_s27 }
0x15ef   : > { %4341 = vmatpush3.bf16.msra.mxu0 %v2238_v32  ;;  %v4056_v32 = vld [vmem:[#allocation9 + $0x1] ss:$0 sm:$0xff] }
0x15f0   : > { %4352 = vmatprep.subr.bf16.mxu0 %v5481_v0 }
0x1668   : > { %v2612_v24 = vpop.xlane.xlu1 %2611 }
0x1669   : > { %4751 = vrcp.f32 %v2612_v24  ;;  %v4063_v24 = vld [vmem:[%s6957_s2 + $0x68] sm:$0xff] }
0x166c   : > { %v2712_v27 = vpop.permute.xlu1 %2711 }
0x166d   : > { %v2717_v29 = vsel %vm1296_vm3, %v2712_v27, 0  ;;  %v4065_v27 = vld [vmem:[%s6957_s2 + $0x78] sm:$0xff] }
0x1673   : > { %v4752_v25 = vpop.eup %4751 }
0x1674   : > { %v2614_v26 = vmul.f32 %v4752_v25, %v4750_v22  ;;  %v2923_v25 = vpack.c.bf16 %v4063_v24, %v4062_v23 }
0x1676   : > { %v2615_v28 = vpack.c.bf16 %v2614_v26, %v2614_v26  ;;  %v4064_v26 = vld [vmem:[%s6957_s2 + $0x70] sm:$0xff] }
0x1678   : > { %4337 = vmatmul.mubr.msk.bf16.vlgmr.msra.gmra.mrb[36].mxu1 %vm1351_vm6, %v2615_v28  ;;  %v2924_v28 = vpack.c.bf16 %v4065_v27, %v4064_v26 }
0x1679   : > { %4347 = vmatpush3.bf16.xpose.msra.mxu1 %v2717_v29  ;;  %4348 = vmatprep.mubr.msk.bf16.mxu1 %vm5482_vm0, %v5481_v0 }
0x167a   : > { %4364 = vmatprep.subr.bf16.mxu1 %v5481_v0 }
0x1680   : > { %4349 = vmatmul.mubr.msk.bf16.vlgmr.msra.gmra.mrb[40].mxu1 %vm1296_vm3, %v2710_v30 }
0x1681   : > { %4372 = vmatprep.mubr.msk.bf16.mxu1 %vm5482_vm0, %v5481_v0  ;;  %4365 = vmatpush3.bf16.msra.mxu1 %v2921_v50 }
0x1682   : > { %4366 = vmatprep.subr.bf16.mxu1 %v5481_v0 }
0x174b   : > { %v2658_v34 = vpop.f32.mrb[36].mxu1 }
0x174c   : > { %v2664_v35 = vpack.c.bf16 %v2658_v34, %v2658_v34  ;;  %v4338_v37 = vpop.f32.mrb[37].mxu1 }
0x174d   : > { %v2661_v38 = vpop.f32.mrb[38].mxu1 }
0x174e   : > { %v4339_v39 = vpop.f32.mrb[39].mxu1  ;;  %4343 = vmatmul.mubr.msk.bf16.vlgmr.msra.gmra.mrb[40].mxu0 %vm1296_vm3, %v2664_v35  ;;  %v4057_v35 = vld [vmem:[#allocation11 + $0x1] ss:$0 sm:$0xff] }
0x174f   : > { %4354 = vmatprep.mubr.msk.bf16.mxu0 %vm5482_vm0, %v5481_v0 }
0x1753   : > { %v2753_v40 = vpop.f32.mrb[40].mxu1 }
0x1754   : > { %v2759_v41 = vmul.f32 0.25, %v2753_v40  ;;  %v4350_v44 = vpop.f32.mrb[41].mxu1  ;;  %v3002_v40 = vld [vmem:[#allocation14 + $0x20] sm:$0xff] }
0x1755   : > { %v2756_v45 = vpop.f32.mrb[42].mxu1 }
0x1756   : > { %v4351_v46 = vpop.f32.mrb[43].mxu1  ;;  %v2760_v47 = vadd.f32 %v2759_v41, %v6316_v1  ;;  %v4041_v1 = vld [vmem:[%s6955_s7 + $0x70] sm:$0xff]  ;;  %v3003_v41 = vld [vmem:[#allocation14 + $0x28] sm:$0xff]  ;;  %v3004_v45 = vld [vmem:[#allocation14 + $0x30] sm:$0xff]  ;;  %s5347_s7 = scalar_lea.vmem %s6754_s27, 128 }
0x1757   : > { %v2239_v61 = vpack.c.bf16 %v4042_v57, %v4041_v1  ;;  %v3009_v44 = vpack.c.bf16 %v3003_v41, %v3002_v40  ;;  %v3005_v46 = vld [vmem:[#allocation14 + $0x38] sm:$0xff]  ;;  %p5348_p4 = scmp.ne.s32.totalorder %s6754_s27, %s5347_s7 }
0x1758   : > { %v2761_v48 = vsel %vm1351_vm6, %v2760_v47, -inf }
0x1759   : > { %2762 = vmax.xlane.f32.xlu1 %v2761_v48  ;;  %v4066_v48 = vld [vmem:[#allocation12 + $0x1] ss:$0 sm:$0xff]  ;;  %p5349_p8 = pnand %p5348_p4, %p6970_p7 }
0x175b   : > { %p5350_p11 = pneg %p5349_p8 }
0x17e6   : > { %v2763_v33 = vpop.xlane.xlu1 %2762 }
0x17e7   : > { %v2764_v49 = vsub.f32 %v2760_v47, %v2763_v33  ;;  %v3010_v47 = vpack.c.bf16 %v3005_v46, %v3004_v45  ;;  %v3121_v45 = vld [vmem:[%s6963_s8] sm:$0xff]  ;;  %v3122_v46 = vld [vmem:[%s6964_s15 + $0x8] sm:$0xff] }
0x17e9   : > { %v2765_v51 = vmul.f32 1.442695, %v2764_v49 }
0x17eb   : > { %4753 = vpow2.f32 %v2765_v51 }
0x17f5   : > { %v4754_v53 = vpop.eup %4753 }
0x17f6   : > { %v2767_v58 = vsel %vm1351_vm6, %v4754_v53, 0.0 }
0x17f7   : > { %2768 = vadd.xlane.f32.xlu0 %v2767_v58 }
0x180d   : > { %2773 = vrot.lane.b32.xlu0 %v6524_v15, %s6961_s9  ;;  %s4102_s9 = sshll.u32 %s6928_s1, 7  ;;  %s5492_s1 = smov [#allocation35]  }
0x180e   : > { %s5351_s4 = sshll.u32 %s5492_s1, 4  ;;  %s5352_s4 = int_to_ptr.vmem [resolvable:$false] %s5351_s4 }
0x180f   : > { %s5353_s11 = scalar_lea.vmem %s5352_s4, 256  ;;  %p5354_p5 = scmp.lt.s32.totalorder %s6754_s27, %s5352_s4 }
0x1810   : > { %p5355_p0 = scmp.lt.s32.totalorder %s5353_s11, %s5347_s7 }
0x1812   : > { %p5356_p6 = por %p5355_p0, %p5354_p5 }
0x1814   : > { %p5357_p9 = pnand %p5356_p6, %p5350_p11 }
0x1884   : > { %v2769_v54 = vpop.xlane.xlu0 %2768 }
0x1885   : > { %4755 = vrcp.f32 %v2769_v54 }
0x1888   : > { %v2774_v55 = vpop.permute.xlu0 %2773 }
0x1889   : > { %v2779_v56 = vsel %vm1367_vm4, %v2774_v55, 0 }
0x188a   : > { %4353 = vmatpush3.bf16.msra.mxu0 %v2779_v56 }
0x188b   : > { %4358 = vmatprep.subr.bf16.mxu0 %v5481_v0 }
0x188f   : > { %v4756_v59 = vpop.eup %4755 }
0x1890   : > { %v2771_v60 = vmul.f32 %v4756_v59, %v4754_v53 }
0x1892   : > { %v2772_v15 = vpack.c.bf16 %v2771_v60, %v2771_v60 }
0x1894   : > { %4355 = vmatmul.mubr.msk.bf16.vlgmr.msra.gmra.mrb[44].mxu0 %vm1351_vm6, %v2772_v15 }
0x1895   : > { %4359 = vmatpush3.bf16.msra.mxu0 %v2239_v61  ;;  %4360 = vmatprep.mubr.msk.bf16.mxu0 %vm5482_vm0, %v5481_v0 }
0x1896   : > { %4376 = vmatprep.subr.bf16.mxu0 %v5481_v0 }
0x1967   : > { %v2815_v63 = vpop.f32.mrb[44].mxu0 }
0x1968   : > { %v2821_v2 = vpack.c.bf16 %v2815_v63, %v2815_v63  ;;  %v4356_v3 = vpop.f32.mrb[45].mxu0 }
0x1969   : > { %v2818_v4 = vpop.f32.mrb[46].mxu0 }
0x196a   : > { %v4357_v5 = vpop.f32.mrb[47].mxu0  ;;  %4361 = vmatmul.mubr.msk.bf16.vlgmr.msra.gmra.mrb[40].mxu0 %vm1296_vm3, %v2821_v2 }
0x196b   : > { %4380 = vmatprep.mubr.msk.bf16.mxu0 %vm5482_vm0, %v5481_v0  ;;  %4377 = vmatpush3.bf16.msra.mxu0 %v3009_v44 }
0x196c   : > { %4378 = vmatprep.subr.bf16.mxu0 %v5481_v0 }
0x196f   : > { %4379 = vmatpush3.bf16.msra.mxu0 %v3010_v47  ;;  %v3131_v47 = vpack.c.bf16 %v3122_v46, %v3121_v45  ;;  %v4079_v46 = vld [vmem:[#allocation27] ss:$0 sm:$0xff] }
0x1970   : > { %4396 = vmatprep.subr.bf16.mxu0 %v5481_v0 }
0x1a3d   : > { %v2859_v6 = vpop.f32.mrb[40].mxu0 }
0x1a3e   : > { %2866 = vst.msk [vmem:[#allocation2] sm:$0xff] %vm1234_vm2, %v2859_v6  ;;  %v4362_v8 = vpop.f32.mrb[41].mxu0 }
0x1a3f   : > { %v2862_v10 = vpop.f32.mrb[42].mxu0 }
0x1a40   : > { %v4363_v11 = vpop.f32.mrb[43].mxu0 }
0x1a45   : > { %v2867_v12 = vld [vmem:[#allocation2] sm:$0xff] }
0x1a46   : > { %v2876_v13 = vadd.f32 %v4055_v43, %v2867_v12 }
0x1a48   : > { %v2877_v14 = vadd.f32 %v2876_v13, %v6502_v62  ;;  %v4060_v62 = vld [vmem:[%s6957_s2 + $0x50] sm:$0xff]  ;;  %s6752_s2 = scalar_lea.hbm %s6968_s30, %s4102_s9 }
0x1a49   : > { %v2922_v22 = vpack.c.bf16 %v4061_v21, %v4060_v62 }
0x1a4a   : > { %v2882_v36 = vsel %vm1234_vm2, %v2877_v14, 0.0 }
0x1a4b   : > { %2883 = vadd.xlane.f32.xlu1 %v2882_v36  ;;  %4367 = vmatpush3.bf16.msra.mxu1 %v2922_v22 }
0x1a4c   : > { %4368 = vmatprep.subr.bf16.mxu1 %v5481_v0 }
0x1a4f   : > { %4369 = vmatpush3.bf16.msra.mxu1 %v2923_v25 }
0x1a50   : > { %4370 = vmatprep.subr.bf16.mxu1 %v5481_v0 }
0x1a53   : > { %4371 = vmatpush3.bf16.msra.mxu1 %v2924_v28 }
0x1a54   : > { %4384 = vmatprep.subr.bf16.mxu1 %v5481_v0 }
0x1ad8   : > { %v2884_v16 = vpop.xlane.xlu1 %2883 }
0x1ad9   : > { %v2885_v42 = vmul.f32 0.015625, %v2884_v16 }
0x1adb   : > { %v2886_v52 = vsub.f32 %v2877_v14, %v2885_v42 }
0x1add   : > { %v2887_v17 = vmul.f32 %v2886_v52, %v2886_v52 }
0x1adf   : > { %v2888_v18 = vsel %vm1234_vm2, %v2887_v17, 0.0  ;;  %v4068_v17 = vld [vmem:[#allocation15 + $0x1] ss:$0 sm:$0xff] }
0x1ae0   : > { %2889 = vadd.xlane.f32.xlu1 %v2888_v18 }
0x1b6d   : > { %v2890_v29 = vpop.xlane.xlu1 %2889 }
0x1b6e   : > { %v2891_v30 = vmul.f32 0.015625, %v2890_v29 }
0x1b70   : > { %v2892_v9 = vadd.f32 1e-05, %v2891_v30 }
0x1b72   : > { %4757 = vrsqrt.f32 %v2892_v9  ;;  %v4070_v9 = vld [vmem:[#allocation17 + $0x1] ss:$0 sm:$0xff] }
0x1b7c   : > { %v4758_v31 = vpop.eup %4757 }
0x1b7d   : > { %v2894_v34 = vmul.f32 %v4758_v31, %v2886_v52 }
0x1b7f   : > { %v2901_v37 = vmul.f32 %v4056_v32, %v2894_v34  ;;  %v4071_v32 = vld [vmem:[#allocation18 + $0x1] ss:$0 sm:$0xff] }
0x1b81   : > { %v2908_v38 = vadd.f32 %v4057_v35, %v2901_v37 }
0x1b83   : > { %v2920_v39 = vpack.c.bf16 %v2908_v38, %v2908_v38 }
0x1b85   : > { %4373 = vmatmul.mubr.msk.bf16.vlgmr.msra.gmra.mrb[44].mxu1 %vm1234_vm2, %v2920_v39 }
0x1b86   : > { %4392 = vmatprep.mubr.msk.bf16.mxu1 %vm5482_vm0, %v5481_v0  ;;  %4385 = vmatpush3.bf16.msra.mxu1 %v3131_v47 }
0x1b87   : > { %4386 = vmatprep.subr.bf16.mxu1 %v5481_v0 }
0x1c58   : > { %v2968_v33 = vpop.f32.mrb[44].mxu1 }
0x1c59   : > { %v2969_v49 = vadd.f32 %v4066_v48, %v2968_v33  ;;  %v4374_v51 = vpop.f32.mrb[45].mxu1  ;;  %v3123_v48 = vld [vmem:[%s6964_s15 + $0x10] sm:$0xff]  ;;  %v3124_v33 = vld [vmem:[%s6964_s15 + $0x18] sm:$0xff] }
0x1c5a   : > { %v2971_v53 = vpop.f32.mrb[46].mxu1  ;;  %v3125_v51 = vld [vmem:[%s6964_s15 + $0x20] sm:$0xff] }
0x1c5b   : > { %v2975_v58 = vmul.f32 0.70710677, %v2969_v49  ;;  %v4375_v54 = vpop.f32.mrb[47].mxu1  ;;  %v2974_v36 = vmul.f32 0.5, %v2969_v49  ;;  %v3132_v49 = vpack.c.bf16 %v3124_v33, %v3123_v48  ;;  %v3126_v53 = vld [vmem:[%s6964_s15 + $0x28] sm:$0xff] }
0x1c5c   : > { %v3127_v54 = vld [vmem:[%s6964_s15 + $0x30] sm:$0xff]  ;;  %v4080_v48 = vld [vmem:[#allocation29] ss:$0 sm:$0xff] }
0x1c5d   : > { %v2978_v55 = vand.u32 2147483647, %v2975_v58  ;;  %vm2976_vm8 = vcmp.ge.f32.partialorder %v2975_v58, 0.0  ;;  %4387 = vmatpush3.bf16.msra.mxu1 %v3132_v49  ;;  %v3133_v58 = vpack.c.bf16 %v3126_v53, %v3125_v51 }
0x1c5e   : > { %v2977_v13 = vsel %vm2976_vm8, 1.0, %v5491_v7  ;;  %4388 = vmatprep.subr.bf16.mxu1 %v5481_v0 }
0x1c5f   : > { %v2979_v56 = vmul.f32 0.3275911, %v2978_v55  ;;  %v2992_v57 = vsub.f32 0.0, %v2978_v55 }
0x1c61   : > { %v2980_v1 = vadd.f32 1.0, %v2979_v56  ;;  %v2993_v60 = vmul.f32 %v2992_v57, %v2978_v55  ;;  %v3128_v55 = vld [vmem:[%s6964_s15 + $0x38] sm:$0xff]  ;;  %4389 = vmatpush3.bf16.msra.mxu1 %v3133_v58 }
0x1c62   : > { %v3134_v56 = vpack.c.bf16 %v3128_v55, %v3127_v54  ;;  %4390 = vmatprep.subr.bf16.mxu1 %v5481_v0 }
0x1c63   : > { %4759 = vrcp.f32 %v2980_v1  ;;  %v2994_v63 = vmul.f32 1.442695, %v2993_v60 }
0x1c65   : > { %4761 = vpow2.f32 %v2994_v63  ;;  %4391 = vmatpush3.bf16.msra.mxu1 %v3134_v56  ;;  %v4073_v63 = vld [vmem:[#allocation21] ss:$0 sm:$0xff] }
0x1c66   : > { %4412 = vmatprep.subr.bf16.mxu1 %v5481_v0 }
0x1c6d   : > { %v4760_v59 = vpop.eup %4759 }
0x1c6e   : > { %v2983_v61 = vmul.f32 1.0614054, %v4760_v59 }
0x1c6f   : > { %v4762_v11 = vpop.eup %4761 }
0x1c70   : > { %v2984_v15 = vadd.f32 -1.4531521, %v2983_v61  ;;  %v4072_v61 = vld [vmem:[#allocation20] ss:$0 sm:$0xff] }
0x1c72   : > { %v2985_v2 = vmul.f32 %v4760_v59, %v2984_v15 }
0x1c74   : > { %v2986_v3 = vadd.f32 1.4214138, %v2985_v2 }
0x1c76   : > { %v2987_v4 = vmul.f32 %v4760_v59, %v2986_v3 }
0x1c78   : > { %v2988_v5 = vadd.f32 -0.28449672, %v2987_v4 }
0x1c7a   : > { %v2989_v6 = vmul.f32 %v4760_v59, %v2988_v5  ;;  %v3192_v5 = vld [vmem:[#allocation24] sm:$0xff] }
0x1c7c   : > { %v2990_v8 = vadd.f32 0.2548296, %v2989_v6  ;;  %v3193_v6 = vld [vmem:[#allocation24 + $0x8] sm:$0xff] }
0x1c7e   : > { %v2991_v10 = vmul.f32 %v4760_v59, %v2990_v8  ;;  %v3198_v8 = vpack.c.bf16 %v3193_v6, %v3192_v5 }
0x1c80   : > { %v2996_v43 = vmul.f32 %v4762_v11, %v2991_v10  ;;  %v3194_v10 = vld [vmem:[#allocation24 + $0x10] sm:$0xff]  ;;  %v3195_v11 = vld [vmem:[#allocation24 + $0x18] sm:$0xff] }
0x1c82   : > { %v2997_v12 = vsub.f32 1.0, %v2996_v43  ;;  %v3199_v43 = vpack.c.bf16 %v3195_v11, %v3194_v10 }
0x1c84   : > { %v2998_v14 = vmul.f32 %v2997_v12, %v2977_v13  ;;  %v4074_v12 = vld [vmem:[#allocation23] ss:$0 sm:$0xff] }
0x1c86   : > { %v2999_v16 = vadd.f32 1.0, %v2998_v14 }
0x1c88   : > { %v3000_v42 = vmul.f32 %v2999_v16, %v2974_v36 }
0x1c8a   : > { %v3008_v52 = vpack.c.bf16 %v3000_v42, %v3000_v42 }
0x1c8c   : > { %4381 = vmatmul.mubr.msk.bf16.vlgmr.msra.gmra.mrb[48].mxu0 %vm1150_vm1, %v3008_v52 }
0x1c8d   : > { %4400 = vmatprep.mubr.msk.bf16.mxu0 %vm5482_vm0, %v5481_v0  ;;  %4397 = vmatpush3.bf16.msra.mxu0 %v3198_v8 }
0x1c8e   : > { %4398 = vmatprep.subr.bf16.mxu0 %v5481_v0 }
0x1c91   : > { %4399 = vmatpush3.bf16.msra.mxu0 %v3199_v43  ;;  %v3388_v43 = vld [vmem:[#allocation24 + $0x40] sm:$0xff] }
0x1c92   : > { %4404 = vmatprep.subr.bf16.mxu0 %v5481_v0 }
0x1d5f   : > { %v3054_v18 = vpop.f32.mrb[48].mxu0 }
0x1d60   : > { %v3055_v19 = vadd.f32 %v4068_v17, %v3054_v18  ;;  %v4382_v20 = vpop.f32.mrb[49].mxu0 }
0x1d61   : > { %v3057_v50 = vpop.f32.mrb[50].mxu0 }
0x1d62   : > { %v4383_v62 = vpop.f32.mrb[51].mxu0  ;;  %v3060_v21 = vadd.f32 %v3055_v19, %v2908_v38 }
0x1d64   : > { %v3065_v22 = vsel %vm1234_vm2, %v3060_v21, 0.0 }
0x1d65   : > { %3066 = vadd.xlane.f32.xlu1 %v3065_v22  ;;  %v4077_v22 = vld [vmem:[#allocation26] ss:$0 sm:$0xff] }
0x1df2   : > { %v3067_v7 = vpop.xlane.xlu1 %3066 }
0x1df3   : > { %v3068_v23 = vmul.f32 0.015625, %v3067_v7 }
0x1df5   : > { %v3069_v24 = vsub.f32 %v3060_v21, %v3068_v23 }
0x1df7   : > { %v3070_v25 = vmul.f32 %v3069_v24, %v3069_v24 }
0x1df9   : > { %v3071_v26 = vsel %vm1234_vm2, %v3070_v25, 0.0 }
0x1dfa   : > { %3072 = vadd.xlane.f32.xlu1 %v3071_v26 }
0x1e87   : > { %v3073_v27 = vpop.xlane.xlu1 %3072 }
0x1e88   : > { %v3074_v28 = vmul.f32 0.015625, %v3073_v27 }
0x1e8a   : > { %v3075_v29 = vadd.f32 1e-05, %v3074_v28 }
0x1e8c   : > { %4763 = vrsqrt.f32 %v3075_v29 }
0x1e96   : > { %v4764_v30 = vpop.eup %4763 }
0x1e97   : > { %v3077_v31 = vmul.f32 %v4764_v30, %v3069_v24 }
0x1e99   : > { %v3084_v34 = vmul.f32 %v4070_v9, %v3077_v31 }
0x1e9b   : > { %v3091_v35 = vadd.f32 %v4071_v32, %v3084_v34  ;;  %v3289_v32 = vld [vmem:[#allocation24 + $0x20] sm:$0xff]  ;;  %v3290_v34 = vld [vmem:[#allocation24 + $0x28] sm:$0xff] }
0x1e9d   : > { %v3094_v37 = vsel %vm1234_vm2, %v3091_v35, 0.0 }
0x1e9e   : > { %3095 = vadd.xlane.f32.xlu1 %v3094_v37  ;;  %v3296_v37 = vpack.c.bf16 %v3290_v34, %v3289_v32 }
0x1f2b   : > { %v3096_v38 = vpop.xlane.xlu1 %3095 }
0x1f2c   : > { %v3097_v39 = vmul.f32 0.015625, %v3096_v38  ;;  %v3292_v38 = vld [vmem:[#allocation24 + $0x38] sm:$0xff] }
0x1f2e   : > { %v3098_v40 = vsub.f32 %v3091_v35, %v3097_v39  ;;  %v3291_v35 = vld [vmem:[#allocation24 + $0x30] sm:$0xff] }
0x1f2f   : > { %v3297_v39 = vpack.c.bf16 %v3292_v38, %v3291_v35 }
0x1f30   : > { %v3099_v41 = vmul.f32 %v3098_v40, %v3098_v40 }
0x1f32   : > { %v3100_v44 = vsel %vm1234_vm2, %v3099_v41, 0.0 }
0x1f33   : > { %3101 = vadd.xlane.f32.xlu1 %v3100_v44 }
0x1fc0   : > { %v3102_v1 = vpop.xlane.xlu1 %3101 }
0x1fc1   : > { %v3103_v57 = vmul.f32 0.015625, %v3102_v1 }
0x1fc3   : > { %v3104_v59 = vadd.f32 1e-05, %v3103_v57 }
0x1fc5   : > { %4765 = vrsqrt.f32 %v3104_v59 }
0x1fcf   : > { %v4766_v60 = vpop.eup %4765 }
0x1fd0   : > { %v3106_v15 = vmul.f32 %v4766_v60, %v3098_v40  ;;  %v4082_v60 = vld [vmem:[#allocation26 + $0x1] ss:$0 sm:$0xff] }
0x1fd2   : > { %v3113_v2 = vmul.f32 %v4072_v61, %v3106_v15 }
0x1fd4   : > { %v3120_v3 = vadd.f32 %v4073_v63, %v3113_v2 }
0x1fd6   : > { %v3130_v4 = vpack.c.bf16 %v3120_v3, %v3120_v3 }
0x1fd8   : > { %4393 = vmatmul.mubr.msk.bf16.vlgmr.msra.gmra.mrb[48].mxu1 %vm1234_vm2, %v3130_v4 }
0x1fd9   : > { %4416 = vmatprep.mubr.msk.bf16.mxu1 %vm5482_vm0, %v5481_v0 }
0x20ab   : > { %v3178_v13 = vpop.f32.mrb[48].mxu1 }
0x20ac   : > { %v3179_v14 = vadd.f32 %v4074_v12, %v3178_v13  ;;  %v4394_v36 = vpop.f32.mrb[49].mxu1  ;;  %v3389_v12 = vld [vmem:[#allocation24 + $0x48] sm:$0xff]  ;;  %v3390_v13 = vld [vmem:[#allocation24 + $0x50] sm:$0xff] }
0x20ad   : > { %v3181_v16 = vpop.f32.mrb[50].mxu1  ;;  %v3391_v36 = vld [vmem:[#allocation24 + $0x58] sm:$0xff] }
0x20ae   : > { %v3185_v42 = vmin.f32 %v3179_v14, 0.0  ;;  %v4395_v52 = vpop.f32.mrb[51].mxu1  ;;  %vm3184_vm9 = vcmp.gt.f32.partialorder %v3179_v14, 0.0  ;;  %v3396_v16 = vpack.c.bf16 %v3391_v36, %v3390_v13 }
0x20b0   : > { %v3186_v17 = vmul.f32 1.442695, %v3185_v42 }
0x20b2   : > { %4767 = vpow2.f32 %v3186_v17 }
0x20bc   : > { %v4768_v18 = vpop.eup %4767 }
0x20bd   : > { %v4076_v19 = vadd.f32 -1.0, %v4768_v18 }
0x20bf   : > { %v3189_v20 = vmul.f32 1.6732632, %v4076_v19  ;;  %v4084_v19 = vld [vmem:[#allocation27 + $0x1] ss:$0 sm:$0xff] }
0x20c1   : > { %v3190_v50 = vsel %vm3184_vm9, %v3179_v14, %v3189_v20  ;;  %v3395_v14 = vpack.c.bf16 %v3389_v12, %v3388_v43 }
0x20c2   : > { %v3191_v62 = vmul.f32 1.050701, %v3190_v50  ;;  %v4085_v50 = vld [vmem:[#allocation29 + $0x1] ss:$0 sm:$0xff] }
0x20c3   : > { %4413 = vmatpush3.bf16.msra.mxu1 %v3395_v14 }
0x20c4   : > { %v3197_v21 = vpack.c.bf16 %v3191_v62, %v3191_v62  ;;  %4414 = vmatprep.subr.bf16.mxu1 %v5481_v0 }
0x20c6   : > { %4401 = vmatmul.mubr.msk.bf16.vlgmr.msra.gmra.mrb[52].mxu0 %vm1150_vm1, %v3197_v21 }
0x20c7   : > { %4408 = vmatprep.mubr.msk.bf16.mxu0 %vm5482_vm0, %v5481_v0  ;;  %4405 = vmatpush3.bf16.msra.mxu0 %v3296_v37 }
0x20c8   : > { %4406 = vmatprep.subr.bf16.mxu0 %v5481_v0  ;;  %4415 = vmatpush3.bf16.msra.mxu1 %v3396_v16 }
0x20c9   : > { %4428 = vmatprep.subr.bf16.mxu1 %v5481_v0 }
0x20cb   : > { %4407 = vmatpush3.bf16.msra.mxu0 %v3297_v39 }
0x20cc   : > { %4420 = vmatprep.subr.bf16.mxu0 %v5481_v0 }
0x2199   : > { %v3243_v7 = vpop.f32.mrb[52].mxu0 }
0x219a   : > { %v3244_v23 = vadd.f32 %v4077_v22, %v3243_v7  ;;  %v4402_v24 = vpop.f32.mrb[53].mxu0 }
0x219b   : > { %v3246_v25 = vpop.f32.mrb[54].mxu0 }
0x219c   : > { %v4403_v26 = vpop.f32.mrb[55].mxu0  ;;  %v3251_v27 = vsel %vm1150_vm1, %v3244_v23, 0.0 }
0x219d   : > { %3252 = vadd.xlane.f32.xlu0 %v3251_v27 }
0x222a   : > { %v3253_v28 = vpop.xlane.xlu0 %3252 }
0x222b   : > { %v3255_v29 = vmul.f32 0.03125, %v3253_v28 }
0x222d   : > { %v3256_v30 = vsub.f32 %v3244_v23, %v3255_v29 }
0x222f   : > { %v3257_v9 = vmul.f32 %v3256_v30, %v3256_v30 }
0x2231   : > { %v3258_v31 = vsel %vm1150_vm1, %v3257_v9, 0.0 }
0x2232   : > { %3259 = vadd.xlane.f32.xlu1 %v3258_v31 }
0x22bf   : > { %v3260_v40 = vpop.xlane.xlu1 %3259 }
0x22c0   : > { %v3261_v41 = vmul.f32 0.03125, %v3260_v40 }
0x22c2   : > { %v3262_v44 = vadd.f32 1e-05, %v3261_v41 }
0x22c4   : > { %4769 = vrsqrt.f32 %v3262_v44 }
0x22ce   : > { %v4770_v45 = vpop.eup %4769 }
0x22cf   : > { %v3264_v47 = vmul.f32 %v4770_v45, %v3256_v30  ;;  %v4087_v30 = vld [vmem:[#allocation26 + $0x2] ss:$0 sm:$0xff] }
0x22d0   : > { %v3487_v45 = vld [vmem:[#allocation24 + $0x60] sm:$0xff] }
0x22d1   : > { %v3271_v33 = vmul.f32 %v4079_v46, %v3264_v47  ;;  %v3488_v46 = vld [vmem:[#allocation24 + $0x68] sm:$0xff]  ;;  %v3489_v47 = vld [vmem:[#allocation24 + $0x70] sm:$0xff] }
0x22d3   : > { %v3278_v49 = vadd.f32 %v4080_v48, %v3271_v33  ;;  %v3494_v48 = vpack.c.bf16 %v3488_v46, %v3487_v45  ;;  %v3490_v33 = vld [vmem:[#allocation24 + $0x78] sm:$0xff] }
0x22d5   : > { %v3280_v51 = vmin.f32 %v3278_v49, 0.0  ;;  %vm3279_vm10 = vcmp.gt.f32.partialorder %v3278_v49, 0.0 }
0x22d7   : > { %v3281_v53 = vmul.f32 1.442695, %v3280_v51 }
0x22d9   : > { %4771 = vpow2.f32 %v3281_v53 }
0x22e3   : > { %v4772_v58 = vpop.eup %4771 }
0x22e4   : > { %v4081_v54 = vadd.f32 -1.0, %v4772_v58 }
0x22e6   : > { %v3284_v55 = vmul.f32 1.6732632, %v4081_v54 }
0x22e8   : > { %v3285_v56 = vsel %vm3279_vm10, %v3278_v49, %v3284_v55  ;;  %v3495_v49 = vpack.c.bf16 %v3490_v33, %v3489_v47  ;;  %v4089_v55 = vld [vmem:[#allocation27 + $0x2] ss:$0 sm:$0xff] }
0x22e9   : > { %v3286_v1 = vmul.f32 1.050701, %v3285_v56 }
0x22eb   : > { %v3287_v57 = vadd.f32 %v3286_v1, %v3191_v62  ;;  %v4090_v1 = vld [vmem:[#allocation29 + $0x2] ss:$0 sm:$0xff] }
0x22ed   : > { %v3295_v59 = vpack.c.bf16 %v3287_v57, %v3287_v57 }
0x22ef   : > { %4409 = vmatmul.mubr.msk.bf16.vlgmr.msra.gmra.mrb[56].mxu0 %vm1150_vm1, %v3295_v59 }
0x22f0   : > { %4424 = vmatprep.mubr.msk.bf16.mxu0 %vm5482_vm0, %v5481_v0  ;;  %4421 = vmatpush3.bf16.msra.mxu0 %v3494_v48 }
0x22f1   : > { %4422 = vmatprep.subr.bf16.mxu0 %v5481_v0 }
0x22f4   : > { %4423 = vmatpush3.bf16.msra.mxu0 %v3495_v49 }
0x23c2   : > { %v3341_v61 = vpop.f32.mrb[56].mxu0 }
0x23c3   : > { %v3342_v15 = vadd.f32 %v4082_v60, %v3341_v61  ;;  %v4410_v63 = vpop.f32.mrb[57].mxu0 }
0x23c4   : > { %v3344_v2 = vpop.f32.mrb[58].mxu0 }
0x23c5   : > { %v4411_v3 = vpop.f32.mrb[59].mxu0  ;;  %v3351_v4 = vsel %vm1150_vm1, %v3342_v15, 0.0 }
0x23c6   : > { %3352 = vadd.xlane.f32.xlu1 %v3351_v4 }
0x2453   : > { %v3353_v5 = vpop.xlane.xlu1 %3352 }
0x2454   : > { %v3354_v6 = vmul.f32 0.03125, %v3353_v5 }
0x2456   : > { %v3355_v8 = vsub.f32 %v3342_v15, %v3354_v6 }
0x2458   : > { %v3356_v10 = vmul.f32 %v3355_v8, %v3355_v8 }
0x245a   : > { %v3357_v11 = vsel %vm1150_vm1, %v3356_v10, 0.0 }
0x245b   : > { %3358 = vadd.xlane.f32.xlu1 %v3357_v11 }
0x24e8   : > { %v3359_v42 = vpop.xlane.xlu1 %3358 }
0x24e9   : > { %v3360_v52 = vmul.f32 0.03125, %v3359_v42 }
0x24eb   : > { %v3361_v17 = vadd.f32 1e-05, %v3360_v52 }
0x24ed   : > { %4773 = vrsqrt.f32 %v3361_v17 }
0x24f7   : > { %v4774_v18 = vpop.eup %4773 }
0x24f8   : > { %v3363_v20 = vmul.f32 %v4774_v18, %v3355_v8  ;;  %v4092_v8 = vld [vmem:[#allocation26 + $0x3] ss:$0 sm:$0xff] }
0x24f9   : > { %v3585_v18 = vld [vmem:[%s6965_s12] sm:$0xff] }
0x24fa   : > { %v3370_v62 = vmul.f32 %v4084_v19, %v3363_v20  ;;  %v3586_v19 = vld [vmem:[%s6965_s12 + $0x8] sm:$0xff]  ;;  %v3587_v20 = vld [vmem:[%s6965_s12 + $0x10] sm:$0xff] }
0x24fc   : > { %v3377_v21 = vadd.f32 %v4085_v50, %v3370_v62  ;;  %v3591_v50 = vpack.c.bf16 %v3586_v19, %v3585_v18  ;;  %v3588_v62 = vld [vmem:[%s6965_s12 + $0x18] sm:$0xff] }
0x24fe   : > { %v3379_v22 = vmin.f32 %v3377_v21, 0.0  ;;  %vm3378_vm11 = vcmp.gt.f32.partialorder %v3377_v21, 0.0 }
0x2500   : > { %v3380_v7 = vmul.f32 1.442695, %v3379_v22 }
0x2502   : > { %4775 = vpow2.f32 %v3380_v7 }
0x250c   : > { %v4776_v23 = vpop.eup %4775 }
0x250d   : > { %v4086_v24 = vadd.f32 -1.0, %v4776_v23 }
0x250f   : > { %v3383_v25 = vmul.f32 1.6732632, %v4086_v24 }
0x2511   : > { %v3384_v26 = vsel %vm3378_vm11, %v3377_v21, %v3383_v25  ;;  %v3592_v21 = vpack.c.bf16 %v3588_v62, %v3587_v20  ;;  %v4094_v25 = vld [vmem:[#allocation27 + $0x3] ss:$0 sm:$0xff] }
0x2512   : > { %v3385_v27 = vmul.f32 1.050701, %v3384_v26 }
0x2514   : > { %v3386_v28 = vadd.f32 %v3385_v27, %v3287_v57  ;;  %v4095_v27 = vld [vmem:[#allocation29 + $0x3] ss:$0 sm:$0xff] }
0x2516   : > { %v3394_v29 = vpack.c.bf16 %v3386_v28, %v3386_v28 }
0x2518   : > { %4417 = vmatmul.mubr.msk.bf16.vlgmr.msra.gmra.mrb[52].mxu1 %vm1150_vm1, %v3394_v29 }
0x2519   : > { %4432 = vmatprep.mubr.msk.bf16.mxu1 %vm5482_vm0, %v5481_v0  ;;  %4429 = vmatpush3.bf16.msra.mxu1 %v3591_v50 }
0x251a   : > { %4430 = vmatprep.subr.bf16.mxu1 %v5481_v0 }
0x251d   : > { %4431 = vmatpush3.bf16.msra.mxu1 %v3592_v21 }
0x25eb   : > { %v3440_v9 = vpop.f32.mrb[52].mxu1 }
0x25ec   : > { %v3441_v31 = vadd.f32 %v4087_v30, %v3440_v9  ;;  %v4418_v32 = vpop.f32.mrb[53].mxu1 }
0x25ed   : > { %v3443_v34 = vpop.f32.mrb[54].mxu1 }
0x25ee   : > { %v4419_v35 = vpop.f32.mrb[55].mxu1  ;;  %v3450_v37 = vsel %vm1150_vm1, %v3441_v31, 0.0 }
0x25ef   : > { %3451 = vadd.xlane.f32.xlu1 %v3450_v37 }
0x267c   : > { %v3452_v38 = vpop.xlane.xlu1 %3451 }
0x267d   : > { %v3453_v39 = vmul.f32 0.03125, %v3452_v38 }
0x267f   : > { %v3454_v40 = vsub.f32 %v3441_v31, %v3453_v39  ;;  %v4097_v39 = vld [vmem:[#allocation30] ss:$0 sm:$0xff] }
0x2681   : > { %v3455_v41 = vmul.f32 %v3454_v40, %v3454_v40 }
0x2683   : > { %v3456_v44 = vsel %vm1150_vm1, %v3455_v41, 0.0 }
0x2684   : > { %3457 = vadd.xlane.f32.xlu1 %v3456_v44 }
0x2711   : > { %v3458_v51 = vpop.xlane.xlu1 %3457 }
0x2712   : > { %v3459_v53 = vmul.f32 0.03125, %v3458_v51 }
0x2714   : > { %v3460_v58 = vadd.f32 1e-05, %v3459_v53 }
0x2716   : > { %4777 = vrsqrt.f32 %v3460_v58 }
0x2720   : > { %v4778_v54 = vpop.eup %4777 }
0x2721   : > { %v3462_v56 = vmul.f32 %v4778_v54, %v3454_v40 }
0x2723   : > { %v3469_v57 = vmul.f32 %v4089_v55, %v3462_v56 }
0x2725   : > { %v3476_v59 = vadd.f32 %v4090_v1, %v3469_v57  ;;  %v4099_v1 = vld [vmem:[#allocation32] ss:$0 sm:$0xff] }
0x2727   : > { %v3478_v60 = vmin.f32 %v3476_v59, 0.0  ;;  %vm3477_vm12 = vcmp.gt.f32.partialorder %v3476_v59, 0.0 }
0x2729   : > { %v3479_v61 = vmul.f32 1.442695, %v3478_v60 }
0x272b   : > { %4779 = vpow2.f32 %v3479_v61 }
0x2735   : > { %v4780_v15 = vpop.eup %4779 }
0x2736   : > { %v4091_v63 = vadd.f32 -1.0, %v4780_v15 }
0x2738   : > { %v3482_v2 = vmul.f32 1.6732632, %v4091_v63 }
0x273a   : > { %v3483_v3 = vsel %vm3477_vm12, %v3476_v59, %v3482_v2  ;;  %v4100_v59 = vld [vmem:[#allocation33] ss:$0 sm:$0xff] }
0x273b   : > { %v3484_v4 = vmul.f32 1.050701, %v3483_v3 }
0x273d   : > { %v3485_v5 = vadd.f32 %v3484_v4, %v3386_v28 }
0x273f   : > { %v3493_v6 = vpack.c.bf16 %v3485_v5, %v3485_v5 }
0x2741   : > { %4425 = vmatmul.mubr.msk.bf16.vlgmr.msra.gmra.mrb[60].mxu0 %vm1150_vm1, %v3493_v6 }
0x2814   : > { %v3539_v10 = vpop.f32.mrb[60].mxu0 }
0x2815   : > { %v3540_v11 = vadd.f32 %v4092_v8, %v3539_v10  ;;  %v4426_v43 = vpop.f32.mrb[61].mxu0 }
0x2816   : > { %v3542_v12 = vpop.f32.mrb[62].mxu0 }
0x2817   : > { %v4427_v13 = vpop.f32.mrb[63].mxu0  ;;  %v3549_v14 = vsel %vm1150_vm1, %v3540_v11, 0.0 }
0x2818   : > { %3550 = vadd.xlane.f32.xlu1 %v3549_v14 }
0x28a5   : > { %v3551_v36 = vpop.xlane.xlu1 %3550 }
0x28a6   : > { %v3552_v16 = vmul.f32 0.03125, %v3551_v36 }
0x28a8   : > { %v3553_v42 = vsub.f32 %v3540_v11, %v3552_v16 }
0x28aa   : > { %v3554_v52 = vmul.f32 %v3553_v42, %v3553_v42 }
0x28ac   : > { %v3555_v17 = vsel %vm1150_vm1, %v3554_v52, 0.0 }
0x28ad   : > { %3556 = vadd.xlane.f32.xlu1 %v3555_v17 }
0x293a   : > { %v3557_v22 = vpop.xlane.xlu1 %3556 }
0x293b   : > { %v3558_v7 = vmul.f32 0.03125, %v3557_v22 }
0x293d   : > { %v3559_v23 = vadd.f32 1e-05, %v3558_v7 }
0x293f   : > { %4781 = vrsqrt.f32 %v3559_v23 }
0x2949   : > { %v4782_v24 = vpop.eup %4781 }
0x294a   : > { %v3561_v26 = vmul.f32 %v4782_v24, %v3553_v42 }
0x294c   : > { %v3568_v28 = vmul.f32 %v4094_v25, %v3561_v26 }
0x294e   : > { %v3575_v29 = vadd.f32 %v4095_v27, %v3568_v28 }
0x2950   : > { %v3577_v30 = vmin.f32 %v3575_v29, 0.0  ;;  %vm3576_vm13 = vcmp.gt.f32.partialorder %v3575_v29, 0.0 }
0x2952   : > { %v3578_v9 = vmul.f32 1.442695, %v3577_v30 }
0x2954   : > { %4783 = vpow2.f32 %v3578_v9 }
0x295e   : > { %v4784_v31 = vpop.eup %4783 }
0x295f   : > { %v4096_v32 = vadd.f32 -1.0, %v4784_v31 }
0x2961   : > { %v3581_v34 = vmul.f32 1.6732632, %v4096_v32 }
0x2963   : > { %v3582_v35 = vsel %vm3576_vm13, %v3575_v29, %v3581_v34 }
0x2964   : > { %v3583_v0 = vmul.f32 1.050701, %v3582_v35 }
0x2966   : > { %v3584_v37 = vadd.f32 %v3583_v0, %v3485_v5 }
0x2968   : > { %v3590_v38 = vpack.c.bf16 %v3584_v37, %v3584_v37 }
0x296a   : > { %4433 = vmatmul.mubr.msk.bf16.vlgmr.msra.gmra.mrb[56].mxu1 %vm1150_vm1, %v3590_v38 }
0x2a3d   : > { %v3636_v40 = vpop.f32.mrb[56].mxu1 }
0x2a3e   : > { %v3637_v41 = vadd.f32 %v4097_v39, %v3636_v40  ;;  %v4434_v44 = vpop.f32.mrb[57].mxu1 }
0x2a3f   : > { %v3639_v45 = vpop.f32.mrb[58].mxu1 }
0x2a40   : > { %v4435_v46 = vpop.f32.mrb[59].mxu1  ;;  %v3644_v47 = vsel %vm1351_vm6, %v3637_v41, 0.0 }
0x2a41   : > { %3645 = vadd.xlane.f32.xlu0 %v3644_v47 }
0x2ace   : > { %v3646_v48 = vpop.xlane.xlu0 %3645 }
0x2acf   : > { %v3648_v33 = vmul.f32 0.125, %v3646_v48 }
0x2ad1   : > { %v3649_v49 = vsub.f32 %v3637_v41, %v3648_v33 }
0x2ad3   : > { %v3650_v51 = vmul.f32 %v3649_v49, %v3649_v49 }
0x2ad5   : > { %v3651_v53 = vsel %vm1351_vm6, %v3650_v51, 0.0 }
0x2ad6   : > { %3652 = vadd.xlane.f32.xlu1 %v3651_v53 }
0x2b63   : > { %v3653_v58 = vpop.xlane.xlu1 %3652 }
0x2b64   : > { %v3654_v54 = vmul.f32 0.125, %v3653_v58 }
0x2b66   : > { %v3655_v55 = vadd.f32 1e-05, %v3654_v54 }
0x2b68   : > { %4785 = vrsqrt.f32 %v3655_v55 }
0x2b72   : > { %v4786_v56 = vpop.eup %4785 }
0x2b73   : > { %v3657_v57 = vmul.f32 %v4786_v56, %v3649_v49 }
0x2b75   : > { %v3664_v60 = vmul.f32 %v4099_v1, %v3657_v57 }
0x2b77   : > { %v3671_v61 = vadd.f32 %v4100_v59, %v3664_v60 }
0x2b79   : > { %3672 = vst.msk [vmem:[%s1126_s3] sm:$0xff] %vm1351_vm6, %v3671_v61 }
0x2b7a   : > { %5360 = shalt.err (!%p5357_p9)
}
0x2b7b   : > { %s5361_s6 = scalar_lea.hbm %s6752_s2, 128  ;;  %s5365_s5 = scalar_lea.hbm %s6969_s0, 256 }
0x2b7c   : > { %p5362_p10 = scmp.ne.s32.totalorder %s6752_s2, %s5361_s6  ;;  %p5366_p1 = scmp.lt.u32.totalorder %s6752_s2, %s6969_s0 }
0x2b7d   : > { %p5367_p2 = scmp.lt.u32.totalorder %s5365_s5, %s5361_s6  ;;  %p5369_p4 = scmp.lt.u32.totalorder %s5361_s6, %s6752_s2 }
0x2b7e   : > { %p5363_p13 = pnand %p5362_p10, %p6970_p7 }
0x2b7f   : > { %p5368_p3 = por %p5367_p2, %p5366_p1 }
0x2b80   : > { %p5364_p12 = pneg %p5363_p13 }
0x2b81   : > { %p5370_p8 = por %p5369_p4, %p5368_p3 }
0x2b83   : > { %p5371_p11 = pnand %p5370_p8, %p5364_p12 }
0x2b85   : > { %5374 = shalt.err (!%p5371_p11)
}
0x2b86   : > { %4540 = dma.vmem_to_hbm [thread:$0]  (%p6970_p7), %s6754_s27, 128, %s6752_s2, %s3674_s10  }
0x2b87 PF: > { %s6971_s11 = sld [smem:[#allocation51_spill]]  ;;  %s6972_s7 = sld [smem:[#allocation48_spill]] }
0x2b88   : > { %s6973_s1 = sld [smem:[#allocation56_spill]] }
0x2b8d   : > { %p4647_p5 = scmp.ge.s32.totalorder %s6971_s11, 2  ;;  %s3699_s4 = sand.u32 1, %s6972_s7  }
0x2b8e   : > { %p6974_p0 = scmp.ne.s32.totalorder %s6973_s1, 0  ;;  %s3700_s9 = scalar_lea.sflag [#allocation5], %s3699_s4 }
0x2b90   : > { %p4604_p6 = pnand %p4647_p5, %p6974_p0 }
0x2b92   : > { %5436 = dma.done.wait (!%p4604_p6), %s3700_s9, 128  }
0x2b93   : > { %5438 = vsyncadd (!%p4604_p6), %s3700_s9, 4294967168  ;;  %s6975_s30 = sld [smem:[#allocation53_spill]]  ;;  %s6976_s8 = sld [smem:[#allocation49_spill]] }
0x2b94   : > { %s6977_s5 = sld [smem:[#allocation50_spill]]  ;;  %s6978_s9 = sld [smem:[#allocation54_spill]] }
0x2b99   : > { %p49_p9 = scmp.ge.s32.totalorder %s6975_s30, 4  }
0x2b9b   :  { %51 = sbr.rel (!%p49_p9) target bundleno = 34 (0x22), region = 275 }
0x2ba2   :  { %3705 = vsyncpa [#allocation4], 1 }
0x2ba3   :  { %3707 = vsyncpa [#allocation4 + $0x1], 1 }
0x2ba4   :  { %3708 = vsyncpa [#allocation7], 1 }
0x2ba5   :  { %3709 = vsyncpa [#allocation10], 1 }
0x2ba6   :  { %3710 = vsyncpa [#allocation13], 1 }
0x2ba7   :  { %3711 = vsyncpa [#allocation16], 1 }
0x2ba8   :  { %3712 = vsyncpa [#allocation19], 1 }
0x2ba9   :  { %3713 = vsyncpa [#allocation22], 1 }
0x2baa   :  { %3714 = vsyncpa [#allocation25], 1 }
0x2bab   :  { %3715 = vsyncpa [#allocation28], 1 }
0x2bac   :  { %3716 = vsyncpa [#allocation31], 1 }
0x2bad   :  { %3717 = vsyncpa [#allocation34], 1 }
0x2bae   :  { %3718 = vsyncpa [#allocation5], 1 }
0x2baf   :  { %3720 = vsyncpa [#allocation5 + $0x1], 1 }

</bundles_post_ra>
